<compile_context>
chip_gen: v7x
topology: tpu7x:2x2x1
jax: 0.10.0
libtpu: 0.0.40
codegen_flags: <defaults>
</compile_context>

<pallas_src>
import functools

import jax
import jax.numpy as jnp
from jax import lax
from jax.experimental import pallas as pl
from jax.experimental.pallas import tpu as pltpu

EPS = 1e-5


# ----------------------------------------------------------------------------
# Pallas kernel: one block of B batch samples per grid step, fully fused.
# ----------------------------------------------------------------------------
def _opm_kernel(B, H, W, C, M,
                x_ref,              # (B, H, W, C)  bf16 NHWC input block
                w01_ref, t01_ref,   # (9*C, 3*M) bf16, (1, 3*M) f32
                w2_ref, t2_ref,     # (C, M) bf16,     (1, M)  f32
                wd1_ref, bd1_ref,   # (M, R) f32,      (1, R)  f32
                wd2_ref, bd2_ref,   # (R, M) f32,      (1, M)  f32
                out_ref,            # (B, H, W, M) f32
                xpad_ref,           # (B, H+2, W+2, C) f32 scratch (halo pad)
                patch_ref):         # (B*H*W, 9*C) bf16 scratch (im2col)
    HW = H * W
    rows = B * HW

    # In-kernel 1-pixel zero halo. The scratch persists across grid steps but
    # the grid axis may be sharded across TensorCores ("parallel"), so it is
    # re-zeroed every step instead of relying on a program_id(0)==0 init.
    # (f32 scratch: halo/interior stores stay on plain masked 32-bit paths.)
    xpad_ref[...] = jnp.zeros_like(xpad_ref)
    xpad_ref[:, 1:H + 1, 1:W + 1, :] = x_ref[...].astype(xpad_ref.dtype)

    # im2col: 9 shifted ref-slices of the padded tile -> (rows, 9*C) bf16.
    for k in range(9):
        dy, dx = divmod(k, 3)
        patch_ref[:, k * C:(k + 1) * C] = (
            xpad_ref[:, dy:dy + H, dx:dx + W, :]
            .reshape(rows, C).astype(jnp.bfloat16))

    # convx0 + convx1 fused: ONE K=9*C matmul, output columns [x_0 | w | b],
    # bf16 x bf16 -> f32 accumulation on the MXU (BN scale folded into w0).
    acc = jnp.dot(patch_ref[...], w01_ref[...],
                  preferred_element_type=jnp.float32) + t01_ref[...]
    x_0 = jnp.maximum(acc[:, :M], 0.0)                 # relu(bnx0(convx0(x)))
    w_mul = acc[:, M:2 * M]
    b_add = acc[:, 2 * M:]
    f_0 = jnp.maximum(w_mul * x_0 + b_add, 0.0)        # relu(w*x_0 + b)

    # convx2 (1x1) + bnx2: reuse the centre (k=4) slab of the im2col buffer.
    x_2 = jnp.maximum(
        jnp.dot(patch_ref[:, 4 * C:5 * C], w2_ref[...],
                preferred_element_type=jnp.float32) + t2_ref[...], 0.0)

    # AdaptiveAvgPool2d(1) per sample + conv_du squeeze-excite.
    f_1 = jnp.mean(f_0.reshape(B, HW, M), axis=1)      # (B, M)
    z = jnp.maximum(
        jnp.dot(f_1, wd1_ref[...], preferred_element_type=jnp.float32)
        + bd1_ref[...], 0.0)
    att = jax.nn.sigmoid(
        jnp.dot(z, wd2_ref[...], preferred_element_type=jnp.float32)
        + bd2_ref[...])                                # (B, M)

    out = x_2.reshape(B, HW, M) * att[:, None, :]      # per-sample gating
    out_ref[...] = out.reshape(B, H, W, M).astype(out_ref.dtype)


# ----------------------------------------------------------------------------
# Wrapper: layout plumbing + pallas_call setup.
# ----------------------------------------------------------------------------
def opm_forward(x_nchw, kp, *, batch_block=None, out_dtype=jnp.float32):
    N, C, H, W = x_nchw.shape
    M = kp["t2"].shape[1]
    R = kp["bd1"].shape[1]
    assert kp["w01f"].shape == (9 * C, 3 * M)
    HW = H * W

    if batch_block is None:
        # Target ~512 MXU rows per grid step (amortizes the ~0.35us per-step
        # overhead and fills the 256-wide MXU on v6e/v7x) while keeping at
        # least 2 grid steps so the one-time weight DMA and the per-block
        # input prefetch pipeline against compute (and v7x can shard the
        # parallel axis across both TensorCores).
        divisors = [b for b in range(1, N + 1) if N % b == 0]
        cands = [b for b in divisors if b * HW <= 512] or [1]
        pipelined = [b for b in cands if N // b >= 2]
        batch_block = max(pipelined) if pipelined else max(cands)
    B = batch_block
    assert N % B == 0, "batch_block must divide the batch size"

    # bf16 NHWC at the kernel boundary: the MXU consumes bf16 anyway, so this
    # is accuracy-neutral, halves the input HBM DMA and the input VMEM block.
    # The zero halo is built inside the kernel (no wrapper jnp.pad).
    x_nhwc = jnp.transpose(x_nchw, (0, 2, 3, 1)).astype(jnp.bfloat16)

    kernel = functools.partial(_opm_kernel, B, H, W, C, M)

    def const_spec(shape):
        zero = (0,) * len(shape)
        index_map = lambda n: zero
        try:
            # Constant index map -> fetched once, VMEM-resident. Buffered(1)
            # drops the useless second pipeline buffer (~14 MB saved at the
            # production 512-channel width; matters on v7x's 64 MiB VMEM).
            return pl.BlockSpec(shape, index_map, pipeline_mode=pl.Buffered(1))
        except (TypeError, AttributeError):
            return pl.BlockSpec(shape, index_map)

    # Explicit VMEM budget: weights (single-buffered) + double-buffered
    # input/output blocks + pad/im2col scratch + f32 intermediates + headroom.
    in_block = B * HW * C * 2                               # bf16
    out_block = B * HW * M * 4                              # f32
    weight_bytes = ((9 * C * 3 * M + C * M) * 2
                    + (3 * M + M + M * R + R + R * M + M) * 4)
    xpad_bytes = B * (H + 2) * (W + 2) * C * 4
    patch_bytes = B * HW * 9 * C * 2
    interm_bytes = B * HW * 6 * M * 4                       # acc + relu temps
    working_set = (2 * in_block + 2 * out_block + weight_bytes
                   + xpad_bytes + patch_bytes + interm_bytes)
    vmem_limit = int(min(64 << 20,                          # <= v7x physical
                         max(32 << 20, working_set * 3 // 2 + (8 << 20))))

    flops = (2 * N * HW * (9 * C * 3 * M + C * M)
             + 2 * N * (M * R + R * M))
    bytes_accessed = int(N * HW * C * 2 + N * HW * M * 4 + weight_bytes)
    cost = pl.CostEstimate(flops=flops, transcendentals=N * (M + R),
                           bytes_accessed=bytes_accessed)

    out_nhwc = pl.pallas_call(
        kernel,
        out_shape=jax.ShapeDtypeStruct((N, H, W, M), out_dtype),
        grid=(N // B,),
        in_specs=[
            pl.BlockSpec((B, H, W, C), lambda n: (n, 0, 0, 0)),
            const_spec((9 * C, 3 * M)), const_spec((1, 3 * M)),
            const_spec((C, M)), const_spec((1, M)),
            const_spec((M, R)), const_spec((1, R)),
            const_spec((R, M)), const_spec((1, M)),
        ],
        out_specs=pl.BlockSpec((B, H, W, M), lambda n: (n, 0, 0, 0)),
        scratch_shapes=[
            pltpu.VMEM((B, H + 2, W + 2, C), jnp.float32),   # halo-padded tile
            pltpu.VMEM((B * HW, 9 * C), jnp.bfloat16),       # im2col patches
        ],
        compiler_params=pltpu.CompilerParams(
            dimension_semantics=("parallel",),
            vmem_limit_bytes=vmem_limit),
        cost_estimate=cost,
    )(x_nhwc, kp["w01f"], kp["t01"], kp["w2f"], kp["t2"],
      kp["wd1"], kp["bd1"], kp["wd2"], kp["bd2"])

    return jnp.transpose(out_nhwc, (0, 3, 1, 2))       # back to NCHW


# ----------------------------------------------------------------------------
# Deterministic parameter init (PyTorch OIHW layout) + BN folding for kernel.
# ----------------------------------------------------------------------------
def init_torch_params(key, C, M, R):
    ks = jax.random.split(key, 20)

    def nrm(k, shape, fan_in):
        return jax.random.normal(k, shape, jnp.float32) / jnp.sqrt(float(fan_in))

    p = {}
    p["w0"], p["b0"] = nrm(ks[0], (M, C, 3, 3), 9 * C), nrm(ks[1], (M,), M)
    p["w1"], p["b1"] = nrm(ks[2], (2 * M, C, 3, 3), 9 * C), nrm(ks[3], (2 * M,), M)
    p["w2"], p["b2"] = nrm(ks[4], (M, C, 1, 1), C), nrm(ks[5], (M,), M)
    p["wd1"], p["bd1"] = nrm(ks[6], (R, M, 1, 1), M), nrm(ks[7], (R,), R)
    p["wd2"], p["bd2"] = nrm(ks[8], (M, R, 1, 1), R), nrm(ks[9], (M,), M)
    # BatchNorm params (eval-mode running stats), nontrivial but deterministic.
    p["g0"] = 1.0 + 0.1 * jax.random.normal(ks[10], (M,), jnp.float32)
    p["be0"] = 0.1 * jax.random.normal(ks[11], (M,), jnp.float32)
    p["mu0"] = 0.1 * jax.random.normal(ks[12], (M,), jnp.float32)
    p["var0"] = jax.random.uniform(ks[13], (M,), jnp.float32, 0.5, 1.5)
    p["g2"] = 1.0 + 0.1 * jax.random.normal(ks[14], (M,), jnp.float32)
    p["be2"] = 0.1 * jax.random.normal(ks[15], (M,), jnp.float32)
    p["mu2"] = 0.1 * jax.random.normal(ks[16], (M,), jnp.float32)
    p["var2"] = jax.random.uniform(ks[17], (M,), jnp.float32, 0.5, 1.5)
    return p


def fold_params(p):
    M, C = p["w0"].shape[0], p["w0"].shape[1]
    R = p["wd1"].shape[0]
    s0 = p["g0"] / jnp.sqrt(p["var0"] + EPS)
    t0 = (p["b0"] - p["mu0"]) * s0 + p["be0"]
    s2 = p["g2"] / jnp.sqrt(p["var2"] + EPS)
    t2 = (p["b2"] - p["mu2"]) * s2 + p["be2"]
    # OIHW -> (ky, kx, cin, cout) -> (9*C, Cout); BN scale folded into w0.
    w0f = jnp.transpose(p["w0"], (2, 3, 1, 0)).reshape(9 * C, M) * s0[None, :]
    w1f = jnp.transpose(p["w1"], (2, 3, 1, 0)).reshape(9 * C, 2 * M)
    w2f = p["w2"].reshape(M, C).T * s2[None, :]
    wd1 = p["wd1"].reshape(R, M).T
    wd2 = p["wd2"].reshape(M, R).T
    # Concatenate convx0|convx1 so the kernel does ONE K=9*C matmul.
    w01f = jnp.concatenate([w0f, w1f], axis=1)                 # (9C, 3M)
    t01 = jnp.concatenate([t0, p["b1"]], axis=0).reshape(1, 3 * M)
    return dict(
        w01f=w01f.astype(jnp.bfloat16), t01=t01,
        w2f=w2f.astype(jnp.bfloat16), t2=t2.reshape(1, M),
        wd1=wd1, bd1=p["bd1"].reshape(1, R),
        wd2=wd2, bd2=p["bd2"].reshape(1, M),
    )


# ----------------------------------------------------------------------------
# Pure-JAX reference mirroring the PyTorch forward (NCHW, f32, eval-mode BN).
# ----------------------------------------------------------------------------
def _conv_nchw(x, w, b, pad):
    y = lax.conv_general_dilated(
        x, w, (1, 1), [(pad, pad), (pad, pad)],
        dimension_numbers=("NCHW", "OIHW", "NCHW"),
        precision=lax.Precision.HIGHEST)
    return y + b[None, :, None, None]


def _bn_eval(x, g, b, mu, var):
    inv = g / jnp.sqrt(var + EPS)
    return (x - mu[None, :, None, None]) * inv[None, :, None, None] \
        + b[None, :, None, None]


def opm_ref(x, p):
    M = p["w0"].shape[0]
    x_0 = jax.nn.relu(_bn_eval(_conv_nchw(x, p["w0"], p["b0"], 1),
                               p["g0"], p["be0"], p["mu0"], p["var0"]))
    x_1 = _conv_nchw(x, p["w1"], p["b1"], 1)
    w, b = x_1[:, :M], x_1[:, M:]
    f_0 = jax.nn.relu(w * x_0 + b)
    x_2 = jax.nn.relu(_bn_eval(_conv_nchw(x, p["w2"], p["b2"], 0),
                               p["g2"], p["be2"], p["mu2"], p["var2"]))
    f_1 = jnp.mean(f_0, axis=(2, 3), keepdims=True)
    z = jax.nn.relu(_conv_nchw(f_1, p["wd1"], p["bd1"], 0))
    att = jax.nn.sigmoid(_conv_nchw(z, p["wd2"], p["bd2"], 0))
    return x_2 * att


# ----------------------------------------------------------------------------
if __name__ == "__main__":
    # Small shapes consistent with the module: convx2 consumes x0 directly, so
    # in_channel must equal the "512" width; use 128 (and 8 for the "32"
    # squeeze width, preserving the 16x reduction). N=8 exercises a multi-step
    # grid with batch blocking (B=4 -> 256 matmul rows per step, 2 grid steps).
    N, H, W = 8, 8, 8
    C = M = 128
    R = 8

    key = jax.random.PRNGKey(0)
    kx, kparam = jax.random.split(key)
    x = jax.random.normal(kx, (N, C, H, W), jnp.float32)

    torch_params = init_torch_params(kparam, C, M, R)
    kernel_params = fold_params(torch_params)

    out = opm_forward(x, kernel_params)
    out = jax.block_until_ready(out)

    ref = opm_ref(x, torch_params)
    assert out.shape == ref.shape == (N, M, H, W)
    # bf16 inputs/weights with f32 accumulation vs an f32 HIGHEST reference:
    # expected max abs error ~1e-2; 5e-2 still catches structural bugs.
    max_err = float(jnp.max(jnp.abs(out - ref)))
    if not bool(jnp.all(jnp.isfinite(out))) or max_err > 5e-2:
        raise SystemExit(f"mismatch vs reference: max abs err {max_err}")
    print("KERNEL_OK")
</pallas_src>

<mosaic_0001>
module attributes {stable_mosaic.version = 11 : i64} {
  func.func @_opm_kernel(%arg0: i32, %arg1: memref<4x8x8x128xbf16, #tpu.memory_space<vmem>>, %arg2: memref<1152x384xbf16, #tpu.memory_space<vmem>>, %arg3: memref<1x384xf32, #tpu.memory_space<vmem>>, %arg4: memref<128x128xbf16, #tpu.memory_space<vmem>>, %arg5: memref<1x128xf32, #tpu.memory_space<vmem>>, %arg6: memref<128x8xf32, #tpu.memory_space<vmem>>, %arg7: memref<1x8xf32, #tpu.memory_space<vmem>>, %arg8: memref<8x128xf32, #tpu.memory_space<vmem>>, %arg9: memref<1x128xf32, #tpu.memory_space<vmem>>, %arg10: memref<4x8x8x128xf32, #tpu.memory_space<vmem>>, %arg11: memref<4x10x10x128xf32, #tpu.memory_space<vmem>>, %arg12: memref<256x1152xbf16, #tpu.memory_space<vmem>>) attributes {dimension_semantics = [#tpu.dimension_semantics<parallel>], iteration_bounds = array<i64: 2>, scalar_prefetch = 0 : i64, scratch_operands = 2 : i64, tpu.core_type = #tpu.core_type<tc>, window_params = [{transform_indices = @transform_0, window_bounds = array<i64: 4, 8, 8, 128>}, {pipeline_mode = #tpu.pipeline_mode<synchronous>, transform_indices = @transform_1, window_bounds = array<i64: 1152, 384>}, {pipeline_mode = #tpu.pipeline_mode<synchronous>, transform_indices = @transform_2, window_bounds = array<i64: 1, 384>}, {pipeline_mode = #tpu.pipeline_mode<synchronous>, transform_indices = @transform_3, window_bounds = array<i64: 128, 128>}, {pipeline_mode = #tpu.pipeline_mode<synchronous>, transform_indices = @transform_4, window_bounds = array<i64: 1, 128>}, {pipeline_mode = #tpu.pipeline_mode<synchronous>, transform_indices = @transform_5, window_bounds = array<i64: 128, 8>}, {pipeline_mode = #tpu.pipeline_mode<synchronous>, transform_indices = @transform_6, window_bounds = array<i64: 1, 8>}, {pipeline_mode = #tpu.pipeline_mode<synchronous>, transform_indices = @transform_7, window_bounds = array<i64: 8, 128>}, {pipeline_mode = #tpu.pipeline_mode<synchronous>, transform_indices = @transform_8, window_bounds = array<i64: 1, 128>}, {transform_indices = @transform_9, window_bounds = array<i64: 4, 8, 8, 128>}]} {
    %cst = arith.constant 0.000000e+00 : f32
    %0 = vector.broadcast %cst : f32 to vector<4x10x10x128xf32>
    %c0 = arith.constant 0 : index
    %c0_0 = arith.constant 0 : index
    %c0_1 = arith.constant 0 : index
    %c0_2 = arith.constant 0 : index
    %1 = vector.load %arg11[%c0, %c0_0, %c0_1, %c0_2] : memref<4x10x10x128xf32, #tpu.memory_space<vmem>>, vector<4x10x10x128xf32>
    tpu.vector_store %arg11[%c0, %c0_0, %c0_1, %c0_2], %0 {strides = array<i32>} : memref<4x10x10x128xf32, #tpu.memory_space<vmem>>, vector<4x10x10x128xf32>,
    %c0_3 = arith.constant 0 : index
    %c0_4 = arith.constant 0 : index
    %c0_5 = arith.constant 0 : index
    %c0_6 = arith.constant 0 : index
    %2 = vector.load %arg1[%c0_3, %c0_4, %c0_5, %c0_6] : memref<4x8x8x128xbf16, #tpu.memory_space<vmem>>, vector<4x8x8x128xbf16>
    %3 = arith.extf %2 : vector<4x8x8x128xbf16> to vector<4x8x8x128xf32>
    %c0_7 = arith.constant 0 : index
    %c1 = arith.constant 1 : index
    %c1_8 = arith.constant 1 : index
    %c0_9 = arith.constant 0 : index
    %4 = vector.load %arg11[%c0_7, %c1, %c1_8, %c0_9] : memref<4x10x10x128xf32, #tpu.memory_space<vmem>>, vector<4x8x8x128xf32>
    tpu.vector_store %arg11[%c0_7, %c1, %c1_8, %c0_9], %3 {strides = array<i32>} : memref<4x10x10x128xf32, #tpu.memory_space<vmem>>, vector<4x8x8x128xf32>,
    %c0_10 = arith.constant 0 : index
    %c0_11 = arith.constant 0 : index
    %c0_12 = arith.constant 0 : index
    %c0_13 = arith.constant 0 : index
    %5 = vector.load %arg11[%c0_10, %c0_11, %c0_12, %c0_13] : memref<4x10x10x128xf32, #tpu.memory_space<vmem>>, vector<4x8x8x128xf32>
    %6 = vector.shape_cast %5 : vector<4x8x8x128xf32> to vector<256x128xf32>
    %7 = arith.truncf %6 : vector<256x128xf32> to vector<256x128xbf16>
    %c0_14 = arith.constant 0 : index
    %c0_15 = arith.constant 0 : index
    %8 = vector.load %arg12[%c0_14, %c0_15] : memref<256x1152xbf16, #tpu.memory_space<vmem>>, vector<256x128xbf16>
    tpu.vector_store %arg12[%c0_14, %c0_15], %7 {strides = array<i32>} : memref<256x1152xbf16, #tpu.memory_space<vmem>>, vector<256x128xbf16>,
    %c0_16 = arith.constant 0 : index
    %c0_17 = arith.constant 0 : index
    %c1_18 = arith.constant 1 : index
    %c0_19 = arith.constant 0 : index
    %9 = vector.load %arg11[%c0_16, %c0_17, %c1_18, %c0_19] : memref<4x10x10x128xf32, #tpu.memory_space<vmem>>, vector<4x8x8x128xf32>
    %10 = vector.shape_cast %9 : vector<4x8x8x128xf32> to vector<256x128xf32>
    %11 = arith.truncf %10 : vector<256x128xf32> to vector<256x128xbf16>
    %c0_20 = arith.constant 0 : index
    %c128 = arith.constant 128 : index
    %12 = vector.load %arg12[%c0_20, %c128] : memref<256x1152xbf16, #tpu.memory_space<vmem>>, vector<256x128xbf16>
    tpu.vector_store %arg12[%c0_20, %c128], %11 {strides = array<i32>} : memref<256x1152xbf16, #tpu.memory_space<vmem>>, vector<256x128xbf16>,
    %c0_21 = arith.constant 0 : index
    %c0_22 = arith.constant 0 : index
    %c2 = arith.constant 2 : index
    %c0_23 = arith.constant 0 : index
    %13 = vector.load %arg11[%c0_21, %c0_22, %c2, %c0_23] : memref<4x10x10x128xf32, #tpu.memory_space<vmem>>, vector<4x8x8x128xf32>
    %14 = vector.shape_cast %13 : vector<4x8x8x128xf32> to vector<256x128xf32>
    %15 = arith.truncf %14 : vector<256x128xf32> to vector<256x128xbf16>
    %c0_24 = arith.constant 0 : index
    %c256 = arith.constant 256 : index
    %16 = vector.load %arg12[%c0_24, %c256] : memref<256x1152xbf16, #tpu.memory_space<vmem>>, vector<256x128xbf16>
    tpu.vector_store %arg12[%c0_24, %c256], %15 {strides = array<i32>} : memref<256x1152xbf16, #tpu.memory_space<vmem>>, vector<256x128xbf16>,
    %c0_25 = arith.constant 0 : index
    %c1_26 = arith.constant 1 : index
    %c0_27 = arith.constant 0 : index
    %c0_28 = arith.constant 0 : index
    %17 = vector.load %arg11[%c0_25, %c1_26, %c0_27, %c0_28] : memref<4x10x10x128xf32, #tpu.memory_space<vmem>>, vector<4x8x8x128xf32>
    %18 = vector.shape_cast %17 : vector<4x8x8x128xf32> to vector<256x128xf32>
    %19 = arith.truncf %18 : vector<256x128xf32> to vector<256x128xbf16>
    %c0_29 = arith.constant 0 : index
    %c384 = arith.constant 384 : index
    %20 = vector.load %arg12[%c0_29, %c384] : memref<256x1152xbf16, #tpu.memory_space<vmem>>, vector<256x128xbf16>
    tpu.vector_store %arg12[%c0_29, %c384], %19 {strides = array<i32>} : memref<256x1152xbf16, #tpu.memory_space<vmem>>, vector<256x128xbf16>,
    %c0_30 = arith.constant 0 : index
    %c1_31 = arith.constant 1 : index
    %c1_32 = arith.constant 1 : index
    %c0_33 = arith.constant 0 : index
    %21 = vector.load %arg11[%c0_30, %c1_31, %c1_32, %c0_33] : memref<4x10x10x128xf32, #tpu.memory_space<vmem>>, vector<4x8x8x128xf32>
    %22 = vector.shape_cast %21 : vector<4x8x8x128xf32> to vector<256x128xf32>
    %23 = arith.truncf %22 : vector<256x128xf32> to vector<256x128xbf16>
    %c0_34 = arith.constant 0 : index
    %c512 = arith.constant 512 : index
    %24 = vector.load %arg12[%c0_34, %c512] : memref<256x1152xbf16, #tpu.memory_space<vmem>>, vector<256x128xbf16>
    tpu.vector_store %arg12[%c0_34, %c512], %23 {strides = array<i32>} : memref<256x1152xbf16, #tpu.memory_space<vmem>>, vector<256x128xbf16>,
    %c0_35 = arith.constant 0 : index
    %c1_36 = arith.constant 1 : index
    %c2_37 = arith.constant 2 : index
    %c0_38 = arith.constant 0 : index
    %25 = vector.load %arg11[%c0_35, %c1_36, %c2_37, %c0_38] : memref<4x10x10x128xf32, #tpu.memory_space<vmem>>, vector<4x8x8x128xf32>
    %26 = vector.shape_cast %25 : vector<4x8x8x128xf32> to vector<256x128xf32>
    %27 = arith.truncf %26 : vector<256x128xf32> to vector<256x128xbf16>
    %c0_39 = arith.constant 0 : index
    %c640 = arith.constant 640 : index
    %28 = vector.load %arg12[%c0_39, %c640] : memref<256x1152xbf16, #tpu.memory_space<vmem>>, vector<256x128xbf16>
    tpu.vector_store %arg12[%c0_39, %c640], %27 {strides = array<i32>} : memref<256x1152xbf16, #tpu.memory_space<vmem>>, vector<256x128xbf16>,
    %c0_40 = arith.constant 0 : index
    %c2_41 = arith.constant 2 : index
    %c0_42 = arith.constant 0 : index
    %c0_43 = arith.constant 0 : index
    %29 = vector.load %arg11[%c0_40, %c2_41, %c0_42, %c0_43] : memref<4x10x10x128xf32, #tpu.memory_space<vmem>>, vector<4x8x8x128xf32>
    %30 = vector.shape_cast %29 : vector<4x8x8x128xf32> to vector<256x128xf32>
    %31 = arith.truncf %30 : vector<256x128xf32> to vector<256x128xbf16>
    %c0_44 = arith.constant 0 : index
    %c768 = arith.constant 768 : index
    %32 = vector.load %arg12[%c0_44, %c768] : memref<256x1152xbf16, #tpu.memory_space<vmem>>, vector<256x128xbf16>
    tpu.vector_store %arg12[%c0_44, %c768], %31 {strides = array<i32>} : memref<256x1152xbf16, #tpu.memory_space<vmem>>, vector<256x128xbf16>,
    %c0_45 = arith.constant 0 : index
    %c2_46 = arith.constant 2 : index
    %c1_47 = arith.constant 1 : index
    %c0_48 = arith.constant 0 : index
    %33 = vector.load %arg11[%c0_45, %c2_46, %c1_47, %c0_48] : memref<4x10x10x128xf32, #tpu.memory_space<vmem>>, vector<4x8x8x128xf32>
    %34 = vector.shape_cast %33 : vector<4x8x8x128xf32> to vector<256x128xf32>
    %35 = arith.truncf %34 : vector<256x128xf32> to vector<256x128xbf16>
    %c0_49 = arith.constant 0 : index
    %c896 = arith.constant 896 : index
    %36 = vector.load %arg12[%c0_49, %c896] : memref<256x1152xbf16, #tpu.memory_space<vmem>>, vector<256x128xbf16>
    tpu.vector_store %arg12[%c0_49, %c896], %35 {strides = array<i32>} : memref<256x1152xbf16, #tpu.memory_space<vmem>>, vector<256x128xbf16>,
    %c0_50 = arith.constant 0 : index
    %c2_51 = arith.constant 2 : index
    %c2_52 = arith.constant 2 : index
    %c0_53 = arith.constant 0 : index
    %37 = vector.load %arg11[%c0_50, %c2_51, %c2_52, %c0_53] : memref<4x10x10x128xf32, #tpu.memory_space<vmem>>, vector<4x8x8x128xf32>
    %38 = vector.shape_cast %37 : vector<4x8x8x128xf32> to vector<256x128xf32>
    %39 = arith.truncf %38 : vector<256x128xf32> to vector<256x128xbf16>
    %c0_54 = arith.constant 0 : index
    %c1024 = arith.constant 1024 : index
    %40 = vector.load %arg12[%c0_54, %c1024] : memref<256x1152xbf16, #tpu.memory_space<vmem>>, vector<256x128xbf16>
    tpu.vector_store %arg12[%c0_54, %c1024], %39 {strides = array<i32>} : memref<256x1152xbf16, #tpu.memory_space<vmem>>, vector<256x128xbf16>,
    %c0_55 = arith.constant 0 : index
    %c0_56 = arith.constant 0 : index
    %41 = vector.load %arg12[%c0_55, %c0_56] : memref<256x1152xbf16, #tpu.memory_space<vmem>>, vector<256x1152xbf16>
    %c0_57 = arith.constant 0 : index
    %c0_58 = arith.constant 0 : index
    %42 = vector.load %arg2[%c0_57, %c0_58] : memref<1152x384xbf16, #tpu.memory_space<vmem>>, vector<1152x384xbf16>
    %cst_59 = arith.constant dense<0.000000e+00> : vector<256x384xf32>
    %43 = tpu.matmul %41, %42, %cst_59 {dimension_numbers = #tpu.dot_dimension_numbers<[1], [0], [0], [1], [0, 0, 1, 1], [], []>} : vector<256x1152xbf16>, vector<1152x384xbf16>, vector<256x384xf32> -> vector<256x384xf32>
    %c0_60 = arith.constant 0 : index
    %c0_61 = arith.constant 0 : index
    %44 = vector.load %arg3[%c0_60, %c0_61] : memref<1x384xf32, #tpu.memory_space<vmem>>, vector<1x384xf32>
    %45 = vector.broadcast %44 : vector<1x384xf32> to vector<256x384xf32>
    %46 = arith.addf %43, %45 : vector<256x384xf32>
    %47 = vector.extract_strided_slice %46 {offsets = [0, 0], sizes = [256, 128], strides = [1, 1]} : vector<256x384xf32> to vector<256x128xf32>
    %cst_62 = arith.constant 0.000000e+00 : f32
    %48 = vector.broadcast %cst_62 : f32 to vector<256x128xf32>
    %49 = arith.maximumf %47, %48 : vector<256x128xf32>
    %50 = vector.extract_strided_slice %46 {offsets = [0, 128], sizes = [256, 128], strides = [1, 1]} : vector<256x384xf32> to vector<256x128xf32>
    %51 = vector.extract_strided_slice %46 {offsets = [0, 256], sizes = [256, 128], strides = [1, 1]} : vector<256x384xf32> to vector<256x128xf32>
    %52 = arith.mulf %50, %49 : vector<256x128xf32>
    %53 = arith.addf %52, %51 : vector<256x128xf32>
    %cst_63 = arith.constant 0.000000e+00 : f32
    %54 = vector.broadcast %cst_63 : f32 to vector<256x128xf32>
    %55 = arith.maximumf %53, %54 : vector<256x128xf32>
    %c0_64 = arith.constant 0 : index
    %c512_65 = arith.constant 512 : index
    %56 = vector.load %arg12[%c0_64, %c512_65] : memref<256x1152xbf16, #tpu.memory_space<vmem>>, vector<256x128xbf16>
    %c0_66 = arith.constant 0 : index
    %c0_67 = arith.constant 0 : index
    %57 = vector.load %arg4[%c0_66, %c0_67] : memref<128x128xbf16, #tpu.memory_space<vmem>>, vector<128x128xbf16>
    %cst_68 = arith.constant dense<0.000000e+00> : vector<256x128xf32>
    %58 = tpu.matmul %56, %57, %cst_68 {dimension_numbers = #tpu.dot_dimension_numbers<[1], [0], [0], [1], [0, 0, 1, 1], [], []>} : vector<256x128xbf16>, vector<128x128xbf16>, vector<256x128xf32> -> vector<256x128xf32>
    %c0_69 = arith.constant 0 : index
    %c0_70 = arith.constant 0 : index
    %59 = vector.load %arg5[%c0_69, %c0_70] : memref<1x128xf32, #tpu.memory_space<vmem>>, vector<1x128xf32>
    %60 = vector.broadcast %59 : vector<1x128xf32> to vector<256x128xf32>
    %61 = arith.addf %58, %60 : vector<256x128xf32>
    %cst_71 = arith.constant 0.000000e+00 : f32
    %62 = vector.broadcast %cst_71 : f32 to vector<256x128xf32>
    %63 = arith.maximumf %61, %62 : vector<256x128xf32>
    %64 = vector.shape_cast %55 : vector<256x128xf32> to vector<4x64x128xf32>
    %cst_72 = arith.constant dense<0.000000e+00> : vector<4x128xf32>
    %65 = vector.multi_reduction <add>, %64, %cst_72 [1] : vector<4x64x128xf32> to vector<4x128xf32>
    %cst_73 = arith.constant 6.400000e+01 : f32
    %66 = vector.broadcast %cst_73 : f32 to vector<4x128xf32>
    %67 = arith.divf %65, %66 : vector<4x128xf32>
    %c0_74 = arith.constant 0 : index
    %c0_75 = arith.constant 0 : index
    %68 = vector.load %arg6[%c0_74, %c0_75] : memref<128x8xf32, #tpu.memory_space<vmem>>, vector<128x8xf32>
    %cst_76 = arith.constant dense<0.000000e+00> : vector<4x8xf32>
    %69 = tpu.matmul %67, %68, %cst_76 {dimension_numbers = #tpu.dot_dimension_numbers<[1], [0], [0], [1], [0, 0, 1, 1], [], []>} : vector<4x128xf32>, vector<128x8xf32>, vector<4x8xf32> -> vector<4x8xf32>
    %c0_77 = arith.constant 0 : index
    %c0_78 = arith.constant 0 : index
    %70 = vector.load %arg7[%c0_77, %c0_78] : memref<1x8xf32, #tpu.memory_space<vmem>>, vector<1x8xf32>
    %71 = vector.broadcast %70 : vector<1x8xf32> to vector<4x8xf32>
    %72 = arith.addf %69, %71 : vector<4x8xf32>
    %cst_79 = arith.constant 0.000000e+00 : f32
    %73 = vector.broadcast %cst_79 : f32 to vector<4x8xf32>
    %74 = arith.maximumf %72, %73 : vector<4x8xf32>
    %c0_80 = arith.constant 0 : index
    %c0_81 = arith.constant 0 : index
    %75 = vector.load %arg8[%c0_80, %c0_81] : memref<8x128xf32, #tpu.memory_space<vmem>>, vector<8x128xf32>
    %cst_82 = arith.constant dense<0.000000e+00> : vector<4x128xf32>
    %76 = tpu.matmul %74, %75, %cst_82 {dimension_numbers = #tpu.dot_dimension_numbers<[1], [0], [0], [1], [0, 0, 1, 1], [], []>} : vector<4x8xf32>, vector<8x128xf32>, vector<4x128xf32> -> vector<4x128xf32>
    %c0_83 = arith.constant 0 : index
    %c0_84 = arith.constant 0 : index
    %77 = vector.load %arg9[%c0_83, %c0_84] : memref<1x128xf32, #tpu.memory_space<vmem>>, vector<1x128xf32>
    %78 = vector.broadcast %77 : vector<1x128xf32> to vector<4x128xf32>
    %79 = arith.addf %76, %78 : vector<4x128xf32>
    %80 = arith.negf %79 : vector<4x128xf32>
    %81 = math.exp %80 : vector<4x128xf32>
    %cst_85 = arith.constant 1.000000e+00 : f32
    %82 = vector.broadcast %cst_85 : f32 to vector<4x128xf32>
    %83 = arith.addf %82, %81 : vector<4x128xf32>
    %84 = arith.divf %82, %83 : vector<4x128xf32>
    %85 = vector.shape_cast %63 : vector<256x128xf32> to vector<4x64x128xf32>
    %86 = vector.shape_cast %84 : vector<4x128xf32> to vector<4x1x128xf32>
    %87 = vector.broadcast %86 : vector<4x1x128xf32> to vector<4x64x128xf32>
    %88 = arith.mulf %85, %87 : vector<4x64x128xf32>
    %89 = vector.shape_cast %88 : vector<4x64x128xf32> to vector<4x8x8x128xf32>
    %c0_86 = arith.constant 0 : index
    %c0_87 = arith.constant 0 : index
    %c0_88 = arith.constant 0 : index
    %c0_89 = arith.constant 0 : index
    %90 = vector.load %arg10[%c0_86, %c0_87, %c0_88, %c0_89] : memref<4x8x8x128xf32, #tpu.memory_space<vmem>>, vector<4x8x8x128xf32>
    tpu.vector_store %arg10[%c0_86, %c0_87, %c0_88, %c0_89], %89 {strides = array<i32>} : memref<4x8x8x128xf32, #tpu.memory_space<vmem>>, vector<4x8x8x128xf32>,
    return
  }
  func.func @transform_0(%arg0: i32) -> (i32, i32, i32, i32) {
    %c0_i32 = arith.constant 0 : i32
    %c0_i32_0 = arith.constant 0 : i32
    %c0_i32_1 = arith.constant 0 : i32
    %c0_i32_2 = arith.constant 0 : i32
    return %arg0, %c0_i32, %c0_i32_0, %c0_i32_1 : i32, i32, i32, i32
  }
  func.func @transform_1(%arg0: i32) -> (i32, i32) {
    %c0_i32 = arith.constant 0 : i32
    %c0_i32_0 = arith.constant 0 : i32
    %c0_i32_1 = arith.constant 0 : i32
    return %c0_i32, %c0_i32_0 : i32, i32
  }
  func.func @transform_2(%arg0: i32) -> (i32, i32) {
    %c0_i32 = arith.constant 0 : i32
    %c0_i32_0 = arith.constant 0 : i32
    %c0_i32_1 = arith.constant 0 : i32
    return %c0_i32, %c0_i32_0 : i32, i32
  }
  func.func @transform_3(%arg0: i32) -> (i32, i32) {
    %c0_i32 = arith.constant 0 : i32
    %c0_i32_0 = arith.constant 0 : i32
    %c0_i32_1 = arith.constant 0 : i32
    return %c0_i32, %c0_i32_0 : i32, i32
  }
  func.func @transform_4(%arg0: i32) -> (i32, i32) {
    %c0_i32 = arith.constant 0 : i32
    %c0_i32_0 = arith.constant 0 : i32
    %c0_i32_1 = arith.constant 0 : i32
    return %c0_i32, %c0_i32_0 : i32, i32
  }
  func.func @transform_5(%arg0: i32) -> (i32, i32) {
    %c0_i32 = arith.constant 0 : i32
    %c0_i32_0 = arith.constant 0 : i32
    %c0_i32_1 = arith.constant 0 : i32
    return %c0_i32, %c0_i32_0 : i32, i32
  }
  func.func @transform_6(%arg0: i32) -> (i32, i32) {
    %c0_i32 = arith.constant 0 : i32
    %c0_i32_0 = arith.constant 0 : i32
    %c0_i32_1 = arith.constant 0 : i32
    return %c0_i32, %c0_i32_0 : i32, i32
  }
  func.func @transform_7(%arg0: i32) -> (i32, i32) {
    %c0_i32 = arith.constant 0 : i32
    %c0_i32_0 = arith.constant 0 : i32
    %c0_i32_1 = arith.constant 0 : i32
    return %c0_i32, %c0_i32_0 : i32, i32
  }
  func.func @transform_8(%arg0: i32) -> (i32, i32) {
    %c0_i32 = arith.constant 0 : i32
    %c0_i32_0 = arith.constant 0 : i32
    %c0_i32_1 = arith.constant 0 : i32
    return %c0_i32, %c0_i32_0 : i32, i32
  }
  func.func @transform_9(%arg0: i32) -> (i32, i32, i32, i32) {
    %c0_i32 = arith.constant 0 : i32
    %c0_i32_0 = arith.constant 0 : i32
    %c0_i32_1 = arith.constant 0 : i32
    %c0_i32_2 = arith.constant 0 : i32
    return %arg0, %c0_i32, %c0_i32_0, %c0_i32_1 : i32, i32, i32, i32
  }
}

</mosaic_0001>

<bundles_post_ra>
// kernel: tpu_custom_call.1
= control target key start
LH: loop header
LB: loop body
LE: loop exit
PB: predicated region body
PF: predicated region fallthrough
CT: control target
= control target key end

     0   :  { %14 = vsyncpa [#allocation5], 0  ;;  %s9252_s0 = inlined_call_operand.hbm [shape: bf16[8,8,8,128], index: 0, kind: input, shape index: {}]   ;;  %s9253_s1 = inlined_call_operand.hbm [shape: bf16[1152,384], index: 1, kind: input, shape index: {}]   ;;  %s9254_s2 = inlined_call_operand.vmem [shape: f32[1,384], index: 2, kind: input, shape index: {}]   ;;  %s9255_s3 = inlined_call_operand.vmem [shape: bf16[128,128], index: 3, kind: input, shape index: {}]   ;;  %s9256_s4 = inlined_call_operand.vmem [shape: f32[1,128], index: 4, kind: input, shape index: {}]   ;;  %s9257_s5 = inlined_call_operand.vmem [shape: f32[128,8], index: 5, kind: input, shape index: {}]   ;;  %s9258_s6 = inlined_call_operand.vmem [shape: f32[1,8], index: 6, kind: input, shape index: {}]   ;;  %s9259_s7 = inlined_call_operand.vmem [shape: f32[8,128], index: 7, kind: input, shape index: {}]   ;;  %s9260_s8 = inlined_call_operand.vmem [shape: f32[1,128], index: 8, kind: input, shape index: {}]   ;;  %s9261_s9 = inlined_call_operand.hbm [shape: f32[8,8,8,128], index: 9, kind: output, shape index: {}]  }
   0x1   :  { %16 = vsyncpa [#allocation5 + $0x1], 0 }
   0x2   :  { %17 = vsyncpa [#allocation8], 0 }
   0x3   :  { %18 = vsyncpa [#allocation6], 0 }
   0x4   :  { %20 = vsyncpa [#allocation6 + $0x1], 0  ;;  %s7267_s30 = smov 0   ;;  %s7269_s10 = smov 0  }
   0x5   :  { %s7271_s11 = smov 0   ;;  %s7273_s12 = smov 0  }
   0x6 LB: > { %s7288_s13 = sadd.s32 4294967295, %s7201_s12   ;;  %s5360_s14 = sadd.s32 4294967294, %s7201_s12   ;;  %s7201_s12 = sphi %s7273_s12, %s9369_s12   ;;  %s7197_s11 = sphi %s7271_s11, %s9372_s11   ;;  %s7193_s10 = sphi %s7269_s10, %s9371_s10   ;;  %s7189_s30 = sphi %s7267_s30, %s9370_s30  }
   0x7   : > { %p46_p0 = scmp.ne.s32.totalorder %s7193_s10, %s7189_s30  ;;  %p9262_p1 = scmp.eq.s32.totalorder %s7288_s13, 0 }
   0x8   : > { %p244_p3 = scmp.eq.s32.totalorder %s5360_s14, 1  ;;  %p5361_p5 = scmp.ge.s32.totalorder %s7201_s12, 1 }
   0x9   : > { %p7297_p4 = por %p9262_p1, %p46_p0  ;;  %p251_p7 = scmp.lt.s32.totalorder %s7201_s12, 3 }
   0xa   : > { %p7302_p6 = por %p244_p3, %p46_p0  ;;  %s7203_s18 = smov [#allocation7]  }
   0xb   : > { %s9289_s15 = scalar_select %p7297_p4, 1, 0 }
   0xc   : > { %s9290_s16 = scalar_select %p7302_p6, 1, 0 }
   0xd   : > { %p7307_p8 = pnand %p5361_p5, %p251_p7  ;;  %s263_s19 = sshll.u32 %s7203_s18, 4  ;;  %s7311_s19 = int_to_ptr.vmem [resolvable:$true] %s263_s19 }
   0xe   : > { %9291 = sst [smem:[#allocation13_spill]] %s9290_s16  ;;  %s7323_s21 = sadd.s32 1, %s7201_s12  }
   0xf   : > { %s9292_s17 = scalar_select %p7307_p8, 1, 0 }
  0x10   : > { %p6693_p9 = pneg %p7307_p8  ;;  %9294 = sst [smem:[#allocation14_spill]] %s7323_s21 }
  0x11   : > { %s33_s22 = sadd.s32 1, %s7197_s11  ;;  %s30_s23 = ssub.s32 %s7201_s12, %s7323_s21 }
  0x12   : > { %p7318_p11 = pnand %p6693_p9, %p9262_p1  ;;  %s7073_s26 = scalar_lea.hbm %s9253_s1, 27648 }
  0x13   : > { %p7074_p12 = scmp.ne.s32.totalorder %s9253_s1, %s7073_s26  ;;  %p7080_p5 = scmp.lt.u32.totalorder %s7073_s26, %s9253_s1 }
  0x14   : > { %p7075_p13 = pneg %p7318_p11 }
  0x16   : > { %p7076_p0 = pnand %p7075_p13, %p7074_p12 }
  0x18   : > { %p7077_p3 = pneg %p7076_p0 }
  0x1a   : > { %p7082_p7 = pnand %p7080_p5, %p7077_p3 }
  0x1c   : > { %7085 = shalt.err (!%p7082_p7)
}
  0x1d   : > { %s7086_s18 = scalar_lea.vmem %s7311_s19, 27648  ;;  %p7094_p2 = scmp.lt.s32.totalorder %s7311_s19, %s7311_s19 }
  0x1e   : > { %p7087_p9 = scmp.ne.s32.totalorder %s7311_s19, %s7086_s18  ;;  %p7095_p6 = scmp.lt.s32.totalorder %s7086_s18, %s7086_s18 }
  0x20   : > { %p7089_p10 = pnand %p7087_p9, %p7075_p13  ;;  %p7096_p4 = por %p7095_p6, %p7094_p2 }
  0x22   : > { %p7090_p1 = pneg %p7089_p10 }
  0x24   : > { %p7097_p8 = pnand %p7096_p4, %p7090_p1 }
  0x26   : > { %7100 = shalt.err (!%p7097_p8)
}
  0x27   : > { %s7204_s24 = smov 192   ;;  %s7205_s25 = smov 12  }
  0x28   : > { %6696 = dma.hbm_to_vmem [thread:$0]  (!%p7318_p11), %s9253_s1, 27648, %s7311_s19, [#allocation8], %s7204_s24, %s7204_s24, %s7205_s25  }
  0x29   : > { %p31_p2 = scmp.eq.s32.totalorder %s30_s23, 0  ;;  %p40_p1 = scmp.ne.s32.totalorder %s7197_s11, %s7193_s10 }
  0x2a   : > { %p41_p4 = scmp.eq.s32.totalorder %s7201_s12, 0  ;;  %p6706_p6 = scmp.lt.s32.totalorder %s7201_s12, 2 }
  0x2b   : > { %s7354_s28 = scalar_select %p31_p2, %s7197_s11, %s33_s22  }
  0x2c   : > { %p42_p8 = por %p41_p4, %p40_p1  ;;  %p9295_p10 = scmp.eq.s32.totalorder %s7288_s13, 1 }
  0x2d   : > { %s298_s14 = sand.u32 1, %s7197_s11   ;;  %s5608_s18 = sshll.u32 %s7201_s12, 11 }
  0x2e   : > { %p7358_p12 = por %p9295_p10, %p40_p1  ;;  %s5364_s21 = sshll.u32 %s298_s14, 7 }
  0x2f   : > { %s7367_s26 = scalar_lea.hbm %s9252_s0, %s5608_s18  ;;  %s302_s19 = scalar_lea.vmem [#allocation4], %s5364_s21 }
  0x30   : > { %s310_s22 = sshll.u32 %s302_s19, 4  ;;  %p7369_p11 = pnand %p6706_p6, %p42_p8  ;;  %s7373_s22 = int_to_ptr.vmem [resolvable:$true] %s310_s22 }
  0x31   : > { %s7375_s24 = scalar_lea.sflag [#allocation5], %s298_s14  ;;  %s7101_s25 = scalar_lea.hbm %s7367_s26, 2048 }
  0x32   : > { %p7102_p13 = scmp.ne.s32.totalorder %s7367_s26, %s7101_s25  ;;  %p7103_p0 = pneg %p7369_p11 }
  0x33   : > { %s7106_s27 = scalar_lea.hbm %s9252_s0, 4096  ;;  %p7107_p7 = scmp.lt.u32.totalorder %s7367_s26, %s9252_s0 }
  0x34   : > { %p7104_p3 = pnand %p7103_p0, %p7102_p13  ;;  %p7108_p9 = scmp.lt.u32.totalorder %s7106_s27, %s7101_s25 }
  0x35   : > { %p7110_p1 = scmp.lt.u32.totalorder %s7101_s25, %s7367_s26 }
  0x36   : > { %p7105_p5 = pneg %p7104_p3  ;;  %p7109_p2 = por %p7108_p9, %p7107_p7 }
  0x38   : > { %p7111_p4 = por %p7110_p1, %p7109_p2 }
  0x3a   : > { %p7112_p6 = pnand %p7111_p4, %p7105_p5 }
  0x3c   : > { %7115 = shalt.err (!%p7112_p6)
}
  0x3d   : > { %s7116_s14 = scalar_lea.vmem %s7373_s22, 2048  ;;  %s7206_s19 = smov [#allocation4]  }
  0x3e   : > { %p7117_p8 = scmp.ne.s32.totalorder %s7373_s22, %s7116_s14  ;;  %s7121_s16 = sshll.u32 %s7206_s19, 4  ;;  %s7122_s16 = int_to_ptr.vmem [resolvable:$false] %s7121_s16 }
  0x3f   : > { %s7123_s21 = scalar_lea.vmem %s7122_s16, 4096  ;;  %p7124_p3 = scmp.lt.s32.totalorder %s7373_s22, %s7122_s16 }
  0x40   : > { %p7119_p10 = pnand %p7117_p8, %p7103_p0  ;;  %p7125_p7 = scmp.lt.s32.totalorder %s7123_s21, %s7116_s14 }
  0x42   : > { %p7120_p13 = pneg %p7119_p10  ;;  %p7126_p9 = por %p7125_p7, %p7124_p3 }
  0x44   : > { %p7127_p2 = pnand %p7126_p9, %p7120_p13 }
  0x46   : > { %7130 = shalt.err (!%p7127_p2)
}
  0x47   : > { %s7207_s25 = smov 64   ;;  %s7208_s27 = smov 4  }
  0x48   : > { %6700 = dma.hbm_to_vmem [thread:$0]  (!%p7369_p11), %s7367_s26, 2048, %s7373_s22, %s7375_s24, %s7207_s25, %s7207_s25, %s7208_s27  }
  0x49   : > { %p9298_p0 = scmp.ne.s32.totalorder %s9292_s17, 0 }
  0x4b   : > { %322 = sbr.rel (%p9298_p0) target bundleno = 1524 (0x5f4), region = 56 }
  0x52   : > { %s7406_s18 = sand.u32 1, %s7193_s10   ;;  %p9299_p5 = scmp.ne.s32.totalorder %s9289_s15, 0 }
  0x53   : > { %s5369_s20 = sshll.u32 %s7406_s18, 7  ;;  %s325_s14 = scalar_lea.sflag [#allocation5], %s7406_s18 }
  0x54   : > { %s7410_s19 = scalar_lea.vmem [#allocation4], %s5369_s20 }
  0x55   : > { %7176 = dma.done.wait (%p9299_p5), %s325_s14, 2048  }
  0x56   : > { %7178 = vsyncadd (%p9299_p5), %s325_s14, 4294965248  ;;  %p9300_p11 = scmp.eq.s32.totalorder %s7288_s13, 0 }
  0x58   : > { %7180 = dma.done.wait (%p9300_p11), [#allocation8], 27648   ;;  %p9301_p1 = pmov %p9300_p11 }
  0x59   : > { %v7209_v0 = vmov 0.0   ;;  %v6753_v1 = vld [vmem:[#allocation7 + $0x4] ss:$12 sps:$4 sm:$0xff]   ;;  %v6755_v2 = vld [vmem:[#allocation7 + $0xc8] ss:$12 sps:$4 sm:$0xff]   ;;  %v5677_v53 = vld [vmem:[%s7410_s19 + $0x18] sm:$0xff]  }
  0x5a   : > { %7182 = vsyncadd (%p9301_p1), [#allocation8], 4294939648  ;;  %370 = vst [vmem:[#allocation2] sm:$0xff] %v7209_v0  ;;  %2725 = vmatprep.subr.bf16.mxu0 %v6753_v1  ;;  %v6756_v3 = vld [vmem:[#allocation7] ss:$12 sps:$4 sm:$0xff]   ;;  %5690 = vmatprep.subr.bf16.mxu1 %v6755_v2  ;;  %v5676_v44 = vld [vmem:[%s7410_s19 + $0x10] sm:$0xff]   ;;  %v5625_v55 = vunpack.c.l.bf16 %v5677_v53 }
  0x5b   : > { %371 = vst [vmem:[#allocation2 + $0x8] sm:$0x3] %v7209_v0  ;;  %372 = vst [vmem:[#allocation2 + $0x10] sm:$0xff] %v7209_v0  ;;  %v6757_v4 = vld [vmem:[#allocation7 + $0x8] ss:$12 sps:$4 sm:$0xff]   ;;  %2726 = vmatpush1.bf16.msra.mxu0 %v6756_v3  ;;  %v5612_v31 = vld [vmem:[%s7410_s19] sm:$0xff]   ;;  %v5621_v45 = vunpack.c.l.bf16 %v5676_v44  ;;  %v5622_v46 = vunpack.c.h.bf16 %v5676_v44 }
  0x5c   : > { %373 = vst [vmem:[#allocation2 + $0x18] sm:$0x3] %v7209_v0  ;;  %374 = vst [vmem:[#allocation2 + $0x20] sm:$0xff] %v7209_v0  ;;  %v6758_v5 = vld [vmem:[#allocation7 + $0x1c] ss:$12 sps:$4 sm:$0xff]   ;;  %5691 = vmatpush3.bf16.msra.mxu1 %v6757_v4  ;;  %v5613_v32 = vunpack.c.l.bf16 %v5612_v31  ;;  %v5614_v33 = vunpack.c.h.bf16 %v5612_v31  ;;  %v7515_v60 = vld [vmem:[%s7410_s19 + $0x20] sm:$0xff]  }
  0x5d   : > { %375 = vst [vmem:[#allocation2 + $0x28] sm:$0x3] %v7209_v0  ;;  %376 = vst [vmem:[#allocation2 + $0x30] sm:$0xff] %v7209_v0  ;;  %v6760_v6 = vld [vmem:[#allocation7 + $0xe0] ss:$12 sps:$4 sm:$0xff]   ;;  %2727 = vmatprep.subr.bf16.mxu0 %v6758_v5  ;;  %v5629_v62 = vunpack.c.l.bf16 %v7515_v60  ;;  %v5630_v63 = vunpack.c.h.bf16 %v7515_v60  ;;  %vm7212_vm0 = vmmov 0  }
  0x5e   : > { %377 = vst [vmem:[#allocation2 + $0x38] sm:$0x3] %v7209_v0  ;;  %378 = vst [vmem:[#allocation2 + $0x40] sm:$0xff] %v7209_v0  ;;  %v6761_v7 = vld [vmem:[#allocation7 + $0x18] ss:$12 sps:$4 sm:$0xff]   ;;  %5692 = vmatprep.subr.bf16.mxu1 %v6760_v6  ;;  %v5675_v39 = vld [vmem:[%s7410_s19 + $0x8] sm:$0xff]  }
  0x5f   : > { %379 = vst [vmem:[#allocation2 + $0x48] sm:$0x3] %v7209_v0  ;;  %380 = vst [vmem:[#allocation2 + $0x50] sm:$0xff] %v7209_v0  ;;  %v6762_v8 = vld [vmem:[#allocation7 + $0x20] ss:$12 sps:$4 sm:$0xff]   ;;  %2728 = vmatpush1.bf16.msra.mxu0 %v6761_v7  ;;  %v5617_v40 = vunpack.c.l.bf16 %v5675_v39  ;;  %v5618_v41 = vunpack.c.h.bf16 %v5675_v39  ;;  %vm4987_vm1 = vcmask 1041409  }
  0x60   : > { %381 = vst [vmem:[#allocation2 + $0x58] sm:$0x3] %v7209_v0  ;;  %382 = vst [vmem:[#allocation2 + $0x60] sm:$0xff] %v7209_v0  ;;  %v6763_v9 = vld [vmem:[#allocation7 + $0x34] ss:$12 sps:$4 sm:$0xff]   ;;  %5693 = vmatpush3.bf16.msra.mxu1 %v6762_v8  ;;  %v5679_v4 = vld [vmem:[%s7410_s19 + $0x28] sm:$0xff]  }
  0x61   : > { %383 = vst [vmem:[#allocation2 + $0x68] sm:$0x3] %v7209_v0  ;;  %384 = vst [vmem:[#allocation2 + $0x70] sm:$0xff] %v7209_v0  ;;  %v6765_v10 = vld [vmem:[#allocation7 + $0xf8] ss:$12 sps:$4 sm:$0xff]   ;;  %2729 = vmatprep.subr.bf16.mxu0 %v6763_v9  ;;  %v5633_v7 = vunpack.c.l.bf16 %v5679_v4  ;;  %v5634_v8 = vunpack.c.h.bf16 %v5679_v4  ;;  %vm4989_vm2 = vcmask 1042434  }
  0x62   : > { %385 = vst [vmem:[#allocation2 + $0x78] sm:$0x3] %v7209_v0  ;;  %386 = vst [vmem:[#allocation2 + $0x80] sm:$0xff] %v7209_v0  ;;  %v6766_v11 = vld [vmem:[#allocation7 + $0x30] ss:$12 sps:$4 sm:$0xff]   ;;  %5694 = vmatprep.subr.bf16.mxu1 %v6765_v10  ;;  %v611_v34 = vld [vmem:[#allocation2 + $0x1] sm:$0xff] }
  0x63   : > { %387 = vst [vmem:[#allocation2 + $0x88] sm:$0x3] %v7209_v0  ;;  %388 = vst [vmem:[#allocation2 + $0x90] sm:$0xff] %v7209_v0  ;;  %v6767_v12 = vld [vmem:[#allocation7 + $0x38] ss:$12 sps:$4 sm:$0xff]   ;;  %2730 = vmatpush1.bf16.msra.mxu0 %v6766_v11  ;;  %v643_v37 = vpack.c.bf16 %v5613_v32, %v611_v34  ;;  %v5680_v10 = vld [vmem:[%s7410_s19 + $0x30] sm:$0xff]  }
  0x64   : > { %389 = vst [vmem:[#allocation2 + $0x98] sm:$0x3] %v7209_v0  ;;  %390 = vst [vmem:[#allocation2 + $0xa0] sm:$0xff] %v7209_v0  ;;  %v6768_v13 = vld [vmem:[#allocation7 + $0x4c] ss:$12 sps:$4 sm:$0xff]   ;;  %5695 = vmatpush3.bf16.msra.mxu1 %v6767_v12  ;;  %v5637_v11 = vunpack.c.l.bf16 %v5680_v10  ;;  %v5638_v12 = vunpack.c.h.bf16 %v5680_v10  ;;  %v7568_v44 = vld [vmem:[%s7410_s19 + $0x60] sm:$0xff]  }
  0x65   : > { %391 = vst [vmem:[#allocation2 + $0xa8] sm:$0x3] %v7209_v0  ;;  %392 = vst [vmem:[#allocation2 + $0xb0] sm:$0xff] %v7209_v0  ;;  %v6770_v14 = vld [vmem:[#allocation7 + $0x110] ss:$12 sps:$4 sm:$0xff]   ;;  %2731 = vmatprep.subr.bf16.mxu0 %v6768_v13  ;;  %3722 = vmatprep.mubr.bf16.mxu1 %v643_v37  ;;  %vm4991_vm3 = vcmask 1043459  }
  0x66   : > { %393 = vst [vmem:[#allocation2 + $0xb8] sm:$0x3] %v7209_v0  ;;  %394 = vst [vmem:[#allocation2 + $0xc0] sm:$0xff] %v7209_v0  ;;  %v6771_v15 = vld [vmem:[#allocation7 + $0x48] ss:$12 sps:$4 sm:$0xff]   ;;  %5696 = vmatprep.subr.bf16.mxu1 %v6770_v14  ;;  %2757 = vmatprep.mubr.bf16.mxu0 %v643_v37  ;;  %vm5073_vm4 = vcmask 64512  }
  0x67   : > { %395 = vst [vmem:[#allocation2 + $0xc8] sm:$0x3] %v7209_v0  ;;  %396 = vst [vmem:[#allocation2 + $0xd0] sm:$0xff] %v7209_v0  ;;  %v6772_v16 = vld [vmem:[#allocation7 + $0x50] ss:$12 sps:$4 sm:$0xff]   ;;  %2732 = vmatpush1.bf16.msra.mxu0 %v6771_v15  ;;  %s5371_s25 = sshll.u32 %s7406_s18, 8 }
  0x68   : > { %397 = vst [vmem:[#allocation2 + $0xd8] sm:$0x3] %v7209_v0  ;;  %398 = vst [vmem:[#allocation2 + $0xe0] sm:$0xff] %v7209_v0  ;;  %v6773_v17 = vld [vmem:[#allocation7 + $0x64] ss:$12 sps:$4 sm:$0xff]   ;;  %5697 = vmatpush3.bf16.msra.mxu1 %v6772_v16  ;;  %v7535_v15 = vld [vmem:[%s7410_s19 + $0x38] sm:$0xff]  }
  0x69   : > { %399 = vst [vmem:[#allocation2 + $0xe8] sm:$0x3] %v7209_v0  ;;  %400 = vst [vmem:[#allocation2 + $0xf0] sm:$0xff] %v7209_v0  ;;  %v6775_v18 = vld [vmem:[#allocation7 + $0x128] ss:$12 sps:$4 sm:$0xff]   ;;  %2733 = vmatprep.subr.bf16.mxu0 %v6773_v17  ;;  %v5641_v17 = vunpack.c.l.bf16 %v7535_v15  ;;  %s9155_s27 = scalar_lea.vmem [#allocation9], %s5371_s25 }
  0x6a   : > { %401 = vst [vmem:[#allocation2 + $0xf8] sm:$0x3] %v7209_v0  ;;  %402 = vst [vmem:[#allocation2 + $0x100] sm:$0xff] %v7209_v0  ;;  %v6776_v19 = vld [vmem:[#allocation7 + $0x60] ss:$12 sps:$4 sm:$0xff]   ;;  %5698 = vmatprep.subr.bf16.mxu1 %v6775_v18  ;;  %s5610_s20 = sshll.u32 %s7288_s13, 12 }
  0x6b   : > { %403 = vst [vmem:[#allocation2 + $0x108] sm:$0x3] %v7209_v0  ;;  %404 = vst [vmem:[#allocation2 + $0x110] sm:$0xff] %v7209_v0  ;;  %v6777_v20 = vld [vmem:[#allocation7 + $0x68] ss:$12 sps:$4 sm:$0xff]   ;;  %2734 = vmatpush1.bf16.msra.mxu0 %v6776_v19  ;;  %v7539_v18 = vld [vmem:[%s7410_s19 + $0x40] sm:$0xff]   ;;  %v5626_v19 = vunpack.c.h.bf16 %v5677_v53  ;;  %s9192_s15 = scalar_lea.hbm %s9261_s9, %s5610_s20 }
  0x6c   : > { %405 = vst [vmem:[#allocation2 + $0x118] sm:$0x3] %v7209_v0  ;;  %406 = vst [vmem:[#allocation2 + $0x120] sm:$0xff] %v7209_v0  ;;  %v6778_v21 = vld [vmem:[#allocation7 + $0x7c] ss:$12 sps:$4 sm:$0xff]   ;;  %5699 = vmatpush3.bf16.msra.mxu1 %v6777_v20  ;;  %s5277_s14 = sshll.u32 %s9155_s27, 4  ;;  %s9194_s14 = int_to_ptr.vmem [resolvable:$true] %s5277_s14 }
  0x6d   : > { %407 = vst [vmem:[#allocation2 + $0x128] sm:$0x3] %v7209_v0  ;;  %408 = vst [vmem:[#allocation2 + $0x130] sm:$0xff] %v7209_v0  ;;  %v6780_v22 = vld [vmem:[#allocation7 + $0x140] ss:$12 sps:$4 sm:$0xff]   ;;  %2735 = vmatprep.subr.bf16.mxu0 %v6778_v21  ;;  %v5645_v21 = vunpack.c.l.bf16 %v7539_v18  ;;  %s5263_s17 = scalar_lea.sflag [#allocation6], %s7406_s18 }
  0x6e   : > { %409 = vst [vmem:[#allocation2 + $0x138] sm:$0x3] %v7209_v0  ;;  %410 = vst [vmem:[#allocation2 + $0x140] sm:$0xff] %v7209_v0  ;;  %v6781_v23 = vld [vmem:[#allocation7 + $0x78] ss:$12 sps:$4 sm:$0xff]   ;;  %5700 = vmatprep.subr.bf16.mxu1 %v6780_v22  ;;  %v5646_v22 = vunpack.c.h.bf16 %v7539_v18  ;;  %s7131_s26 = scalar_lea.vmem %s9194_s14, 4096 }
  0x6f   : > { %411 = vst [vmem:[#allocation2 + $0x148] sm:$0x3] %v7209_v0  ;;  %412 = vst [vmem:[#allocation2 + $0x150] sm:$0xff] %v7209_v0  ;;  %v6782_v24 = vld [vmem:[#allocation7 + $0x80] ss:$12 sps:$4 sm:$0xff]   ;;  %2736 = vmatpush1.bf16.msra.mxu0 %v6781_v23  ;;  %p7132_p4 = scmp.ne.s32.totalorder %s9194_s14, %s7131_s26  ;;  %s7214_s22 = smov [#allocation9]  }
  0x70   : > { %413 = vst [vmem:[#allocation2 + $0x158] sm:$0x3] %v7209_v0  ;;  %414 = vst [vmem:[#allocation2 + $0x160] sm:$0xff] %v7209_v0  ;;  %v6783_v25 = vld [vmem:[#allocation7 + $0x94] ss:$12 sps:$4 sm:$0xff]   ;;  %5701 = vmatpush3.bf16.msra.mxu1 %v6782_v24  ;;  %s7135_s23 = sshll.u32 %s7214_s22, 4  ;;  %s7136_s23 = int_to_ptr.vmem [resolvable:$false] %s7135_s23 }
  0x71   : > { %415 = vst [vmem:[#allocation2 + $0x168] sm:$0x3] %v7209_v0  ;;  %416 = vst [vmem:[#allocation2 + $0x170] sm:$0xff] %v7209_v0  ;;  %v6785_v26 = vld [vmem:[#allocation7 + $0x158] ss:$12 sps:$4 sm:$0xff]   ;;  %2737 = vmatprep.subr.bf16.mxu0 %v6783_v25  ;;  %p7133_p6 = pnand %p7132_p4, %p7358_p12  ;;  %s7137_s24 = scalar_lea.vmem %s7136_s23, 8192 }
  0x72   : > { %417 = vst [vmem:[#allocation2 + $0x178] sm:$0x3] %v7209_v0  ;;  %418 = vst [vmem:[#allocation2 + $0x180] sm:$0xff] %v7209_v0  ;;  %v6786_v27 = vld [vmem:[#allocation7 + $0x90] ss:$12 sps:$4 sm:$0xff]   ;;  %5702 = vmatprep.subr.bf16.mxu1 %v6785_v26  ;;  %v5683_v26 = vld [vmem:[%s7410_s19 + $0x48] sm:$0xff]   ;;  %p7138_p10 = scmp.lt.s32.totalorder %s9194_s14, %s7136_s23  ;;  %p7139_p13 = scmp.lt.s32.totalorder %s7137_s24, %s7131_s26 }
  0x73   : > { %419 = vst [vmem:[#allocation2 + $0x188] sm:$0x3] %v7209_v0  ;;  %420 = vst [vmem:[#allocation2 + $0x190] sm:$0xff] %v7209_v0  ;;  %v6787_v28 = vld [vmem:[#allocation7 + $0x98] ss:$12 sps:$4 sm:$0xff]   ;;  %2738 = vmatpush1.bf16.msra.mxu0 %v6786_v27  ;;  %v5649_v27 = vunpack.c.l.bf16 %v5683_v26  ;;  %p7134_p8 = pneg %p7133_p6 }
  0x74   : > { %421 = vst [vmem:[#allocation2 + $0x198] sm:$0x3] %v7209_v0  ;;  %422 = vst [vmem:[#allocation2 + $0x1a0] sm:$0xff] %v7209_v0  ;;  %v6788_v29 = vld [vmem:[#allocation7 + $0xac] ss:$12 sps:$4 sm:$0xff]   ;;  %5703 = vmatpush3.bf16.msra.mxu1 %v6787_v28  ;;  %v5650_v28 = vunpack.c.h.bf16 %v5683_v26  ;;  %p7140_p3 = por %p7139_p13, %p7138_p10 }
  0x75   : > { %423 = vst [vmem:[#allocation2 + $0x1a8] sm:$0x3] %v7209_v0  ;;  %424 = vst [vmem:[#allocation2 + $0x1b0] sm:$0xff] %v7209_v0  ;;  %v6790_v30 = vld [vmem:[#allocation7 + $0x170] ss:$12 sps:$4 sm:$0xff]   ;;  %2739 = vmatprep.subr.bf16.mxu0 %v6788_v29 }
  0x76   : > { %425 = vst [vmem:[#allocation2 + $0x1b8] sm:$0x3] %v7209_v0  ;;  %426 = vst [vmem:[#allocation2 + $0x1c0] sm:$0xff] %v7209_v0  ;;  %v6791_v35 = vld [vmem:[#allocation7 + $0xa8] ss:$12 sps:$4 sm:$0xff]   ;;  %5704 = vmatprep.subr.bf16.mxu1 %v6790_v30  ;;  %p7141_p7 = pnand %p7140_p3, %p7134_p8 }
  0x77   : > { %427 = vst [vmem:[#allocation2 + $0x1c8] sm:$0x3] %v7209_v0  ;;  %428 = vst [vmem:[#allocation2 + $0x1d0] sm:$0xff] %v7209_v0  ;;  %v6792_v36 = vld [vmem:[#allocation7 + $0xb0] ss:$12 sps:$4 sm:$0xff]   ;;  %2740 = vmatpush1.bf16.msra.mxu0 %v6791_v35  ;;  %v619_v35 = vld [vmem:[#allocation2 + $0xa1] sm:$0xff] }
  0x78   : > { %429 = vst [vmem:[#allocation2 + $0x1d8] sm:$0x3] %v7209_v0  ;;  %430 = vst [vmem:[#allocation2 + $0x1e0] sm:$0xff] %v7209_v0  ;;  %v6793_v38 = vld [vmem:[#allocation7 + $0xc4] ss:$12 sps:$4 sm:$0xff]   ;;  %5705 = vmatpush3.bf16.msra.mxu1 %v6792_v36  ;;  %v7557_v36 = vld [vmem:[%s7410_s19 + $0x58] sm:$0xff]  }
  0x79   : > { %431 = vst [vmem:[#allocation2 + $0x1e8] sm:$0x3] %v7209_v0  ;;  %432 = vst [vmem:[#allocation2 + $0x1f0] sm:$0xff] %v7209_v0  ;;  %v6795_v42 = vld [vmem:[#allocation7 + $0xc0] ss:$12 sps:$4 sm:$0xff]   ;;  %2741 = vmatprep.subr.bf16.mxu0 %v6793_v38  ;;  %v5684_v29 = vld [vmem:[%s7410_s19 + $0x50] sm:$0xff]   ;;  %v5657_v38 = vunpack.c.l.bf16 %v7557_v36 }
  0x7a   : > { %433 = vst [vmem:[#allocation2 + $0x1f8] sm:$0x3] %v7209_v0  ;;  %434 = vst [vmem:[#allocation2 + $0x200] sm:$0xff] %v7209_v0  ;;  %v6796_v43 = vld [vmem:[#allocation7 + $0xdc] ss:$12 sps:$4 sm:$0xff]   ;;  %v5654_v34 = vunpack.c.h.bf16 %v5684_v29 }
  0x7b   : > { %435 = vst [vmem:[#allocation2 + $0x208] sm:$0x3] %v7209_v0  ;;  %436 = vst [vmem:[#allocation2 + $0x210] sm:$0xff] %v7209_v0  ;;  %v6798_v47 = vld [vmem:[#allocation7 + $0xd8] ss:$12 sps:$4 sm:$0xff]   ;;  %2742 = vmatpush1.bf16.msra.mxu0 %v6795_v42 }
  0x7c   : > { %437 = vst [vmem:[#allocation2 + $0x218] sm:$0x3] %v7209_v0  ;;  %438 = vst [vmem:[#allocation2 + $0x220] sm:$0xff] %v7209_v0  ;;  %v7504_v49 = vld [vmem:[%s7410_s19 + $0x4] ss:$4 sps:$4 sm:$0xff]   ;;  %2743 = vmatprep.subr.bf16.mxu0 %v6796_v43 }
  0x7d   : > { %439 = vst [vmem:[#allocation2 + $0x228] sm:$0x3] %v7209_v0  ;;  %440 = vst [vmem:[#allocation2 + $0x230] sm:$0xff] %v7209_v0  ;;  %v6800_v52 = vld [vmem:[#allocation7 + $0xf4] ss:$12 sps:$4 sm:$0xff]  }
  0x7e   : > { %441 = vst [vmem:[#allocation2 + $0x238] sm:$0x3] %v7209_v0  ;;  %442 = vst [vmem:[#allocation2 + $0x240] sm:$0xff] %v7209_v0  ;;  %v6802_v57 = vld [vmem:[#allocation7 + $0xf0] ss:$12 sps:$4 sm:$0xff]  }
  0x7f   : > { %443 = vst [vmem:[#allocation2 + $0x248] sm:$0x3] %v7209_v0  ;;  %444 = vst [vmem:[#allocation2 + $0x250] sm:$0xff] %v7209_v0  ;;  %2744 = vmatpush1.bf16.msra.mxu0 %v6798_v47  ;;  %v6803_v59 = vld [vmem:[#allocation7 + $0x10c] ss:$12 sps:$4 sm:$0xff]   ;;  %v5662_v47 = vunpack.c.h.bf16 %v7568_v44 }
  0x80   : > { %445 = vst [vmem:[#allocation2 + $0x258] sm:$0x3] %v7209_v0  ;;  %446 = vst [vmem:[#allocation2 + $0x260] sm:$0xff] %v7209_v0  ;;  %2745 = vmatprep.subr.bf16.mxu0 %v6800_v52  ;;  %v6805_v2 = vld [vmem:[#allocation7 + $0x108] ss:$12 sps:$4 sm:$0xff]  }
  0x81   : > { %447 = vst [vmem:[#allocation2 + $0x268] sm:$0x3] %v7209_v0  ;;  %448 = vst [vmem:[#allocation2 + $0x270] sm:$0xff] %v7209_v0  ;;  %v7524_v3 = vld [vmem:[%s7410_s19 + $0xc] ss:$4 sps:$4 sm:$0xff]  }
  0x82   : > { %449 = vst [vmem:[#allocation2 + $0x278] sm:$0x3] %v7209_v0  ;;  %515 = vst [vmem:[#allocation2 + $0x11] sm:$0xff] %v5613_v32  ;;  %v6807_v5 = vld [vmem:[#allocation7 + $0x124] ss:$12 sps:$4 sm:$0xff]  }
  0x83   : > { %516 = vst [vmem:[#allocation2 + $0x21] sm:$0xff] %v5614_v33  ;;  %517 = vst [vmem:[#allocation2 + $0x31] sm:$0xff] %v5617_v40  ;;  %2746 = vmatpush1.bf16.msra.mxu0 %v6802_v57  ;;  %v6809_v14 = vld [vmem:[#allocation7 + $0x120] ss:$12 sps:$4 sm:$0xff]   ;;  %v6810_v16 = vld [vmem:[#allocation7 + $0x13c] ss:$12 sps:$4 sm:$0xff]   ;;  %v5653_v33 = vunpack.c.l.bf16 %v5684_v29  ;;  %v7565_v40 = vpack.c.bf16 %v5629_v62, %v619_v35 }
  0x84   : > { %518 = vst [vmem:[#allocation2 + $0x41] sm:$0xff] %v5618_v41  ;;  %519 = vst [vmem:[#allocation2 + $0x51] sm:$0xff] %v5621_v45  ;;  %2747 = vmatprep.subr.bf16.mxu0 %v6803_v59  ;;  %v6812_v23 = vld [vmem:[#allocation7 + $0x138] ss:$12 sps:$4 sm:$0xff]   ;;  %v6814_v25 = vld [vmem:[#allocation7 + $0x154] ss:$12 sps:$4 sm:$0xff]   ;;  %v5661_v45 = vunpack.c.l.bf16 %v7568_v44 }
  0x85   : > { %520 = vst [vmem:[#allocation2 + $0x61] sm:$0xff] %v5622_v46  ;;  %521 = vst [vmem:[#allocation2 + $0x71] sm:$0xff] %v5625_v55  ;;  %v7546_v24 = vld [vmem:[%s7410_s19 + $0x14] ss:$4 sps:$4 sm:$0xff]   ;;  %v6816_v31 = vld [vmem:[#allocation7 + $0x150] ss:$12 sps:$4 sm:$0xff]  }
  0x86   : > { %523 = vst [vmem:[#allocation2 + $0xb1] sm:$0xff] %v5629_v62  ;;  %524 = vst [vmem:[#allocation2 + $0xc1] sm:$0xff] %v5630_v63  ;;  %v6817_v32 = vld [vmem:[#allocation7 + $0x16c] ss:$12 sps:$4 sm:$0xff]   ;;  %v6819_v39 = vld [vmem:[#allocation7 + $0x168] ss:$12 sps:$4 sm:$0xff]  }
  0x87   : > { %525 = vst [vmem:[#allocation2 + $0xd1] sm:$0xff] %v5633_v7  ;;  %526 = vst [vmem:[#allocation2 + $0xe1] sm:$0xff] %v5634_v8  ;;  %2748 = vmatpush1.bf16.msra.mxu0 %v6805_v2  ;;  %v6822_v41 = vld [vmem:[#allocation7 + $0x184] ss:$12 sps:$4 sm:$0xff]   ;;  %v6850_v46 = vld [vmem:[#allocation7 + $0x248] ss:$12 sps:$4 sm:$0xff]  }
  0x88   : > { %2749 = vmatprep.subr.bf16.mxu0 %v6807_v5  ;;  %527 = vst [vmem:[#allocation2 + $0xf1] sm:$0xff] %v5637_v11  ;;  %528 = vst [vmem:[#allocation2 + $0x101] sm:$0xff] %v5638_v12  ;;  %v6826_v52 = vld [vmem:[#allocation7 + $0x19c] ss:$12 sps:$4 sm:$0xff]   ;;  %5802 = vmatprep.subr.bf16.mxu1 %v6850_v46  ;;  %v6855_v57 = vld [vmem:[#allocation7 + $0x260] ss:$12 sps:$4 sm:$0xff]  }
  0x89   : > { %v548_v48 = vld [vmem:[#allocation2 + $0x10] sm:$0xff]  ;;  %529 = vst [vmem:[#allocation2 + $0x111] sm:$0xff] %v5641_v17  ;;  %522 = vst [vmem:[#allocation2 + $0x81] sm:$0xff] %v5626_v19  ;;  %v7579_v53 = vld [vmem:[%s7410_s19 + $0x24] ss:$4 sps:$4 sm:$0xff]  }
  0x8a   : > { %v549_v50 = vld [vmem:[#allocation2 + $0x20] sm:$0xff]  ;;  %v7507_v51 = vpack.c.bf16 %v548_v48, %v7209_v0  ;;  %v550_v56 = vld [vmem:[#allocation2 + $0x30] sm:$0xff]  ;;  %531 = vst [vmem:[#allocation2 + $0x151] sm:$0xff] %v5645_v21  ;;  %532 = vst [vmem:[#allocation2 + $0x161] sm:$0xff] %v5646_v22 }
  0x8b   : > { %v7510_v54 = vpack.c.bf16 %v549_v50, %v548_v48  ;;  %v551_v58 = vld [vmem:[#allocation2 + $0x40] sm:$0xff]  ;;  %v7521_v1 = vpack.c.bf16 %v550_v56, %v549_v50  ;;  %v552_v6 = vld [vmem:[#allocation2 + $0x50] sm:$0xff]  ;;  %2750 = vmatpush1.bf16.msra.mxu0 %v6809_v14  ;;  %533 = vst [vmem:[#allocation2 + $0x171] sm:$0xff] %v5649_v27  ;;  %534 = vst [vmem:[#allocation2 + $0x181] sm:$0xff] %v5650_v28 }
  0x8c   : > { %3723 = vmatmul.mubr.bf16.vlgmr.msra.gmra.mrb[0].mxu1 %v7507_v51  ;;  %v7517_v61 = vpack.c.bf16 %v551_v58, %v550_v56  ;;  %v553_v9 = vld [vmem:[#allocation2 + $0x60] sm:$0xff]  ;;  %v7541_v20 = vpack.c.bf16 %v552_v6, %v551_v58  ;;  %2751 = vmatprep.subr.bf16.mxu0 %v6810_v16  ;;  %v7554_v30 = vld [vmem:[#allocation2 + $0x70] sm:$0xff]  ;;  %535 = vst [vmem:[#allocation2 + $0x191] sm:$0xff] %v5653_v33  ;;  %536 = vst [vmem:[#allocation2 + $0x1a1] sm:$0xff] %v5654_v34 }
  0x8d   : > { %3730 = vmatprep.mubr.bf16.mxu1 %v7504_v49  ;;  %v7531_v13 = vpack.c.bf16 %v553_v9, %v552_v6  ;;  %v7560_v37 = vpack.c.bf16 %v7554_v30, %v553_v9  ;;  %v556_v42 = vld [vmem:[#allocation2 + $0xb0] sm:$0xff]  ;;  %v557_v43 = vld [vmem:[#allocation2 + $0xc0] sm:$0xff]  ;;  %537 = vst [vmem:[#allocation2 + $0x1b1] sm:$0xff] %v5657_v38  ;;  %539 = vst [vmem:[#allocation2 + $0x1f1] sm:$0xff] %v5661_v45 }
  0x8e   : > { %v7573_v48 = vpack.c.bf16 %v557_v43, %v556_v42  ;;  %v6820_v50 = vld [vmem:[#allocation7 + $0x180] ss:$12 sps:$4 sm:$0xff]   ;;  %540 = vst [vmem:[#allocation2 + $0x201] sm:$0xff] %v5662_v47  ;;  %v6854_v55 = vld [vmem:[#allocation7 + $0x188] ss:$12 sps:$4 sm:$0xff]   ;;  %v7583_v56 = vpack.c.bf16 %v556_v42, %v7209_v0  ;;  %v7604_v29 = vld [vmem:[%s7410_s19 + $0x78] sm:$0xff]  }
  0x8f   : > { %2752 = vmatpush1.bf16.msra.mxu0 %v6812_v23  ;;  %v6824_v58 = vld [vmem:[#allocation7 + $0x198] ss:$12 sps:$4 sm:$0xff]   ;;  %v6830_v59 = vld [vmem:[#allocation7 + $0x1b4] ss:$12 sps:$4 sm:$0xff]   ;;  %5803 = vmatpush3.bf16.msra.mxu1 %v6854_v55  ;;  %v5687_v62 = vld [vmem:[%s7410_s19 + $0x68] sm:$0xff]   ;;  %v5673_v34 = vunpack.c.l.bf16 %v7604_v29 }
  0x90   : > { %2753 = vmatprep.subr.bf16.mxu0 %v6814_v25  ;;  %v6856_v60 = vld [vmem:[#allocation7 + $0x1a0] ss:$12 sps:$4 sm:$0xff]   ;;  %v558_v63 = vld [vmem:[#allocation2 + $0xd0] sm:$0xff]  ;;  %5804 = vmatprep.subr.bf16.mxu1 %v6855_v57  ;;  %v5665_v4 = vunpack.c.l.bf16 %v5687_v62  ;;  %v5666_v5 = vunpack.c.h.bf16 %v5687_v62  ;;  %v6862_v7 = vld [vmem:[#allocation7 + $0x1b8] ss:$12 sps:$4 sm:$0xff]  }
  0x91   : > { %v559_v2 = vld [vmem:[#allocation2 + $0xe0] sm:$0xff]  ;;  %v6828_v0 = vld [vmem:[#allocation7 + $0x1b0] ss:$12 sps:$4 sm:$0xff]   ;;  %v6832_v9 = vld [vmem:[#allocation7 + $0x1c8] ss:$12 sps:$4 sm:$0xff]   ;;  %v7595_v11 = vpack.c.bf16 %v558_v63, %v557_v43  ;;  %545 = vst [vmem:[#allocation2 + $0x251] sm:$0xff] %v5673_v34 }
  0x92   : > { %v7588_v6 = vpack.c.bf16 %v559_v2, %v558_v63  ;;  %541 = vst [vmem:[#allocation2 + $0x211] sm:$0xff] %v5665_v4  ;;  %542 = vst [vmem:[#allocation2 + $0x221] sm:$0xff] %v5666_v5  ;;  %v7592_v8 = vld [vmem:[%s7410_s19 + $0x2c] ss:$4 sps:$4 sm:$0xff]   ;;  %v561_v22 = vld [vmem:[#allocation2 + $0x100] sm:$0xff] }
  0x93   : > { %2754 = vmatpush1.bf16.msra.mxu0 %v6816_v31  ;;  %5805 = vmatpush3.bf16.msra.mxu1 %v6856_v60  ;;  %v6863_v10 = vld [vmem:[#allocation7 + $0x290] ss:$12 sps:$4 sm:$0xff]   ;;  %v6869_v25 = vld [vmem:[#allocation7 + $0x2a8] ss:$12 sps:$4 sm:$0xff]   ;;  %v6871_v28 = vld [vmem:[#allocation7 + $0x2c0] ss:$12 sps:$4 sm:$0xff]   ;;  %v5642_v31 = vunpack.c.h.bf16 %v7535_v15 }
  0x94   : > { %3731 = vmatmul.mubr.bf16.gmra.mrb[4].mxu1 %v7521_v1  ;;  %2755 = vmatprep.subr.bf16.mxu0 %v6817_v32  ;;  %v6837_v12 = vld [vmem:[#allocation7 + $0x1e4] ss:$12 sps:$4 sm:$0xff]   ;;  %v6870_v27 = vld [vmem:[#allocation7 + $0x1e8] ss:$12 sps:$4 sm:$0xff]   ;;  %v6851_v18 = vld [vmem:[#allocation7 + $0x240] ss:$12 sps:$4 sm:$0xff]  }
  0x95   : > { %3738 = vmatprep.mubr.bf16.mxu1 %v7524_v3  ;;  %v5688_v14 = vld [vmem:[%s7410_s19 + $0x70] sm:$0xff]   ;;  %v6839_v35 = vld [vmem:[#allocation7 + $0x1f8] ss:$12 sps:$4 sm:$0xff]   ;;  %530 = vst [vmem:[#allocation2 + $0x121] sm:$0xff] %v5642_v31 }
  0x96   : > { %v560_v16 = vld [vmem:[#allocation2 + $0xf0] sm:$0xff]  ;;  %v5669_v17 = vunpack.c.l.bf16 %v5688_v14  ;;  %v5670_v19 = vunpack.c.h.bf16 %v5688_v14  ;;  %v6877_v15 = vld [vmem:[#allocation7 + $0x2d8] ss:$12 sps:$4 sm:$0xff]   ;;  %v6881_v14 = vld [vmem:[#allocation7 + $0x2a0] ss:$12 sps:$4 sm:$0xff]  }
  0x97   : > { %2756 = vmatpush1.bf16.msra.mxu0 %v6819_v39  ;;  %v6864_v23 = vld [vmem:[#allocation7 + $0x1d0] ss:$12 sps:$4 sm:$0xff]   ;;  %v7600_v26 = vpack.c.bf16 %v561_v22, %v560_v16  ;;  %v7608_v32 = vpack.c.bf16 %v560_v16, %v559_v2  ;;  %v7611_v33 = vld [vmem:[%s7410_s19 + $0x34] ss:$4 sps:$4 sm:$0xff]   ;;  %v6872_v39 = vld [vmem:[#allocation7 + $0x200] ss:$12 sps:$4 sm:$0xff]  }
  0x98   : > { %2918 = vmatprep.subr.bf16.mxu0 %v6822_v41  ;;  %543 = vst [vmem:[#allocation2 + $0x231] sm:$0xff] %v5669_v17  ;;  %544 = vst [vmem:[#allocation2 + $0x241] sm:$0xff] %v5670_v19  ;;  %v6845_v38 = vld [vmem:[#allocation7 + $0x214] ss:$12 sps:$4 sm:$0xff]   ;;  %v6843_v41 = vld [vmem:[#allocation7 + $0x210] ss:$12 sps:$4 sm:$0xff]  }
  0x99   : > { %v627_v42 = vld [vmem:[#allocation2 + $0x141] sm:$0xff]  ;;  %v6879_v46 = vld [vmem:[#allocation7 + $0x2f0] ss:$12 sps:$4 sm:$0xff]   ;;  %v6846_v19 = vld [vmem:[%s7410_s19 + $0x54] ss:$4 sps:$4 sm:$0xff]  }
  0x9a   : > { %2758 = vmatmul.mubr.bf16.vlgmr.msra.gmra.mrb[0].mxu0 %v7507_v51  ;;  %v6834_v51 = vld [vmem:[#allocation7 + $0x1cc] ss:$12 sps:$4 sm:$0xff]   ;;  %v6853_v55 = vld [vmem:[#allocation7 + $0x244] ss:$12 sps:$4 sm:$0xff]   ;;  %v6868_v2 = vld [vmem:[#allocation7 + $0x274] ss:$12 sps:$4 sm:$0xff]  }
  0x9b   : > { %2919 = vmatpush1.bf16.msra.mxu0 %v6820_v50  ;;  %2767 = vmatprep.mubr.bf16.mxu0 %v7504_v49  ;;  %v6861_v49 = vld [vmem:[#allocation7 + $0x278] ss:$12 sps:$4 sm:$0xff]   ;;  %v7626_v50 = vpack.c.bf16 %v5645_v21, %v627_v42  ;;  %v6880_v57 = vld [vmem:[#allocation7 + $0x230] ss:$12 sps:$4 sm:$0xff]  }
  0x9c   : > { %3739 = vmatmul.mubr.bf16.gmra.mrb[8].mxu1 %v7541_v20  ;;  %2920 = vmatprep.subr.bf16.mxu0 %v6826_v52  ;;  %v6878_v43 = vld [vmem:[#allocation7 + $0x218] ss:$12 sps:$4 sm:$0xff]   ;;  %v6847_v52 = vld [vmem:[#allocation7 + $0x228] ss:$12 sps:$4 sm:$0xff]  }
  0x9d   : > { %3746 = vmatprep.mubr.bf16.mxu1 %v7546_v24  ;;  %5806 = vmatprep.subr.bf16.mxu1 %v6861_v49  ;;  %v6860_v21 = vld [vmem:[#allocation7 + $0x25c] ss:$12 sps:$4 sm:$0xff]   ;;  %v6858_v63 = vld [vmem:[#allocation7 + $0x258] ss:$12 sps:$4 sm:$0xff]   ;;  %v566_v4 = vld [vmem:[#allocation2 + $0x170] sm:$0xff] }
  0x9e   : > { %5807 = vmatpush3.bf16.msra.mxu1 %v6862_v7  ;;  %v7640_v62 = vld [vmem:[%s7410_s19 + $0x44] ss:$4 sps:$4 sm:$0xff]   ;;  %v6842_v49 = vld [vmem:[%s7410_s19 + $0x4c] ss:$4 sps:$4 sm:$0xff]  }
  0x9f   : > { %2921 = vmatpush1.bf16.msra.mxu0 %v6824_v58  ;;  %5808 = vmatprep.subr.bf16.mxu1 %v6863_v10  ;;  %v564_v58 = vld [vmem:[#allocation2 + $0x150] sm:$0xff]  ;;  %v567_v5 = vld [vmem:[#allocation2 + $0x180] sm:$0xff]  ;;  %v6886_v16 = vld [vmem:[#allocation7 + $0x2bc] ss:$12 sps:$4 sm:$0xff]  }
  0xa0   : > { %2922 = vmatprep.subr.bf16.mxu0 %v6830_v59  ;;  %v565_v59 = vld [vmem:[#allocation2 + $0x160] sm:$0xff]  ;;  %v6874_v7 = vld [vmem:[#allocation7 + $0x288] ss:$12 sps:$4 sm:$0xff]  }
  0xa1   : > { %v569_v10 = vld [vmem:[#allocation2 + $0x1a0] sm:$0xff]  ;;  %v572_v31 = vld [vmem:[#allocation2 + $0x1f0] sm:$0xff] }
  0xa2   : > { %2768 = vmatmul.mubr.bf16.gmra.mrb[4].mxu0 %v7521_v1  ;;  %v6835_v1 = vld [vmem:[#allocation7 + $0x1e0] ss:$12 sps:$4 sm:$0xff]   ;;  %5809 = vmatpush3.bf16.msra.mxu1 %v6864_v23  ;;  %v6895_v34 = vld [vmem:[#allocation7 + $0x304] ss:$12 sps:$4 sm:$0xff]  }
  0xa3   : > { %2777 = vmatprep.mubr.bf16.mxu0 %v7524_v3  ;;  %2923 = vmatpush1.bf16.msra.mxu0 %v6828_v0  ;;  %v6841_v3 = vld [vmem:[#allocation7 + $0x1fc] ss:$12 sps:$4 sm:$0xff]   ;;  %v7643_v0 = vpack.c.bf16 %v567_v5, %v566_v4  ;;  %v6889_v23 = vld [vmem:[#allocation7 + $0x2d4] ss:$12 sps:$4 sm:$0xff]  }
  0xa4   : > { %3747 = vmatmul.mubr.bf16.gmra.mrb[12].mxu1 %v7560_v37  ;;  %2924 = vmatprep.subr.bf16.mxu0 %v6834_v51  ;;  %v6876_v51 = vld [vmem:[#allocation7 + $0x28c] ss:$12 sps:$4 sm:$0xff]  }
  0xa5   : > { %3754 = vmatprep.mubr.bf16.mxu1 %v7565_v40  ;;  %5810 = vmatprep.subr.bf16.mxu1 %v6869_v25  ;;  %v7655_v25 = vld [vmem:[#allocation2 + $0x1b0] sm:$0xff] }
  0xa6   : > { %5811 = vmatpush3.bf16.msra.mxu1 %v6870_v27  ;;  %v6892_v27 = vld [vmem:[#allocation7 + $0x2ec] ss:$12 sps:$4 sm:$0xff]  }
  0xa7   : > { %2925 = vmatpush1.bf16.msra.mxu0 %v6832_v9  ;;  %5812 = vmatprep.subr.bf16.mxu1 %v6871_v28  ;;  %v568_v9 = vld [vmem:[#allocation2 + $0x190] sm:$0xff] }
  0xa8   : > { %2926 = vmatprep.subr.bf16.mxu0 %v6837_v12  ;;  %v6883_v12 = vld [vmem:[#allocation7 + $0x2a4] ss:$12 sps:$4 sm:$0xff]   ;;  %v7649_v17 = vpack.c.bf16 %v569_v10, %v568_v9 }
  0xaa   : > { %2778 = vmatmul.mubr.bf16.gmra.mrb[8].mxu0 %v7541_v20  ;;  %v7616_v20 = vld [vmem:[#allocation2 + $0x110] sm:$0xff]  ;;  %5813 = vmatpush3.bf16.msra.mxu1 %v6872_v39 }
  0xab   : > { %2787 = vmatprep.mubr.bf16.mxu0 %v7546_v24  ;;  %2927 = vmatpush1.bf16.msra.mxu0 %v6835_v1  ;;  %v6849_v24 = vld [vmem:[#allocation7 + $0x22c] ss:$12 sps:$4 sm:$0xff]   ;;  %v7621_v47 = vpack.c.bf16 %v7616_v20, %v561_v22  ;;  %v6887_v1 = vld [vmem:[#allocation7 + $0x2d0] ss:$12 sps:$4 sm:$0xff]  }
  0xac   : > { %3755 = vmatmul.mubr.bf16.gmra.mrb[16].mxu1 %v7583_v56  ;;  %2928 = vmatprep.subr.bf16.mxu0 %v6841_v3  ;;  %v6884_v22 = vld [vmem:[#allocation7 + $0x2b8] ss:$12 sps:$4 sm:$0xff]   ;;  %v574_v39 = vld [vmem:[#allocation2 + $0x210] sm:$0xff] }
  0xad   : > { %3762 = vmatprep.mubr.bf16.mxu1 %v7579_v53  ;;  %5814 = vmatprep.subr.bf16.mxu1 %v6877_v15  ;;  %v635_v3 = vld [vmem:[#allocation2 + $0x1e1] sm:$0xff] }
  0xae   : > { %5815 = vmatpush3.bf16.msra.mxu1 %v6878_v43  ;;  %v655_v28 = vpack.c.bf16 %v5661_v45, %v635_v3  ;;  %v6857_v45 = vld [vmem:[%s7410_s19 + $0x64] ss:$4 sps:$4 sm:$0xff]   ;;  %v576_v43 = vld [vmem:[#allocation2 + $0x230] sm:$0xff]  ;;  %v6893_v3 = vld [vmem:[#allocation7 + $0x300] ss:$12 sps:$4 sm:$0xff]  }
  0xaf   : > { %2929 = vmatpush1.bf16.msra.mxu0 %v6839_v35  ;;  %5816 = vmatprep.subr.bf16.mxu1 %v6879_v46  ;;  %v577_v46 = vld [vmem:[#allocation2 + $0x240] sm:$0xff] }
  0xb0   : > { %2930 = vmatprep.subr.bf16.mxu0 %v6845_v38  ;;  %v6917_v38 = vld [vmem:[#allocation7 + $0x3c8] ss:$12 sps:$4 sm:$0xff]  }
  0xb2   : > { %2788 = vmatmul.mubr.bf16.gmra.mrb[12].mxu0 %v7560_v37  ;;  %v7629_v37 = vpack.c.bf16 %v565_v59, %v564_v58  ;;  %5817 = vmatpush3.bf16.msra.mxu1 %v6880_v57  ;;  %v7675_v57 = vld [vmem:[#allocation2 + $0x250] sm:$0xff] }
  0xb3   : > { %2797 = vmatprep.mubr.bf16.mxu0 %v7565_v40  ;;  %2931 = vmatpush1.bf16.msra.mxu0 %v6843_v41  ;;  %v7633_v40 = vld [vmem:[#allocation2] sm:$0xff] }
  0xb4   : > { %3763 = vmatmul.mubr.bf16.gmra.mrb[20].mxu1 %v7595_v11  ;;  %2932 = vmatprep.subr.bf16.mxu0 %v6849_v24  ;;  %v7636_v60 = vpack.c.bf16 %v564_v58, %v7633_v40  ;;  %v591_v44 = vpack.c.bf16 %v572_v31, %v7633_v40  ;;  %v575_v41 = vld [vmem:[#allocation2 + $0x220] sm:$0xff]  ;;  %v6865_v24 = vld [vmem:[%s7410_s19 + $0x6c] ss:$4 sps:$4 sm:$0xff]   ;;  %v594_v58 = vpack.c.bf16 %v7675_v57, %v577_v46 }
  0xb5   : > { %3770 = vmatprep.mubr.bf16.mxu1 %v7592_v8  ;;  %5914 = vmatprep.subr.bf16.mxu1 %v6917_v38  ;;  %v7668_v15 = vpack.c.bf16 %v575_v41, %v574_v39  ;;  %v6922_v40 = vld [vmem:[#allocation7 + $0x3e0] ss:$12 sps:$4 sm:$0xff]   ;;  %v7712_v38 = vld [vmem:[#allocation2 + $0xd2] sm:$0xff] }
  0xb7   : > { %2933 = vmatpush1.bf16.msra.mxu0 %v6847_v52  ;;  %v593_v52 = vpack.c.bf16 %v576_v43, %v575_v41  ;;  %v6907_v41 = vld [vmem:[#allocation7 + $0x364] ss:$12 sps:$4 sm:$0xff]  }
  0xb8   : > { %2934 = vmatprep.subr.bf16.mxu0 %v6853_v55  ;;  %v6873_v55 = vld [vmem:[%s7410_s19 + $0x74] ss:$4 sps:$4 sm:$0xff]  }
  0xba   : > { %2798 = vmatmul.mubr.bf16.gmra.mrb[16].mxu0 %v7583_v56  ;;  %v6866_v56 = vld [vmem:[#allocation7 + $0x270] ss:$12 sps:$4 sm:$0xff]  }
  0xbb   : > { %2807 = vmatprep.mubr.bf16.mxu0 %v7579_v53  ;;  %2935 = vmatpush1.bf16.msra.mxu0 %v6851_v18  ;;  %v588_v53 = vpack.c.bf16 %v566_v4, %v565_v59  ;;  %v675_v59 = vld [vmem:[#allocation2 + $0x2] sm:$0xff]  ;;  %v7678_v18 = vld [vmem:[#allocation2 + $0x12] sm:$0xff] }
  0xbc   : > { %3771 = vmatmul.mubr.bf16.gmra.mrb[24].mxu1 %v7608_v32  ;;  %2936 = vmatprep.subr.bf16.mxu0 %v6860_v21  ;;  %v6921_v21 = vld [vmem:[#allocation7 + $0x308] ss:$12 sps:$4 sm:$0xff]  }
  0xbd   : > { %3778 = vmatprep.mubr.bf16.mxu1 %v7611_v33 }
  0xbf   : > { %2937 = vmatpush1.bf16.msra.mxu0 %v6858_v63  ;;  %v6923_v63 = vld [vmem:[#allocation7 + $0x320] ss:$12 sps:$4 sm:$0xff]  }
  0xc0   : > { %2938 = vmatprep.subr.bf16.mxu0 %v6868_v2  ;;  %v6927_v2 = vld [vmem:[#allocation7 + $0x3f8] ss:$12 sps:$4 sm:$0xff]  }
  0xc2   : > { %2808 = vmatmul.mubr.bf16.gmra.mrb[20].mxu0 %v7595_v11  ;;  %v5658_v11 = vunpack.c.h.bf16 %v7557_v36  ;;  %v590_v36 = vpack.c.bf16 %v7655_v25, %v569_v10 }
  0xc3   : > { %2817 = vmatprep.mubr.bf16.mxu0 %v7592_v8  ;;  %2939 = vmatpush1.bf16.msra.mxu0 %v6866_v56  ;;  %v589_v8 = vpack.c.bf16 %v568_v9, %v567_v5  ;;  %v6928_v5 = vld [vmem:[#allocation7 + $0x338] ss:$12 sps:$4 sm:$0xff]   ;;  %v6929_v56 = vld [vmem:[#allocation7 + $0x410] ss:$12 sps:$4 sm:$0xff]   ;;  %v6934_v9 = vld [vmem:[#allocation7 + $0x428] ss:$12 sps:$4 sm:$0xff]  }
  0xc4   : > { %3779 = vmatmul.mubr.bf16.gmra.mrb[28].mxu1 %v7621_v47  ;;  %2940 = vmatprep.subr.bf16.mxu0 %v6876_v51  ;;  %538 = vst [vmem:[#allocation2 + $0x1c1] sm:$0xff] %v5658_v11  ;;  %v7689_v51 = vld [vmem:[#allocation2 + $0x42] sm:$0xff] }
  0xc5   : > { %3786 = vmatprep.mubr.bf16.mxu1 %v7626_v50  ;;  %v7697_v11 = vld [vmem:[#allocation2 + $0x62] sm:$0xff] }
  0xc7   : > { %2941 = vmatpush1.bf16.msra.mxu0 %v6874_v7  ;;  %v746_v7 = vld [vmem:[#allocation2 + $0x80] sm:$0xff] }
  0xc8   : > { %2942 = vmatprep.subr.bf16.mxu0 %v6883_v12  ;;  %v6935_v12 = vld [vmem:[#allocation7 + $0x368] ss:$12 sps:$4 sm:$0xff]  }
  0xca   : > { %2818 = vmatmul.mubr.bf16.gmra.mrb[24].mxu0 %v7608_v32  ;;  %v573_v32 = vld [vmem:[#allocation2 + $0x200] sm:$0xff] }
  0xcb   : > { %2827 = vmatprep.mubr.bf16.mxu0 %v7611_v33  ;;  %2943 = vmatpush1.bf16.msra.mxu0 %v6881_v14  ;;  %v6890_v33 = vld [vmem:[#allocation7 + $0x2e8] ss:$12 sps:$4 sm:$0xff]   ;;  %v7662_v35 = vpack.c.bf16 %v573_v32, %v572_v31  ;;  %v592_v42 = vpack.c.bf16 %v574_v39, %v573_v32  ;;  %v774_v14 = vpack.c.bf16 %v746_v7, %v7554_v30  ;;  %v6942_v30 = vld [vmem:[#allocation7 + $0x398] ss:$12 sps:$4 sm:$0xff]   ;;  %v6944_v31 = vld [vmem:[#allocation7 + $0x3b0] ss:$12 sps:$4 sm:$0xff]  }
  0xcc   : > { %3787 = vmatmul.mubr.bf16.gmra.mrb[32].mxu1 %v7636_v60  ;;  %2944 = vmatprep.subr.bf16.mxu0 %v6886_v16  ;;  %v6936_v16 = vld [vmem:[#allocation7 + $0x440] ss:$12 sps:$4 sm:$0xff]  }
  0xcd   : > { %3794 = vmatprep.mubr.bf16.mxu1 %v7640_v62 }
  0xcf   : > { %2945 = vmatpush1.bf16.msra.mxu0 %v6884_v22  ;;  %v6941_v22 = vld [vmem:[#allocation7 + $0x458] ss:$12 sps:$4 sm:$0xff]  }
  0xd0   : > { %2946 = vmatprep.subr.bf16.mxu0 %v6889_v23 }
  0xd2   : > { %2828 = vmatmul.mubr.bf16.gmra.mrb[28].mxu0 %v7621_v47  ;;  %v7671_v47 = vpack.c.bf16 %v577_v46, %v576_v43  ;;  %v6905_v43 = vld [vmem:[#allocation7 + $0x360] ss:$12 sps:$4 sm:$0xff]  }
  0xd3   : > { %2837 = vmatprep.mubr.bf16.mxu0 %v7626_v50  ;;  %2947 = vmatpush1.bf16.msra.mxu0 %v6887_v1  ;;  %v5674_v50 = vunpack.c.h.bf16 %v7604_v29  ;;  %v707_v29 = vpack.c.bf16 %v7678_v18, %v675_v59  ;;  %v6943_v1 = vld [vmem:[#allocation7 + $0x470] ss:$12 sps:$4 sm:$0xff]   ;;  %v754_v46 = vld [vmem:[#allocation2 + $0x120] sm:$0xff] }
  0xd4   : > { %3795 = vmatmul.mubr.bf16.gmra.mrb[36].mxu1 %v588_v53  ;;  %2948 = vmatprep.subr.bf16.mxu0 %v6892_v27  ;;  %v683_v27 = vld [vmem:[#allocation2 + $0xa2] sm:$0xff] }
  0xd5   : > { %3802 = vmatprep.mubr.bf16.mxu1 %v6842_v49  ;;  %546 = vst [vmem:[#allocation2 + $0x261] sm:$0xff] %v5674_v50  ;;  %v6910_v50 = vld [vmem:[#allocation7 + $0x37c] ss:$12 sps:$4 sm:$0xff]  }
  0xd6   : > { %v7725_v59 = vld [vmem:[#allocation2 + $0x102] sm:$0xff] }
  0xd7   : > { %2949 = vmatpush1.bf16.msra.mxu0 %v6890_v33  ;;  %v6901_v33 = vld [vmem:[#allocation7 + $0x334] ss:$12 sps:$4 sm:$0xff]  }
  0xd8   : > { %3111 = vmatprep.subr.bf16.mxu0 %v6895_v34  ;;  %v7710_v34 = vld [vmem:[#allocation2 + $0xc2] sm:$0xff] }
  0xd9   : > { %v712_v39 = vpack.c.bf16 %v7712_v38, %v7710_v34 }
  0xda   : > { %2838 = vmatmul.mubr.bf16.gmra.mrb[32].mxu0 %v7636_v60  ;;  %v7682_v60 = vld [vmem:[#allocation2 + $0x22] sm:$0xff] }
  0xdb   : > { %2847 = vmatprep.mubr.bf16.mxu0 %v7640_v62  ;;  %v7684_v62 = vld [vmem:[#allocation2 + $0x32] sm:$0xff] }
  0xdc   : > { %3803 = vmatmul.mubr.bf16.gmra.mrb[40].mxu1 %v589_v8  ;;  %v708_v4 = vpack.c.bf16 %v7684_v62, %v7682_v60 }
  0xdd   : > { %3810 = vmatprep.mubr.bf16.mxu1 %v6846_v19 }
  0xe2   : > { %2848 = vmatmul.mubr.bf16.gmra.mrb[36].mxu0 %v588_v53  ;;  %v7691_v53 = vld [vmem:[#allocation2 + $0x52] sm:$0xff] }
  0xe3   : > { %2857 = vmatprep.mubr.bf16.mxu0 %v6842_v49  ;;  %v6930_v49 = vld [vmem:[#allocation7 + $0x350] ss:$12 sps:$4 sm:$0xff]   ;;  %v709_v10 = vpack.c.bf16 %v7691_v53, %v7689_v51 }
  0xe4   : > { %3811 = vmatmul.mubr.bf16.gmra.mrb[44].mxu1 %v590_v36 }
  0xe5   : > { %3818 = vmatprep.mubr.bf16.mxu1 %v655_v28 }
  0xea   : > { %2858 = vmatmul.mubr.bf16.gmra.mrb[40].mxu0 %v589_v8  ;;  %v7699_v8 = vld [vmem:[#allocation2 + $0x72] sm:$0xff] }
  0xeb   : > { %2867 = vmatprep.mubr.bf16.mxu0 %v6846_v19  ;;  %v6937_v19 = vld [vmem:[#allocation7 + $0x380] ss:$12 sps:$4 sm:$0xff]   ;;  %v710_v23 = vpack.c.bf16 %v7699_v8, %v7697_v11 }
  0xec   : > { %3819 = vmatmul.mubr.bf16.gmra.mrb[48].mxu1 %v591_v44 }
  0xed   : > { %3826 = vmatprep.mubr.bf16.mxu1 %v6857_v45 }
  0xf2   : > { %2868 = vmatmul.mubr.bf16.gmra.mrb[44].mxu0 %v590_v36  ;;  %v7705_v36 = vld [vmem:[#allocation2 + $0xb2] sm:$0xff] }
  0xf3   : > { %2877 = vmatprep.mubr.bf16.mxu0 %v655_v28  ;;  %v6898_v28 = vld [vmem:[#allocation7 + $0x31c] ss:$12 sps:$4 sm:$0xff]   ;;  %v711_v32 = vpack.c.bf16 %v7705_v36, %v683_v27 }
  0xf4   : > { %3827 = vmatmul.mubr.bf16.gmra.mrb[52].mxu1 %v592_v42  ;;  %v6950_v27 = vld [vmem:[#allocation7 + $0x43c] ss:$12 sps:$4 sm:$0xff]  }
  0xf5   : > { %3834 = vmatprep.mubr.bf16.mxu1 %v6865_v24 }
  0xfa   : > { %2878 = vmatmul.mubr.bf16.gmra.mrb[48].mxu0 %v591_v44  ;;  %v6899_v44 = vld [vmem:[#allocation7 + $0x330] ss:$12 sps:$4 sm:$0xff]  }
  0xfb   : > { %2887 = vmatprep.mubr.bf16.mxu0 %v6857_v45  ;;  %v6904_v45 = vld [vmem:[#allocation7 + $0x34c] ss:$12 sps:$4 sm:$0xff]  }
  0xfc   : > { %3835 = vmatmul.mubr.bf16.gmra.mrb[56].mxu1 %v593_v52 }
  0xfd   : > { %3842 = vmatprep.mubr.bf16.mxu1 %v6873_v55 }
 0x102   : > { %2888 = vmatmul.mubr.bf16.gmra.mrb[52].mxu0 %v592_v42  ;;  %v7718_v42 = vld [vmem:[#allocation2 + $0xe2] sm:$0xff] }
 0x103   : > { %2897 = vmatprep.mubr.bf16.mxu0 %v6865_v24  ;;  %v7720_v24 = vld [vmem:[#allocation2 + $0xf2] sm:$0xff] }
 0x104   : > { %3843 = vmatmul.mubr.bf16.gmra.mrb[60].mxu1 %v594_v58 }
 0x105   : > { %3883 = vmatprep.mubr.bf16.mxu1 %v7510_v54 }
 0x10a   : > { %2898 = vmatmul.mubr.bf16.gmra.mrb[56].mxu0 %v593_v52  ;;  %v778_v52 = vpack.c.bf16 %v754_v46, %v7616_v20  ;;  %v6914_v20 = vld [vmem:[#allocation7 + $0x3a8] ss:$12 sps:$4 sm:$0xff]  }
 0x10b   : > { %2907 = vmatprep.mubr.bf16.mxu0 %v6873_v55  ;;  %v6908_v55 = vld [vmem:[#allocation7 + $0x378] ss:$12 sps:$4 sm:$0xff]   ;;  %v6954_v46 = vld [vmem:[#allocation7 + $0x468] ss:$12 sps:$4 sm:$0xff]  }
 0x10c   : > { %3884 = vmatmul.mubr.bf16.vlgmr.msra.gmra.mrb[64].mxu1 %v707_v29 }
 0x10d   : > { %3891 = vmatprep.mubr.bf16.mxu1 %v7517_v61  ;;  %5915 = vmatpush3.bf16.msra.mxu1 %v6921_v21  ;;  %v6911_v21 = vld [vmem:[#allocation7 + $0x390] ss:$12 sps:$4 sm:$0xff]  }
 0x10e   : > { %5916 = vmatprep.subr.bf16.mxu1 %v6922_v40  ;;  %v6916_v40 = vld [vmem:[#allocation7 + $0x3ac] ss:$12 sps:$4 sm:$0xff]  }
 0x111   : > { %5917 = vmatpush3.bf16.msra.mxu1 %v6923_v63 }
 0x112   : > { %5918 = vmatprep.subr.bf16.mxu1 %v6927_v2  ;;  %2908 = vmatmul.mubr.bf16.gmra.mrb[60].mxu0 %v594_v58  ;;  %v6913_v58 = vld [vmem:[#allocation7 + $0x394] ss:$12 sps:$4 sm:$0xff]   ;;  %v6920_v2 = vld [vmem:[#allocation7 + $0x3c4] ss:$12 sps:$4 sm:$0xff]  }
 0x113   : > { %2950 = vmatprep.mubr.bf16.mxu0 %v7510_v54  ;;  %v6896_v54 = vld [vmem:[#allocation7 + $0x318] ss:$12 sps:$4 sm:$0xff]  }
 0x114   : > { %3892 = vmatmul.mubr.bf16.gmra.mrb[68].mxu1 %v708_v4 }
 0x115   : > { %3899 = vmatprep.mubr.bf16.mxu1 %v7531_v13  ;;  %5919 = vmatpush3.bf16.msra.mxu1 %v6928_v5  ;;  %v7733_v5 = vld [vmem:[#allocation2 + $0x152] sm:$0xff] }
 0x116   : > { %5920 = vmatprep.subr.bf16.mxu1 %v6929_v56  ;;  %v6918_v56 = vld [vmem:[#allocation7 + $0x3c0] ss:$12 sps:$4 sm:$0xff]  }
 0x119   : > { %5921 = vmatpush3.bf16.msra.mxu1 %v6930_v49  ;;  %v6926_v49 = vld [vmem:[#allocation7 + $0x3dc] ss:$12 sps:$4 sm:$0xff]  }
 0x11a   : > { %5922 = vmatprep.subr.bf16.mxu1 %v6934_v9  ;;  %2951 = vmatmul.mubr.bf16.vlgmr.msra.gmra.mrb[0].mxu0 %v707_v29  ;;  %v7727_v29 = vld [vmem:[#allocation2 + $0x112] sm:$0xff] }
 0x11b   : > { %3112 = vmatpush1.bf16.msra.mxu0 %v6893_v3  ;;  %2960 = vmatprep.mubr.bf16.mxu0 %v7517_v61  ;;  %v6902_v61 = vld [vmem:[#allocation7 + $0x348] ss:$12 sps:$4 sm:$0xff]   ;;  %v714_v63 = vpack.c.bf16 %v7727_v29, %v7725_v59  ;;  %v762_v3 = vld [vmem:[#allocation2 + $0x1c0] sm:$0xff] }
 0x11c   : > { %3900 = vmatmul.mubr.bf16.gmra.mrb[72].mxu1 %v709_v10  ;;  %3113 = vmatprep.subr.bf16.mxu0 %v6898_v28  ;;  %v6933_v9 = vld [vmem:[#allocation7 + $0x3f4] ss:$12 sps:$4 sm:$0xff]   ;;  %v7761_v28 = vpack.c.bf16 %v762_v3, %v7655_v25 }
 0x11d   : > { %3907 = vmatprep.mubr.bf16.mxu1 %v774_v14  ;;  %5923 = vmatpush3.bf16.msra.mxu1 %v6935_v12  ;;  %v7743_v12 = vld [vmem:[#allocation2 + $0x172] sm:$0xff] }
 0x11e   : > { %5924 = vmatprep.subr.bf16.mxu1 %v6936_v16  ;;  %v6940_v16 = vld [vmem:[#allocation7 + $0x40c] ss:$12 sps:$4 sm:$0xff]  }
 0x11f   : > { %3114 = vmatpush1.bf16.msra.mxu0 %v6896_v54  ;;  %v7765_v54 = vld [vmem:[#allocation2 + $0x1a2] sm:$0xff]  ;;  %v7802_v3 = vld [vmem:[#allocation2 + $0x232] sm:$0xff] }
 0x120   : > { %3115 = vmatprep.subr.bf16.mxu0 %v6901_v33  ;;  %v7767_v33 = vld [vmem:[#allocation2 + $0x1b2] sm:$0xff] }
 0x121   : > { %5925 = vmatpush3.bf16.msra.mxu1 %v6937_v19  ;;  %v6938_v19 = vld [vmem:[#allocation7 + $0x408] ss:$12 sps:$4 sm:$0xff]   ;;  %v718_v25 = vpack.c.bf16 %v7767_v33, %v7765_v54 }
 0x122   : > { %5926 = vmatprep.subr.bf16.mxu1 %v6941_v22  ;;  %2961 = vmatmul.mubr.bf16.gmra.mrb[4].mxu0 %v708_v4  ;;  %v691_v4 = vld [vmem:[#allocation2 + $0x142] sm:$0xff] }
 0x123   : > { %2970 = vmatprep.mubr.bf16.mxu0 %v7531_v13  ;;  %3116 = vmatpush1.bf16.msra.mxu0 %v6899_v44  ;;  %v713_v13 = vpack.c.bf16 %v7720_v24, %v7718_v42  ;;  %v7736_v7 = vpack.c.bf16 %v7733_v5, %v691_v4  ;;  %v6947_v22 = vld [vmem:[#allocation7 + $0x424] ss:$12 sps:$4 sm:$0xff]   ;;  %v6981_v4 = vld [vmem:[#allocation7 + $0x548] ss:$12 sps:$4 sm:$0xff]  }
 0x124   : > { %3908 = vmatmul.mubr.bf16.gmra.mrb[76].mxu1 %v710_v23  ;;  %3117 = vmatprep.subr.bf16.mxu0 %v6904_v45  ;;  %v6951_v44 = vld [vmem:[#allocation7 + $0x450] ss:$12 sps:$4 sm:$0xff]   ;;  %v6956_v45 = vld [vmem:[#allocation7 + $0x46c] ss:$12 sps:$4 sm:$0xff]  }
 0x125   : > { %3915 = vmatprep.mubr.bf16.mxu1 %v7573_v48  ;;  %5927 = vmatpush3.bf16.msra.mxu1 %v6942_v30  ;;  %v7754_v30 = vld [vmem:[#allocation2 + $0x192] sm:$0xff] }
 0x126   : > { %5928 = vmatprep.subr.bf16.mxu1 %v6943_v1  ;;  %v6945_v1 = vld [vmem:[#allocation7 + $0x420] ss:$12 sps:$4 sm:$0xff]  }
 0x127   : > { %3118 = vmatpush1.bf16.msra.mxu0 %v6902_v61 }
 0x128   : > { %3119 = vmatprep.subr.bf16.mxu0 %v6907_v41 }
 0x129   : > { %5929 = vmatpush3.bf16.msra.mxu1 %v6944_v31  ;;  %v6948_v31 = vld [vmem:[#allocation7 + $0x438] ss:$12 sps:$4 sm:$0xff]  }
 0x12a   : > { %2971 = vmatmul.mubr.bf16.gmra.mrb[8].mxu0 %v709_v10  ;;  %v7741_v10 = vld [vmem:[#allocation2 + $0x162] sm:$0xff]  ;;  %6026 = vmatprep.subr.bf16.mxu1 %v6981_v4 }
 0x12b   : > { %2980 = vmatprep.mubr.bf16.mxu0 %v774_v14  ;;  %3120 = vmatpush1.bf16.msra.mxu0 %v6905_v43  ;;  %v6931_v14 = vld [vmem:[#allocation7 + $0x3f0] ss:$12 sps:$4 sm:$0xff]  }
 0x12c   : > { %3916 = vmatmul.mubr.bf16.gmra.mrb[80].mxu1 %v711_v32  ;;  %3121 = vmatprep.subr.bf16.mxu0 %v6910_v50 }
 0x12d   : > { %3923 = vmatprep.mubr.bf16.mxu1 %v7588_v6 }
 0x12f   : > { %3122 = vmatpush1.bf16.msra.mxu0 %v6908_v55  ;;  %v699_v55 = vld [vmem:[#allocation2 + $0x1e2] sm:$0xff] }
 0x130   : > { %3123 = vmatprep.subr.bf16.mxu0 %v6913_v58  ;;  %v7777_v58 = vld [vmem:[#allocation2 + $0x1f2] sm:$0xff] }
 0x132   : > { %2981 = vmatmul.mubr.bf16.gmra.mrb[12].mxu0 %v710_v23  ;;  %v7752_v23 = vld [vmem:[#allocation2 + $0x182] sm:$0xff] }
 0x133   : > { %2990 = vmatprep.mubr.bf16.mxu0 %v7573_v48  ;;  %3124 = vmatpush1.bf16.msra.mxu0 %v6911_v21  ;;  %v6924_v48 = vld [vmem:[#allocation7 + $0x3d8] ss:$12 sps:$4 sm:$0xff]  }
 0x134   : > { %3924 = vmatmul.mubr.bf16.gmra.mrb[84].mxu1 %v712_v39  ;;  %3125 = vmatprep.subr.bf16.mxu0 %v6916_v40 }
 0x135   : > { %3931 = vmatprep.mubr.bf16.mxu1 %v7600_v26 }
 0x137   : > { %3126 = vmatpush1.bf16.msra.mxu0 %v6914_v20 }
 0x138   : > { %3127 = vmatprep.subr.bf16.mxu0 %v6920_v2 }
 0x13a   : > { %2991 = vmatmul.mubr.bf16.gmra.mrb[16].mxu0 %v711_v32  ;;  %v6953_v32 = vld [vmem:[#allocation7 + $0x454] ss:$12 sps:$4 sm:$0xff]  }
 0x13b   : > { %3000 = vmatprep.mubr.bf16.mxu0 %v7588_v6  ;;  %3128 = vmatpush1.bf16.msra.mxu0 %v6918_v56  ;;  %v7747_v6 = vpack.c.bf16 %v7743_v12, %v7741_v10 }
 0x13c   : > { %3932 = vmatmul.mubr.bf16.gmra.mrb[88].mxu1 %v713_v13  ;;  %3129 = vmatprep.subr.bf16.mxu0 %v6926_v49  ;;  %v7787_v49 = vld [vmem:[#allocation2 + $0x202] sm:$0xff] }
 0x13d   : > { %3939 = vmatprep.mubr.bf16.mxu1 %v778_v52 }
 0x13f   : > { %3130 = vmatpush1.bf16.msra.mxu0 %v6924_v48  ;;  %v7789_v48 = vld [vmem:[#allocation2 + $0x212] sm:$0xff] }
 0x140   : > { %3131 = vmatprep.subr.bf16.mxu0 %v6933_v9 }
 0x142   : > { %3001 = vmatmul.mubr.bf16.gmra.mrb[20].mxu0 %v712_v39 }
 0x143   : > { %3010 = vmatprep.mubr.bf16.mxu0 %v7600_v26  ;;  %3132 = vmatpush1.bf16.msra.mxu0 %v6931_v14  ;;  %v7758_v26 = vpack.c.bf16 %v7754_v30, %v7752_v23 }
 0x144   : > { %3940 = vmatmul.mubr.bf16.gmra.mrb[92].mxu1 %v714_v63  ;;  %3133 = vmatprep.subr.bf16.mxu0 %v6940_v16 }
 0x145   : > { %3947 = vmatprep.mubr.bf16.mxu1 %v7629_v37 }
 0x147   : > { %3134 = vmatpush1.bf16.msra.mxu0 %v6938_v19 }
 0x148   : > { %3135 = vmatprep.subr.bf16.mxu0 %v6947_v22 }
 0x14a   : > { %3011 = vmatmul.mubr.bf16.gmra.mrb[24].mxu0 %v713_v13  ;;  %v6959_v13 = vld [vmem:[#allocation7 + $0x484] ss:$12 sps:$4 sm:$0xff]  }
 0x14b   : > { %3020 = vmatprep.mubr.bf16.mxu0 %v778_v52  ;;  %3136 = vmatpush1.bf16.msra.mxu0 %v6945_v1  ;;  %v7800_v1 = vld [vmem:[#allocation2 + $0x222] sm:$0xff] }
 0x14c   : > { %3948 = vmatmul.mubr.bf16.gmra.mrb[96].mxu1 %v7736_v7  ;;  %3137 = vmatprep.subr.bf16.mxu0 %v6950_v27 }
 0x14d   : > { %3955 = vmatprep.mubr.bf16.mxu1 %v7643_v0 }
 0x14f   : > { %3138 = vmatpush1.bf16.msra.mxu0 %v6948_v31 }
 0x150   : > { %3139 = vmatprep.subr.bf16.mxu0 %v6953_v32 }
 0x152   : > { %3021 = vmatmul.mubr.bf16.gmra.mrb[28].mxu0 %v714_v63 }
 0x153   : > { %3030 = vmatprep.mubr.bf16.mxu0 %v7629_v37  ;;  %3140 = vmatpush1.bf16.msra.mxu0 %v6951_v44  ;;  %v719_v37 = vpack.c.bf16 %v7777_v58, %v699_v55 }
 0x154   : > { %3956 = vmatmul.mubr.bf16.gmra.mrb[100].mxu1 %v7747_v6  ;;  %3141 = vmatprep.subr.bf16.mxu0 %v6956_v45 }
 0x155   : > { %3963 = vmatprep.mubr.bf16.mxu1 %v7649_v17 }
 0x157   : > { %3142 = vmatpush1.bf16.msra.mxu0 %v6954_v46 }
 0x158   : > { %3304 = vmatprep.subr.bf16.mxu0 %v6959_v13 }
 0x15a   : > { %3031 = vmatmul.mubr.bf16.gmra.mrb[32].mxu0 %v7736_v7 }
 0x15b   : > { %3040 = vmatprep.mubr.bf16.mxu0 %v7643_v0  ;;  %v720_v0 = vpack.c.bf16 %v7789_v48, %v7787_v49 }
 0x15c   : > { %3964 = vmatmul.mubr.bf16.gmra.mrb[104].mxu1 %v7758_v26 }
 0x15d   : > { %3971 = vmatprep.mubr.bf16.mxu1 %v7761_v28 }
 0x15f   : > { %v5706_v39 = vpop.f32.mrb[0].mxu1 }
 0x160   : > { %v5707_v61 = vpop.f32.mrb[1].mxu1 }
 0x161   : > { %v7772_v41 = vadd.f32 %v5707_v61, %v5706_v39  ;;  %v5709_v43 = vpop.f32.mrb[2].mxu1 }
 0x162   : > { %v5710_v50 = vpop.f32.mrb[3].mxu1  ;;  %3041 = vmatmul.mubr.bf16.gmra.mrb[36].mxu0 %v7747_v6  ;;  %v770_v6 = vld [vmem:[#allocation2 + $0x260] sm:$0xff] }
 0x163   : > { %v7774_v52 = vadd.f32 %v5710_v50, %v5709_v43  ;;  %3050 = vmatprep.mubr.bf16.mxu0 %v7649_v17  ;;  %v7807_v17 = vpack.c.bf16 %v7802_v3, %v7800_v1  ;;  %v7811_v32 = vpack.c.bf16 %v770_v6, %v7675_v57  ;;  %v7821_v43 = vld [vmem:[#allocation2 + $0x252] sm:$0xff]  ;;  %v7830_v50 = vpack.c.bf16 %v7682_v60, %v7678_v18 }
 0x164   : > { %3972 = vmatmul.mubr.bf16.gmra.mrb[108].mxu1 %v718_v25  ;;  %v7846_v60 = vpack.c.bf16 %v7689_v51, %v7684_v62  ;;  %v6991_v62 = vld [vmem:[#allocation7 + $0x578] ss:$12 sps:$4 sm:$0xff]  }
 0x165   : > { %3979 = vmatprep.mubr.bf16.mxu1 %v7662_v35 }
 0x167   : > { %v5712_v21 = vpop.f32.mrb[4].mxu1 }
 0x168   : > { %v5713_v40 = vpop.f32.mrb[5].mxu1 }
 0x169   : > { %v7782_v63 = vadd.f32 %v5713_v40, %v5712_v21  ;;  %v5715_v20 = vpop.f32.mrb[6].mxu1 }
 0x16a   : > { %v5716_v2 = vpop.f32.mrb[7].mxu1  ;;  %3051 = vmatmul.mubr.bf16.gmra.mrb[40].mxu0 %v7758_v26  ;;  %v7819_v26 = vld [vmem:[#allocation2 + $0x242] sm:$0xff] }
 0x16b   : > { %v7784_v56 = vadd.f32 %v5716_v2, %v5715_v20  ;;  %3060 = vmatprep.mubr.bf16.mxu0 %v7761_v28  ;;  %v7825_v57 = vpack.c.bf16 %v7821_v43, %v7819_v26  ;;  %v7838_v20 = vld [vmem:[#allocation2 + $0x21] sm:$0xff] }
 0x16c   : > { %3980 = vmatmul.mubr.bf16.gmra.mrb[112].mxu1 %v719_v37 }
 0x16d   : > { %3987 = vmatprep.mubr.bf16.mxu1 %v7668_v15 }
 0x16f   : > { %v5718_v7 = vpop.f32.mrb[8].mxu1 }
 0x170   : > { %v5719_v9 = vpop.f32.mrb[9].mxu1 }
 0x171   : > { %v7795_v14 = vadd.f32 %v5719_v9, %v5718_v7  ;;  %v5721_v16 = vpop.f32.mrb[10].mxu1  ;;  %v6985_v9 = vld [vmem:[#allocation7 + $0x488] ss:$12 sps:$4 sm:$0xff]  }
 0x172   : > { %v5722_v19 = vpop.f32.mrb[11].mxu1  ;;  %3061 = vmatmul.mubr.bf16.gmra.mrb[44].mxu0 %v718_v25  ;;  %v803_v25 = vld [vmem:[#allocation2 + $0x11] sm:$0xff] }
 0x173   : > { %v7797_v22 = vadd.f32 %v5722_v19, %v5721_v16  ;;  %3070 = vmatprep.mubr.bf16.mxu0 %v7662_v35  ;;  %v7841_v35 = vpack.c.bf16 %v7838_v20, %v803_v25  ;;  %v6986_v19 = vld [vmem:[#allocation7 + $0x560] ss:$12 sps:$4 sm:$0xff]   ;;  %v6993_v25 = vld [vmem:[#allocation7 + $0x590] ss:$12 sps:$4 sm:$0xff]  }
 0x174   : > { %3988 = vmatmul.mubr.bf16.gmra.mrb[116].mxu1 %v720_v0 }
 0x175   : > { %3995 = vmatprep.mubr.bf16.mxu1 %v7671_v47  ;;  %9302 = vst [vmem:[#allocation15_spill] sm:$0xff] %v7841_v35 }
 0x177   : > { %v5724_v27 = vpop.f32.mrb[12].mxu1 }
 0x178   : > { %v5725_v31 = vpop.f32.mrb[13].mxu1 }
 0x179   : > { %v7813_v44 = vadd.f32 %v5725_v31, %v5724_v27  ;;  %v5727_v45 = vpop.f32.mrb[14].mxu1  ;;  %v7856_v27 = vld [vmem:[#allocation2 + $0x41] sm:$0xff] }
 0x17a   : > { %v5728_v39 = vpop.f32.mrb[15].mxu1  ;;  %3071 = vmatmul.mubr.bf16.gmra.mrb[48].mxu0 %v719_v37  ;;  %v7854_v37 = vld [vmem:[#allocation2 + $0x31] sm:$0xff] }
 0x17b   : > { %v7815_v61 = vadd.f32 %v5728_v39, %v5727_v45  ;;  %3080 = vmatprep.mubr.bf16.mxu0 %v7668_v15  ;;  %v6987_v15 = vld [vmem:[#allocation7 + $0x4a0] ss:$12 sps:$4 sm:$0xff]   ;;  %v7860_v31 = vpack.c.bf16 %v7856_v27, %v7854_v37  ;;  %v7865_v39 = vpack.c.bf16 %v7697_v11, %v7691_v53  ;;  %v6994_v53 = vld [vmem:[#allocation7 + $0x4d0] ss:$12 sps:$4 sm:$0xff]  }
 0x17c   : > { %3996 = vmatmul.mubr.bf16.gmra.mrb[120].mxu1 %v7807_v17  ;;  %v874_v11 = vld [vmem:[#allocation2 + $0x82] sm:$0xff] }
 0x17d   : > { %4003 = vmatprep.mubr.bf16.mxu1 %v7811_v32  ;;  %9303 = vst [vmem:[#allocation16_spill] sm:$0xff] %v7860_v31 }
 0x17f   : > { %v5730_v46 = vpop.f32.mrb[16].mxu1 }
 0x180   : > { %v5731_v28 = vpop.f32.mrb[17].mxu1 }
 0x181   : > { %v7832_v13 = vadd.f32 %v5731_v28, %v5730_v46  ;;  %v5733_v55 = vpop.f32.mrb[18].mxu1 }
 0x182   : > { %v5734_v21 = vpop.f32.mrb[19].mxu1  ;;  %3081 = vmatmul.mubr.bf16.gmra.mrb[52].mxu0 %v720_v0 }
 0x183   : > { %v7834_v40 = vadd.f32 %v5734_v21, %v5733_v55  ;;  %3090 = vmatprep.mubr.bf16.mxu0 %v7671_v47  ;;  %v6992_v55 = vld [vmem:[#allocation7 + $0x4b8] ss:$12 sps:$4 sm:$0xff]  }
 0x184   : > { %4004 = vmatmul.mubr.bf16.gmra.mrb[124].mxu1 %v7825_v57  ;;  %v7875_v47 = vld [vmem:[#allocation2 + $0x61] sm:$0xff] }
 0x185   : > { %4044 = vmatprep.mubr.bf16.mxu1 %v7830_v50 }
 0x187   : > { %v5736_v2 = vpop.f32.mrb[20].mxu1 }
 0x188   : > { %v5737_v18 = vpop.f32.mrb[21].mxu1 }
 0x189   : > { %v7848_v4 = vadd.f32 %v5737_v18, %v5736_v2  ;;  %v5739_v7 = vpop.f32.mrb[22].mxu1  ;;  %v7873_v2 = vld [vmem:[#allocation2 + $0x51] sm:$0xff] }
 0x18a   : > { %v5740_v16 = vpop.f32.mrb[23].mxu1  ;;  %v6998_v18 = vld [vmem:[#allocation7 + $0x5a8] ss:$12 sps:$4 sm:$0xff]   ;;  %3091 = vmatmul.mubr.bf16.gmra.mrb[56].mxu0 %v7807_v17 }
 0x18b   : > { %v7850_v6 = vadd.f32 %v5740_v16, %v5739_v7  ;;  %3100 = vmatprep.mubr.bf16.mxu0 %v7811_v32  ;;  %v7892_v17 = vld [vmem:[#allocation2 + $0x71] sm:$0xff]  ;;  %v7001_v32 = vld [vmem:[#allocation7 + $0x500] ss:$12 sps:$4 sm:$0xff]  }
 0x18c   : > { %4045 = vmatmul.mubr.bf16.vlgmr.msra.gmra.mrb[128].mxu1 %v7841_v35 }
 0x18d   : > { %4052 = vmatprep.mubr.bf16.mxu1 %v7846_v60  ;;  %6027 = vmatpush3.bf16.msra.mxu1 %v6985_v9  ;;  %v7880_v9 = vpack.c.bf16 %v7875_v47, %v7873_v2 }
 0x18e   : > { %6028 = vmatprep.subr.bf16.mxu1 %v6986_v19  ;;  %v7884_v19 = vpack.c.bf16 %v874_v11, %v7699_v8  ;;  %v7005_v8 = vld [vmem:[#allocation7 + $0x5d8] ss:$12 sps:$4 sm:$0xff]  }
 0x18f   : > { %v5742_v51 = vpop.f32.mrb[24].mxu1  ;;  %9304 = vst [vmem:[#allocation17_spill] sm:$0xff] %v7880_v9 }
 0x190   : > { %v5743_v45 = vpop.f32.mrb[25].mxu1 }
 0x191   : > { %v7867_v46 = vadd.f32 %v5743_v45, %v5742_v51  ;;  %v5745_v28 = vpop.f32.mrb[26].mxu1  ;;  %6029 = vmatpush3.bf16.msra.mxu1 %v6987_v15  ;;  %v6999_v51 = vld [vmem:[#allocation7 + $0x4e8] ss:$12 sps:$4 sm:$0xff]  }
 0x192   : > { %v5746_v21 = vpop.f32.mrb[27].mxu1  ;;  %6030 = vmatprep.subr.bf16.mxu1 %v6991_v62  ;;  %3101 = vmatmul.mubr.bf16.gmra.mrb[60].mxu0 %v7825_v57 }
 0x193   : > { %v7869_v0 = vadd.f32 %v5746_v21, %v5745_v28  ;;  %v7000_v28 = vld [vmem:[#allocation7 + $0x5c0] ss:$12 sps:$4 sm:$0xff]   ;;  %3143 = vmatprep.mubr.bf16.mxu0 %v7830_v50  ;;  %v811_v50 = vld [vmem:[#allocation2 + $0xb1] sm:$0xff] }
 0x194   : > { %4053 = vmatmul.mubr.bf16.gmra.mrb[132].mxu1 %v7860_v31 }
 0x195   : > { %4060 = vmatprep.mubr.bf16.mxu1 %v7865_v39  ;;  %6031 = vmatpush3.bf16.msra.mxu1 %v6992_v55 }
 0x196   : > { %6032 = vmatprep.subr.bf16.mxu1 %v6993_v25  ;;  %v7066_v25 = vld [vmem:[#allocation2 + $0x81] sm:$0xff] }
 0x197   : > { %v5748_v7 = vpop.f32.mrb[28].mxu1 }
 0x198   : > { %v5749_v16 = vpop.f32.mrb[29].mxu1 }
 0x199   : > { %v7886_v15 = vadd.f32 %v5749_v16, %v5748_v7  ;;  %v5751_v62 = vpop.f32.mrb[30].mxu1  ;;  %6033 = vmatpush3.bf16.msra.mxu1 %v6994_v53  ;;  %v7896_v53 = vpack.c.bf16 %v7066_v25, %v7892_v17  ;;  %v7909_v25 = vld [vmem:[#allocation2 + $0xc1] sm:$0xff] }
 0x19a   : > { %v5752_v45 = vpop.f32.mrb[31].mxu1  ;;  %6034 = vmatprep.subr.bf16.mxu1 %v6998_v18  ;;  %v7901_v18 = vpack.c.bf16 %v7710_v34, %v7705_v36  ;;  %v6962_v36 = vld [vmem:[#allocation7 + $0x49c] ss:$12 sps:$4 sm:$0xff]   ;;  %3144 = vmatmul.mubr.bf16.vlgmr.msra.gmra.mrb[0].mxu0 %v7841_v35 }
 0x19b   : > { %v7888_v55 = vadd.f32 %v5752_v45, %v5751_v62  ;;  %9305 = vst [vmem:[#allocation18_spill] sm:$0xff] %v7896_v53  ;;  %v7006_v62 = vld [vmem:[#allocation7 + $0x518] ss:$12 sps:$4 sm:$0xff]   ;;  %v7007_v45 = vld [vmem:[#allocation7 + $0x5f0] ss:$12 sps:$4 sm:$0xff]   ;;  %3153 = vmatprep.mubr.bf16.mxu0 %v7846_v60 }
 0x19c   : > { %4061 = vmatmul.mubr.bf16.gmra.mrb[136].mxu1 %v7880_v9  ;;  %v7008_v34 = vld [vmem:[#allocation7 + $0x530] ss:$12 sps:$4 sm:$0xff]   ;;  %v7928_v60 = vld [vmem:[#allocation2 + $0xe1] sm:$0xff] }
 0x19d   : > { %4068 = vmatprep.mubr.bf16.mxu1 %v7884_v19  ;;  %6035 = vmatpush3.bf16.msra.mxu1 %v6999_v51  ;;  %9309 = vst [vmem:[#allocation22_spill] sm:$0xff] %v7928_v60 }
 0x19e   : > { %6036 = vmatprep.subr.bf16.mxu1 %v7000_v28  ;;  %v6957_v28 = vld [vmem:[#allocation7 + $0x480] ss:$12 sps:$4 sm:$0xff]  }
 0x19f   : > { %v5754_v21 = vpop.f32.mrb[32].mxu1  ;;  %3305 = vmatpush1.bf16.msra.mxu0 %v6957_v28  ;;  %v7926_v28 = vld [vmem:[#allocation2 + $0xd1] sm:$0xff] }
 0x1a0   : > { %v5755_v11 = vpop.f32.mrb[33].mxu1  ;;  %3306 = vmatprep.subr.bf16.mxu0 %v6962_v36  ;;  %v7933_v36 = vpack.c.bf16 %v7928_v60, %v7926_v28 }
 0x1a1   : > { %v7903_v7 = vadd.f32 %v5755_v11, %v5754_v21  ;;  %v5757_v16 = vpop.f32.mrb[34].mxu1  ;;  %6037 = vmatpush3.bf16.msra.mxu1 %v7001_v32  ;;  %v7913_v32 = vpack.c.bf16 %v7909_v25, %v811_v50  ;;  %v7918_v11 = vpack.c.bf16 %v7718_v42, %v7712_v38  ;;  %v6963_v38 = vld [vmem:[#allocation7 + $0x4b0] ss:$12 sps:$4 sm:$0xff]   ;;  %v6968_v42 = vld [vmem:[#allocation7 + $0x4cc] ss:$12 sps:$4 sm:$0xff]  }
 0x1a2   : > { %v5758_v51 = vpop.f32.mrb[35].mxu1  ;;  %6038 = vmatprep.subr.bf16.mxu1 %v7005_v8  ;;  %3154 = vmatmul.mubr.bf16.gmra.mrb[4].mxu0 %v7860_v31  ;;  %9310 = vst [vmem:[#allocation23_spill] sm:$0xff] %v7933_v36 }
 0x1a3   : > { %v7905_v57 = vadd.f32 %v5758_v51, %v5757_v16  ;;  %9307 = vst [vmem:[#allocation20_spill] sm:$0xff] %v7913_v32  ;;  %v6960_v16 = vld [vmem:[#allocation7 + $0x498] ss:$12 sps:$4 sm:$0xff]   ;;  %3163 = vmatprep.mubr.bf16.mxu0 %v7865_v39 }
 0x1a4   : > { %4069 = vmatmul.mubr.bf16.gmra.mrb[140].mxu1 %v7896_v53  ;;  %3307 = vmatpush1.bf16.msra.mxu0 %v6960_v16  ;;  %v7948_v39 = vld [vmem:[#allocation2 + $0x101] sm:$0xff] }
 0x1a5   : > { %9306 = vst [vmem:[#allocation19_spill] sm:$0xff] %v7905_v57  ;;  %4076 = vmatprep.mubr.bf16.mxu1 %v7901_v18  ;;  %6039 = vmatpush3.bf16.msra.mxu1 %v7006_v62 }
 0x1a6   : > { %6040 = vmatprep.subr.bf16.mxu1 %v7007_v45  ;;  %v6965_v45 = vld [vmem:[#allocation7 + $0x4b4] ss:$12 sps:$4 sm:$0xff]  }
 0x1a7   : > { %v5760_v21 = vpop.f32.mrb[36].mxu1  ;;  %3308 = vmatprep.subr.bf16.mxu0 %v6965_v45  ;;  %v6971_v45 = vld [vmem:[#allocation7 + $0x4e4] ss:$12 sps:$4 sm:$0xff]  }
 0x1a8   : > { %v5761_v8 = vpop.f32.mrb[37].mxu1  ;;  %3309 = vmatpush1.bf16.msra.mxu0 %v6963_v38  ;;  %v6974_v38 = vld [vmem:[#allocation7 + $0x4fc] ss:$12 sps:$4 sm:$0xff]  }
 0x1a9   : > { %v7920_v51 = vadd.f32 %v5761_v8, %v5760_v21  ;;  %v5763_v62 = vpop.f32.mrb[38].mxu1  ;;  %6041 = vmatpush3.bf16.msra.mxu1 %v7008_v34  ;;  %v7938_v34 = vpack.c.bf16 %v7725_v59, %v7720_v24  ;;  %v6966_v21 = vld [vmem:[#allocation7 + $0x4c8] ss:$12 sps:$4 sm:$0xff]   ;;  %3310 = vmatprep.subr.bf16.mxu0 %v6968_v42  ;;  %v6969_v24 = vld [vmem:[#allocation7 + $0x4e0] ss:$12 sps:$4 sm:$0xff]  }
 0x1aa   : > { %v5764_v57 = vpop.f32.mrb[39].mxu1  ;;  %v882_v59 = vld [vmem:[#allocation2 + $0x122] sm:$0xff]  ;;  %3164 = vmatmul.mubr.bf16.gmra.mrb[8].mxu0 %v7880_v9  ;;  %v7965_v9 = vld [vmem:[#allocation2 + $0x111] sm:$0xff] }
 0x1ab   : > { %v7922_v35 = vadd.f32 %v5764_v57, %v5763_v62  ;;  %3173 = vmatprep.mubr.bf16.mxu0 %v7884_v19  ;;  %v6975_v19 = vld [vmem:[#allocation7 + $0x510] ss:$12 sps:$4 sm:$0xff]  }
 0x1ac   : > { %4077 = vmatmul.mubr.bf16.gmra.mrb[144].mxu1 %v7913_v32  ;;  %3311 = vmatpush1.bf16.msra.mxu0 %v6966_v21 }
 0x1ad   : > { %9308 = vst [vmem:[#allocation21_spill] sm:$0xff] %v7922_v35  ;;  %4084 = vmatprep.mubr.bf16.mxu1 %v7918_v11  ;;  %v7946_v35 = vld [vmem:[#allocation2 + $0xf1] sm:$0xff]  ;;  %3312 = vmatprep.subr.bf16.mxu0 %v6971_v45 }
 0x1ae   : > { %v7953_v42 = vpack.c.bf16 %v7948_v39, %v7946_v35 }
 0x1af   : > { %v5766_v50 = vpop.f32.mrb[40].mxu1 }
 0x1b0   : > { %v5767_v57 = vpop.f32.mrb[41].mxu1  ;;  %9313 = vst [vmem:[#allocation26_spill] sm:$0xff] %v7953_v42  ;;  %3313 = vmatpush1.bf16.msra.mxu0 %v6969_v24  ;;  %v7067_v24 = vld [vmem:[#allocation2 + $0x121] sm:$0xff] }
 0x1b1   : > { %v7940_v8 = vadd.f32 %v5767_v57, %v5766_v50  ;;  %v5769_v16 = vpop.f32.mrb[42].mxu1  ;;  %3314 = vmatprep.subr.bf16.mxu0 %v6974_v38 }
 0x1b2   : > { %v5770_v62 = vpop.f32.mrb[43].mxu1  ;;  %3174 = vmatmul.mubr.bf16.gmra.mrb[12].mxu0 %v7896_v53 }
 0x1b3   : > { %9311 = vst [vmem:[#allocation24_spill] sm:$0xff] %v7940_v8  ;;  %v7942_v31 = vadd.f32 %v5770_v62, %v5769_v16  ;;  %v7957_v16 = vpack.c.bf16 %v882_v59, %v7727_v29  ;;  %v6977_v8 = vld [vmem:[#allocation7 + $0x514] ss:$12 sps:$4 sm:$0xff]   ;;  %v6980_v29 = vld [vmem:[#allocation7 + $0x52c] ss:$12 sps:$4 sm:$0xff]   ;;  %3183 = vmatprep.mubr.bf16.mxu0 %v7901_v18 }
 0x1b4   : > { %4085 = vmatmul.mubr.bf16.gmra.mrb[148].mxu1 %v7933_v36  ;;  %v7982_v18 = vld [vmem:[#allocation2 + $0x161] sm:$0xff] }
 0x1b5   : > { %9312 = vst [vmem:[#allocation25_spill] sm:$0xff] %v7942_v31  ;;  %4092 = vmatprep.mubr.bf16.mxu1 %v7938_v34  ;;  %v6972_v31 = vld [vmem:[#allocation7 + $0x4f8] ss:$12 sps:$4 sm:$0xff]  }
 0x1b6   : > { %3315 = vmatpush1.bf16.msra.mxu0 %v6972_v31 }
 0x1b7   : > { %v5772_v50 = vpop.f32.mrb[44].mxu1  ;;  %3316 = vmatprep.subr.bf16.mxu0 %v6977_v8  ;;  %v6978_v8 = vld [vmem:[#allocation7 + $0x528] ss:$12 sps:$4 sm:$0xff]  }
 0x1b8   : > { %v5773_v57 = vpop.f32.mrb[45].mxu1 }
 0x1b9   : > { %v7959_v62 = vadd.f32 %v5773_v57, %v5772_v50  ;;  %v5775_v21 = vpop.f32.mrb[46].mxu1  ;;  %v7969_v50 = vpack.c.bf16 %v7067_v24, %v7965_v9  ;;  %v7974_v57 = vpack.c.bf16 %v7741_v10, %v7733_v5  ;;  %v819_v24 = vld [vmem:[#allocation2 + $0x151] sm:$0xff]  ;;  %v6982_v5 = vld [vmem:[#allocation7 + $0x540] ss:$12 sps:$4 sm:$0xff]   ;;  %v6990_v10 = vld [vmem:[#allocation7 + $0x55c] ss:$12 sps:$4 sm:$0xff]  }
 0x1ba   : > { %v5776_v45 = vpop.f32.mrb[47].mxu1  ;;  %3317 = vmatpush1.bf16.msra.mxu0 %v6975_v19  ;;  %v7986_v19 = vpack.c.bf16 %v7982_v18, %v819_v24  ;;  %v7999_v24 = vld [vmem:[#allocation2 + $0x171] sm:$0xff] }
 0x1bb   : > { %v7961_v60 = vadd.f32 %v5776_v45, %v5775_v21  ;;  %9315 = vst [vmem:[#allocation28_spill] sm:$0xff] %v7969_v50  ;;  %3318 = vmatprep.subr.bf16.mxu0 %v6980_v29  ;;  %3184 = vmatmul.mubr.bf16.gmra.mrb[16].mxu0 %v7913_v32 }
 0x1bc   : > { %4093 = vmatmul.mubr.bf16.gmra.mrb[152].mxu1 %v7953_v42  ;;  %3193 = vmatprep.mubr.bf16.mxu0 %v7918_v11  ;;  %v8001_v11 = vld [vmem:[#allocation2 + $0x181] sm:$0xff] }
 0x1bd   : > { %9314 = vst [vmem:[#allocation27_spill] sm:$0xff] %v7961_v60  ;;  %4100 = vmatprep.mubr.bf16.mxu1 %v7957_v16  ;;  %v6984_v60 = vld [vmem:[#allocation7 + $0x544] ss:$12 sps:$4 sm:$0xff]   ;;  %9319 = vst [vmem:[#allocation32_spill] sm:$0xff] %v8001_v11 }
 0x1be   : > { %3319 = vmatpush1.bf16.msra.mxu0 %v6978_v8  ;;  %v6988_v8 = vld [vmem:[#allocation7 + $0x558] ss:$12 sps:$4 sm:$0xff]  }
 0x1bf   : > { %v5778_v59 = vpop.f32.mrb[48].mxu1  ;;  %3320 = vmatprep.subr.bf16.mxu0 %v6984_v60 }
 0x1c0   : > { %v5779_v38 = vpop.f32.mrb[49].mxu1 }
 0x1c1   : > { %v7976_v21 = vadd.f32 %v5779_v38, %v5778_v59  ;;  %v5781_v31 = vpop.f32.mrb[50].mxu1  ;;  %v7991_v38 = vpack.c.bf16 %v7752_v23, %v7743_v12  ;;  %v6995_v12 = vld [vmem:[#allocation7 + $0x570] ss:$12 sps:$4 sm:$0xff]   ;;  %v7004_v23 = vld [vmem:[#allocation7 + $0x58c] ss:$12 sps:$4 sm:$0xff]  }
 0x1c2   : > { %v5782_v45 = vpop.f32.mrb[51].mxu1  ;;  %3321 = vmatpush1.bf16.msra.mxu0 %v6982_v5  ;;  %v8006_v5 = vpack.c.bf16 %v8001_v11, %v7999_v24 }
 0x1c3   : > { %9316 = vst [vmem:[#allocation29_spill] sm:$0xff] %v7976_v21  ;;  %v7978_v53 = vadd.f32 %v5782_v45, %v5781_v31  ;;  %3322 = vmatprep.subr.bf16.mxu0 %v6990_v10  ;;  %3194 = vmatmul.mubr.bf16.gmra.mrb[20].mxu0 %v7933_v36  ;;  %v7011_v36 = vld [vmem:[#allocation7 + $0x5a4] ss:$12 sps:$4 sm:$0xff]  }
 0x1c4   : > { %4101 = vmatmul.mubr.bf16.gmra.mrb[156].mxu1 %v7969_v50  ;;  %9320 = vst [vmem:[#allocation33_spill] sm:$0xff] %v8006_v5  ;;  %3203 = vmatprep.mubr.bf16.mxu0 %v7938_v34  ;;  %v8023_v34 = vld [vmem:[#allocation2 + $0x1a1] sm:$0xff] }
 0x1c5   : > { %9317 = vst [vmem:[#allocation30_spill] sm:$0xff] %v7978_v53  ;;  %4108 = vmatprep.mubr.bf16.mxu1 %v7974_v57  ;;  %v6997_v53 = vld [vmem:[#allocation7 + $0x574] ss:$12 sps:$4 sm:$0xff]   ;;  %9325 = vst [vmem:[#allocation38_spill] sm:$0xff] %v8023_v34 }
 0x1c6   : > { %3323 = vmatpush1.bf16.msra.mxu0 %v6988_v8  ;;  %v8013_v8 = vpack.c.bf16 %v7765_v54, %v7754_v30  ;;  %v7009_v30 = vld [vmem:[#allocation7 + $0x5a0] ss:$12 sps:$4 sm:$0xff]  }
 0x1c7   : > { %v5784_v59 = vpop.f32.mrb[52].mxu1  ;;  %3324 = vmatprep.subr.bf16.mxu0 %v6997_v53  ;;  %v7002_v53 = vld [vmem:[#allocation7 + $0x588] ss:$12 sps:$4 sm:$0xff]  }
 0x1c8   : > { %v5785_v29 = vpop.f32.mrb[53].mxu1  ;;  %v890_v54 = vld [vmem:[#allocation2 + $0x1c2] sm:$0xff] }
 0x1c9   : > { %v7993_v31 = vadd.f32 %v5785_v29, %v5784_v59  ;;  %v5787_v45 = vpop.f32.mrb[54].mxu1  ;;  %v1558_v29 = vlaneseq }
 0x1ca   : > { %v5788_v60 = vpop.f32.mrb[55].mxu1  ;;  %3325 = vmatpush1.bf16.msra.mxu0 %v6995_v12  ;;  %v7014_v12 = vld [vmem:[#allocation7 + $0x5bc] ss:$12 sps:$4 sm:$0xff]  }
 0x1cb   : > { %v7995_v21 = vadd.f32 %v5788_v60, %v5787_v45  ;;  %3326 = vmatprep.subr.bf16.mxu0 %v7004_v23  ;;  %v8018_v11 = vshrl.u32 %v1558_v29, 7  ;;  %3204 = vmatmul.mubr.bf16.gmra.mrb[24].mxu0 %v7953_v42  ;;  %v1556_v42 = vld [vmem:[%s9254_s2] sm:$0x7] }
 0x1cc   : > { %4109 = vmatmul.mubr.bf16.gmra.mrb[160].mxu1 %v7986_v19  ;;  %3213 = vmatprep.mubr.bf16.mxu0 %v7957_v16  ;;  %v8046_v16 = vld [vmem:[#allocation2 + $0x1b1] sm:$0xff] }
 0x1cd   : > { %9318 = vst [vmem:[#allocation31_spill] sm:$0xff] %v7995_v21  ;;  %4116 = vmatprep.mubr.bf16.mxu1 %v7991_v38  ;;  %9323 = vst [vmem:[#allocation36_spill] sm:$0xff] %v8018_v11  ;;  %v1568_v29 = vsub.s32 2, %v8018_v11 }
 0x1ce   : > { %3327 = vmatpush1.bf16.msra.mxu0 %v7002_v53  ;;  %v8035_v53 = vpack.c.bf16 %v890_v54, %v7767_v33  ;;  %v7015_v33 = vld [vmem:[#allocation7 + $0x5d0] ss:$12 sps:$4 sm:$0xff]  }
 0x1cf   : > { %v5790_v59 = vpop.f32.mrb[56].mxu1  ;;  %3328 = vmatprep.subr.bf16.mxu0 %v7011_v36  ;;  %v7012_v36 = vld [vmem:[#allocation7 + $0x5b8] ss:$12 sps:$4 sm:$0xff]  }
 0x1d0   : > { %v5791_v10 = vpop.f32.mrb[57].mxu1 }
 0x1d1   : > { %v8008_v45 = vadd.f32 %v5791_v10, %v5790_v59  ;;  %v5793_v60 = vpop.f32.mrb[58].mxu1  ;;  %v8021_v59 = vld [vmem:[#allocation2 + $0x191] sm:$0xff] }
 0x1d2   : > { %v5794_v32 = vpop.f32.mrb[59].mxu1  ;;  %9324 = vst [vmem:[#allocation37_spill] sm:$0xff] %v8021_v59  ;;  %v8028_v23 = vpack.c.bf16 %v8023_v34, %v8021_v59  ;;  %3329 = vmatpush1.bf16.msra.mxu0 %v7009_v30  ;;  %v7017_v34 = vld [vmem:[#allocation7 + $0x5d4] ss:$12 sps:$4 sm:$0xff]   ;;  %v7020_v30 = vld [vmem:[#allocation7 + $0x5ec] ss:$12 sps:$4 sm:$0xff]  }
 0x1d3   : > { %9321 = vst [vmem:[#allocation34_spill] sm:$0xff] %v8008_v45  ;;  %v8015_v21 = vadd.f32 %v5794_v32, %v5793_v60  ;;  %3330 = vmatprep.subr.bf16.mxu0 %v7014_v12  ;;  %3214 = vmatmul.mubr.bf16.gmra.mrb[28].mxu0 %v7969_v50  ;;  %v7068_v12 = vld [vmem:[#allocation2 + $0x1c1] sm:$0xff] }
 0x1d4   : > { %4117 = vmatmul.mubr.bf16.gmra.mrb[164].mxu1 %v8006_v5  ;;  %9326 = vst [vmem:[#allocation39_spill] sm:$0xff] %v8028_v23  ;;  %3223 = vmatprep.mubr.bf16.mxu0 %v7974_v57  ;;  %v7023_v50 = vld [vmem:[#allocation7 + $0x604] ss:$12 sps:$4 sm:$0xff]  }
 0x1d5   : > { %9322 = vst [vmem:[#allocation35_spill] sm:$0xff] %v8015_v21  ;;  %4124 = vmatprep.mubr.bf16.mxu1 %v8013_v8  ;;  %v8065_v57 = vld [vmem:[#allocation2 + $0x201] sm:$0xff] }
 0x1d6   : > { %3331 = vmatpush1.bf16.msra.mxu0 %v7012_v36  ;;  %v8057_v36 = vpack.c.bf16 %v7787_v49, %v7777_v58 }
 0x1d7   : > { %v5796_v10 = vpop.f32.mrb[60].mxu1  ;;  %3332 = vmatprep.subr.bf16.mxu0 %v7017_v34  ;;  %v7018_v34 = vld [vmem:[#allocation7 + $0x5e8] ss:$12 sps:$4 sm:$0xff]  }
 0x1d8   : > { %v5797_v32 = vpop.f32.mrb[61].mxu1 }
 0x1d9   : > { %v8031_v60 = vadd.f32 %v5797_v32, %v5796_v10  ;;  %v5799_v21 = vpop.f32.mrb[62].mxu1  ;;  %v8043_v10 = vrot.slane %v1556_v42, %v1568_v29 }
 0x1da   : > { %v5800_v45 = vpop.f32.mrb[63].mxu1  ;;  %3333 = vmatpush1.bf16.msra.mxu0 %v7015_v33 }
 0x1db   : > { %9327 = vst [vmem:[#allocation40_spill] sm:$0xff] %v8031_v60  ;;  %v8040_v59 = vadd.f32 %v5800_v45, %v5799_v21  ;;  %v8050_v21 = vpack.c.bf16 %v7068_v12, %v8046_v16  ;;  %v3725_v42 = vadd.f32 %v7772_v41, %v8043_v10  ;;  %3334 = vmatprep.subr.bf16.mxu0 %v7020_v30  ;;  %v827_v41 = vld [vmem:[#allocation2 + $0x1f1] sm:$0xff] }
 0x1dc   : > { %4125 = vmatmul.mubr.bf16.gmra.mrb[168].mxu1 %v8028_v23  ;;  %v3728_v12 = vadd.f32 %v7774_v52, %v8043_v10  ;;  %3224 = vmatmul.mubr.bf16.gmra.mrb[32].mxu0 %v7986_v19  ;;  %v8071_v52 = vpack.c.bf16 %v8065_v57, %v827_v41 }
 0x1dd   : > { %9328 = vst [vmem:[#allocation41_spill] sm:$0xff] %v8040_v59  ;;  %4132 = vmatprep.mubr.bf16.mxu1 %v8035_v53  ;;  %9329 = vst [vmem:[#allocation42_spill] sm:$0xff] %v8050_v21  ;;  %3233 = vmatprep.mubr.bf16.mxu0 %v7991_v38  ;;  %v8091_v38 = vld [vmem:[#allocation2 + $0x211] sm:$0xff] }
 0x1de   : > { %3335 = vmatpush1.bf16.msra.mxu0 %v7018_v34  ;;  %9330 = vst [vmem:[#allocation43_spill] sm:$0xff] %v8071_v52 }
 0x1df   : > { %v5818_v54 = vpop.f32.mrb[64].mxu1  ;;  %3497 = vmatprep.subr.bf16.mxu0 %v7023_v50  ;;  %v8080_v50 = vld [vmem:[#allocation7 + $0x608] ss:$12 sps:$4 sm:$0xff]  }
 0x1e0   : > { %v5819_v32 = vpop.f32.mrb[65].mxu1  ;;  %6205 = vmatprep.subr.bf16.mxu1 %v8080_v50 }
 0x1e1   : > { %v5820_v45 = vadd.f32 %v5819_v32, %v5818_v54  ;;  %v5821_v29 = vpop.f32.mrb[66].mxu1  ;;  %v8078_v32 = vpack.c.bf16 %v7800_v1, %v7789_v48  ;;  %v8093_v48 = vld [vmem:[#allocation2 + $0x221] sm:$0xff] }
 0x1e2   : > { %v5822_v11 = vpop.f32.mrb[67].mxu1 }
 0x1e3   : > { %v5823_v59 = vadd.f32 %v5822_v11, %v5821_v29  ;;  %v8061_v60 = vadd.f32 %v5820_v45, %v3725_v42  ;;  %v3733_v11 = vadd.f32 %v7782_v63, %v8043_v10  ;;  %v3736_v45 = vadd.f32 %v7784_v56, %v8043_v10 }
 0x1e4   : > { %4133 = vmatmul.mubr.bf16.gmra.mrb[172].mxu1 %v8050_v21  ;;  %3234 = vmatmul.mubr.bf16.gmra.mrb[36].mxu0 %v8006_v5  ;;  %v8098_v56 = vpack.c.bf16 %v8093_v48, %v8091_v38 }
 0x1e5   : > { %4140 = vmatprep.mubr.bf16.mxu1 %v8057_v36  ;;  %v8067_v58 = vadd.f32 %v5823_v59, %v3728_v12  ;;  %v3741_v12 = vadd.f32 %v7795_v14, %v8043_v10  ;;  %3243 = vmatprep.mubr.bf16.mxu0 %v8013_v8  ;;  %v8115_v14 = vld [vmem:[#allocation2 + $0x231] sm:$0xff]  ;;  %v8117_v8 = vld [vmem:[#allocation2 + $0x241] sm:$0xff] }
 0x1e6   : > { %9331 = vst [vmem:[#allocation44_spill] sm:$0xff] %v8098_v56 }
 0x1e7   : > { %v5824_v49 = vpop.f32.mrb[68].mxu1 }
 0x1e8   : > { %v5825_v33 = vpop.f32.mrb[69].mxu1 }
 0x1e9   : > { %v5826_v30 = vadd.f32 %v5825_v33, %v5824_v49  ;;  %v5827_v54 = vpop.f32.mrb[70].mxu1  ;;  %v8105_v33 = vpack.c.bf16 %v7819_v26, %v7802_v3 }
 0x1ea   : > { %v5828_v59 = vpop.f32.mrb[71].mxu1 }
 0x1eb   : > { %v8082_v42 = vadd.f32 %v5826_v30, %v3733_v11  ;;  %v5829_v29 = vadd.f32 %v5828_v59, %v5827_v54  ;;  %v3744_v54 = vadd.f32 %v7797_v22, %v8043_v10  ;;  %v3749_v22 = vadd.f32 %v7813_v44, %v8043_v10  ;;  %v8138_v44 = vld [vmem:[#allocation2 + $0x251] sm:$0xff] }
 0x1ec   : > { %4141 = vmatmul.mubr.bf16.gmra.mrb[176].mxu1 %v8071_v52  ;;  %3244 = vmatmul.mubr.bf16.gmra.mrb[40].mxu0 %v8028_v23 }
 0x1ed   : > { %v8088_v63 = vadd.f32 %v5829_v29, %v3736_v45  ;;  %4148 = vmatprep.mubr.bf16.mxu1 %v8078_v32  ;;  %v898_v29 = vld [vmem:[#allocation2 + $0x262] sm:$0xff]  ;;  %3253 = vmatprep.mubr.bf16.mxu0 %v8035_v53 }
 0x1ef   : > { %v5830_v1 = vpop.f32.mrb[72].mxu1 }
 0x1f0   : > { %v5831_v34 = vpop.f32.mrb[73].mxu1 }
 0x1f1   : > { %v5832_v41 = vadd.f32 %v5831_v34, %v5830_v1  ;;  %v5833_v49 = vpop.f32.mrb[74].mxu1  ;;  %v8122_v1 = vpack.c.bf16 %v8117_v8, %v8115_v14 }
 0x1f2   : > { %v5834_v11 = vpop.f32.mrb[75].mxu1 }
 0x1f3   : > { %v8107_v30 = vadd.f32 %v5832_v41, %v3741_v12  ;;  %v5835_v59 = vadd.f32 %v5834_v11, %v5833_v49  ;;  %9332 = vst [vmem:[#allocation45_spill] sm:$0xff] %v8122_v1  ;;  %v8128_v41 = vpack.c.bf16 %v898_v29, %v7821_v43  ;;  %v7069_v43 = vld [vmem:[#allocation2 + $0x261] sm:$0xff] }
 0x1f4   : > { %4149 = vmatmul.mubr.bf16.gmra.mrb[180].mxu1 %v8098_v56  ;;  %3254 = vmatmul.mubr.bf16.gmra.mrb[44].mxu0 %v8050_v21  ;;  %v8142_v29 = vpack.c.bf16 %v7069_v43, %v8138_v44 }
 0x1f5   : > { %v8112_v45 = vadd.f32 %v5835_v59, %v3744_v54  ;;  %4156 = vmatprep.mubr.bf16.mxu1 %v8105_v33  ;;  %v3752_v54 = vadd.f32 %v7815_v61, %v8043_v10  ;;  %v3757_v61 = vadd.f32 %v7832_v13, %v8043_v10  ;;  %3263 = vmatprep.mubr.bf16.mxu0 %v8057_v36  ;;  %v932_v13 = vld [vmem:[#allocation2 + $0x20] sm:$0xff] }
 0x1f6   : > { %9333 = vst [vmem:[#allocation46_spill] sm:$0xff] %v8142_v29 }
 0x1f7   : > { %v5836_v3 = vpop.f32.mrb[76].mxu1 }
 0x1f8   : > { %v5837_v26 = vpop.f32.mrb[77].mxu1 }
 0x1f9   : > { %v5838_v34 = vadd.f32 %v5837_v26, %v5836_v3  ;;  %v5839_v12 = vpop.f32.mrb[78].mxu1 }
 0x1fa   : > { %v5840_v49 = vpop.f32.mrb[79].mxu1 }
 0x1fb   : > { %v8130_v11 = vadd.f32 %v5838_v34, %v3749_v22  ;;  %v5841_v59 = vadd.f32 %v5840_v49, %v5839_v12  ;;  %v8149_v34 = vpack.c.bf16 %v7854_v37, %v7838_v20  ;;  %v3765_v37 = vadd.f32 %v7848_v4, %v8043_v10  ;;  %v934_v4 = vld [vmem:[#allocation2 + $0x40] sm:$0xff] }
 0x1fc   : > { %4157 = vmatmul.mubr.bf16.gmra.mrb[184].mxu1 %v8122_v1  ;;  %3264 = vmatmul.mubr.bf16.gmra.mrb[48].mxu0 %v8071_v52  ;;  %v9349_v52 = vld [vmem:[#allocation41_spill] sm:$0xff] }
 0x1fd   : > { %v8135_v23 = vadd.f32 %v5841_v59, %v3752_v54  ;;  %4164 = vmatprep.mubr.bf16.mxu1 %v8128_v41  ;;  %v3760_v54 = vadd.f32 %v7834_v40, %v8043_v10  ;;  %3273 = vmatprep.mubr.bf16.mxu0 %v8078_v32  ;;  %v935_v32 = vld [vmem:[#allocation2 + $0x50] sm:$0xff]  ;;  %v3848_v21 = vadd.f32 %v9349_v52, %v8043_v10 }
 0x1ff   : > { %v5842_v3 = vpop.f32.mrb[80].mxu1 }
 0x200   : > { %v5843_v53 = vpop.f32.mrb[81].mxu1 }
 0x201   : > { %v5844_v26 = vadd.f32 %v5843_v53, %v5842_v3  ;;  %v5845_v22 = vpop.f32.mrb[82].mxu1  ;;  %v933_v3 = vld [vmem:[#allocation2 + $0x30] sm:$0xff] }
 0x202   : > { %v5846_v12 = vpop.f32.mrb[83].mxu1  ;;  %v8160_v20 = vpack.c.bf16 %v933_v3, %v932_v13 }
 0x203   : > { %v8151_v49 = vadd.f32 %v5844_v26, %v3757_v61  ;;  %v5847_v59 = vadd.f32 %v5846_v12, %v5845_v22  ;;  %v8167_v26 = vpack.c.bf16 %v7873_v2, %v7856_v27  ;;  %v7037_v12 = vld [vmem:[#allocation7 + $0x620] ss:$12 sps:$4 sm:$0xff]   ;;  %v7038_v27 = vld [vmem:[#allocation7 + $0x638] ss:$12 sps:$4 sm:$0xff]  }
 0x204   : > { %4165 = vmatmul.mubr.bf16.gmra.mrb[188].mxu1 %v8142_v29  ;;  %3274 = vmatmul.mubr.bf16.gmra.mrb[52].mxu0 %v8098_v56 }
 0x205   : > { %v8156_v43 = vadd.f32 %v5847_v59, %v3760_v54  ;;  %4205 = vmatprep.mubr.bf16.mxu1 %v8149_v34  ;;  %v3768_v59 = vadd.f32 %v7850_v6, %v8043_v10  ;;  %v3773_v6 = vadd.f32 %v7867_v46, %v8043_v10  ;;  %3283 = vmatprep.mubr.bf16.mxu0 %v8105_v33  ;;  %v936_v33 = vld [vmem:[#allocation2 + $0x60] sm:$0xff] }
 0x207   : > { %v5848_v36 = vpop.f32.mrb[84].mxu1 }
 0x208   : > { %v5849_v53 = vpop.f32.mrb[85].mxu1 }
 0x209   : > { %v5850_v61 = vadd.f32 %v5849_v53, %v5848_v36  ;;  %v5851_v40 = vpop.f32.mrb[86].mxu1  ;;  %v8179_v53 = vpack.c.bf16 %v935_v32, %v934_v4  ;;  %v937_v32 = vld [vmem:[#allocation2 + $0x70] sm:$0xff] }
 0x20a   : > { %v5852_v22 = vpop.f32.mrb[87].mxu1 }
 0x20b   : > { %v8169_v54 = vadd.f32 %v5850_v61, %v3765_v37  ;;  %v5853_v13 = vadd.f32 %v5852_v22, %v5851_v40  ;;  %v8186_v40 = vpack.c.bf16 %v7892_v17, %v7875_v47  ;;  %v7039_v22 = vld [vmem:[#allocation7 + $0x650] ss:$12 sps:$4 sm:$0xff]   ;;  %v1002_v47 = vld [vmem:[#allocation2 + $0x81] sm:$0xff] }
 0x20c   : > { %4206 = vmatmul.mubr.bf16.vlgmr.msra.gmra.mrb[192].mxu1 %v8160_v20  ;;  %v1003_v17 = vld [vmem:[#allocation2 + $0x91] sm:$0xff]  ;;  %3284 = vmatmul.mubr.bf16.gmra.mrb[56].mxu0 %v8122_v1  ;;  %v3784_v1 = vadd.f32 %v7888_v55, %v8043_v10  ;;  %v3789_v55 = vadd.f32 %v7903_v7, %v8043_v10 }
 0x20d   : > { %v8174_v3 = vadd.f32 %v5853_v13, %v3768_v59  ;;  %4213 = vmatprep.mubr.bf16.mxu1 %v8167_v26  ;;  %6206 = vmatpush3.bf16.msra.mxu1 %v8080_v50  ;;  %v3776_v13 = vadd.f32 %v7869_v0, %v8043_v10  ;;  %v3781_v0 = vadd.f32 %v7886_v15, %v8043_v10  ;;  %v938_v15 = vld [vmem:[#allocation2 + $0x80] sm:$0xff] }
 0x20e   : > { %6207 = vmatprep.subr.bf16.mxu1 %v7037_v12  ;;  %3293 = vmatprep.mubr.bf16.mxu0 %v8128_v41  ;;  %v7045_v41 = vld [vmem:[#allocation7 + $0x698] ss:$12 sps:$4 sm:$0xff]  }
 0x20f   : > { %v5854_v2 = vpop.f32.mrb[88].mxu1 }
 0x210   : > { %v5855_v36 = vpop.f32.mrb[89].mxu1 }
 0x211   : > { %v5856_v37 = vadd.f32 %v5855_v36, %v5854_v2  ;;  %v5857_v61 = vpop.f32.mrb[90].mxu1  ;;  %6208 = vmatpush3.bf16.msra.mxu1 %v7037_v12  ;;  %v7043_v12 = vld [vmem:[#allocation7 + $0x668] ss:$12 sps:$4 sm:$0xff]  }
 0x212   : > { %v5858_v50 = vpop.f32.mrb[91].mxu1  ;;  %6209 = vmatprep.subr.bf16.mxu1 %v7038_v27 }
 0x213   : > { %v8188_v59 = vadd.f32 %v5856_v37, %v3773_v6  ;;  %v5859_v4 = vadd.f32 %v5858_v50, %v5857_v61  ;;  %v8197_v6 = vpack.c.bf16 %v937_v32, %v936_v33  ;;  %v8202_v50 = vpack.c.bf16 %v1003_v17, %v1002_v47  ;;  %v8213_v17 = vld [vmem:[#allocation2] sm:$0xff] }
 0x214   : > { %4214 = vmatmul.mubr.bf16.gmra.mrb[196].mxu1 %v8179_v53  ;;  %3294 = vmatmul.mubr.bf16.gmra.mrb[60].mxu0 %v8142_v29  ;;  %v7029_v29 = vld [vmem:[#allocation7 + $0x634] ss:$12 sps:$4 sm:$0xff]  }
 0x215   : > { %v8193_v46 = vadd.f32 %v5859_v4, %v3776_v13  ;;  %4221 = vmatprep.mubr.bf16.mxu1 %v8186_v40  ;;  %6210 = vmatpush3.bf16.msra.mxu1 %v7038_v27  ;;  %v7044_v13 = vld [vmem:[#allocation7 + $0x680] ss:$12 sps:$4 sm:$0xff]  }
 0x216   : > { %6211 = vmatprep.subr.bf16.mxu1 %v7039_v22  ;;  %3336 = vmatprep.mubr.bf16.mxu0 %v8149_v34  ;;  %v7021_v34 = vld [vmem:[#allocation7 + $0x600] ss:$12 sps:$4 sm:$0xff]  }
 0x217   : > { %v5860_v2 = vpop.f32.mrb[92].mxu1 }
 0x218   : > { %v5861_v36 = vpop.f32.mrb[93].mxu1 }
 0x219   : > { %v5862_v37 = vadd.f32 %v5861_v36, %v5860_v2  ;;  %v5863_v61 = vpop.f32.mrb[94].mxu1  ;;  %6212 = vmatpush3.bf16.msra.mxu1 %v7039_v22  ;;  %v8216_v2 = vpack.c.bf16 %v8213_v17, %v938_v15 }
 0x21a   : > { %v5864_v27 = vpop.f32.mrb[95].mxu1  ;;  %6213 = vmatprep.subr.bf16.mxu1 %v7043_v12 }
 0x21b   : > { %v8204_v4 = vadd.f32 %v5862_v37, %v3781_v0  ;;  %v5865_v33 = vadd.f32 %v5864_v27, %v5863_v61  ;;  %v7046_v37 = vld [vmem:[#allocation7 + $0x6b0] ss:$12 sps:$4 sm:$0xff]   ;;  %v9334_v27 = vld [vmem:[#allocation19_spill] sm:$0xff] }
 0x21c   : > { %4222 = vmatmul.mubr.bf16.gmra.mrb[200].mxu1 %v8197_v6  ;;  %3337 = vmatmul.mubr.bf16.vlgmr.msra.gmra.mrb[0].mxu0 %v8160_v20 }
 0x21d   : > { %v8209_v32 = vadd.f32 %v5865_v33, %v3784_v1  ;;  %4229 = vmatprep.mubr.bf16.mxu1 %v8202_v50  ;;  %6214 = vmatpush3.bf16.msra.mxu1 %v7043_v12  ;;  %v8223_v12 = vpack.c.bf16 %v7926_v28, %v7909_v25  ;;  %v3792_v33 = vadd.f32 %v9334_v27, %v8043_v10  ;;  %v941_v25 = vld [vmem:[#allocation2 + $0xd0] sm:$0xff]  ;;  %v7026_v28 = vld [vmem:[#allocation7 + $0x61c] ss:$12 sps:$4 sm:$0xff]  }
 0x21e   : > { %6215 = vmatprep.subr.bf16.mxu1 %v7044_v13  ;;  %3498 = vmatpush1.bf16.msra.mxu0 %v7021_v34  ;;  %v9335_v27 = vld [vmem:[#allocation22_spill] sm:$0xff] }
 0x21f   : > { %v5866_v22 = vpop.f32.mrb[96].mxu1  ;;  %3346 = vmatprep.mubr.bf16.mxu0 %v8167_v26  ;;  %3499 = vmatprep.subr.bf16.mxu0 %v7026_v28  ;;  %v942_v26 = vld [vmem:[#allocation2 + $0xe0] sm:$0xff]  ;;  %v7032_v28 = vld [vmem:[#allocation7 + $0x64c] ss:$12 sps:$4 sm:$0xff]  }
 0x220   : > { %v5867_v47 = vpop.f32.mrb[97].mxu1 }
 0x221   : > { %v5868_v1 = vadd.f32 %v5867_v47, %v5866_v22  ;;  %v5869_v36 = vpop.f32.mrb[98].mxu1  ;;  %6216 = vmatpush3.bf16.msra.mxu1 %v7044_v13  ;;  %v940_v22 = vld [vmem:[#allocation2 + $0xc0] sm:$0xff] }
 0x222   : > { %v5870_v0 = vpop.f32.mrb[99].mxu1  ;;  %6217 = vmatprep.subr.bf16.mxu1 %v7045_v41 }
 0x223   : > { %v8225_v61 = vadd.f32 %v5868_v1, %v3789_v55  ;;  %v5871_v15 = vadd.f32 %v5870_v0, %v5869_v36  ;;  %v8234_v55 = vpack.c.bf16 %v941_v25, %v940_v22  ;;  %v3797_v1 = vadd.f32 %v7920_v51, %v8043_v10  ;;  %v9336_v22 = vld [vmem:[#allocation21_spill] sm:$0xff] }
 0x224   : > { %4230 = vmatmul.mubr.bf16.gmra.mrb[204].mxu1 %v8216_v2  ;;  %v3800_v25 = vadd.f32 %v9336_v22, %v8043_v10  ;;  %3347 = vmatmul.mubr.bf16.gmra.mrb[4].mxu0 %v8179_v53  ;;  %v8259_v22 = vpack.c.bf16 %v7965_v9, %v7948_v39  ;;  %v9338_v53 = vld [vmem:[#allocation25_spill] sm:$0xff]  ;;  %v7034_v39 = vld [vmem:[#allocation7 + $0x660] ss:$12 sps:$4 sm:$0xff]  }
 0x225   : > { %v8230_v7 = vadd.f32 %v5871_v15, %v3792_v33  ;;  %4237 = vmatprep.mubr.bf16.mxu1 %v8223_v12  ;;  %6218 = vmatpush3.bf16.msra.mxu1 %v7045_v41  ;;  %v8241_v33 = vpack.c.bf16 %v7946_v35, %v9335_v27  ;;  %v7024_v41 = vld [vmem:[#allocation7 + $0x618] ss:$12 sps:$4 sm:$0xff]   ;;  %v943_v35 = vld [vmem:[#allocation2 + $0xf0] sm:$0xff] }
 0x226   : > { %6219 = vmatprep.subr.bf16.mxu1 %v7046_v37  ;;  %3500 = vmatpush1.bf16.msra.mxu0 %v7024_v41  ;;  %v945_v9 = vld [vmem:[#allocation2 + $0x110] sm:$0xff] }
 0x227   : > { %v5872_v13 = vpop.f32.mrb[100].mxu1  ;;  %3501 = vmatprep.subr.bf16.mxu0 %v7029_v29  ;;  %3356 = vmatprep.mubr.bf16.mxu0 %v8186_v40  ;;  %v7030_v29 = vld [vmem:[#allocation7 + $0x648] ss:$12 sps:$4 sm:$0xff]   ;;  %v944_v40 = vld [vmem:[#allocation2 + $0x100] sm:$0xff] }
 0x228   : > { %v5873_v47 = vpop.f32.mrb[101].mxu1 }
 0x229   : > { %v5874_v36 = vadd.f32 %v5873_v47, %v5872_v13  ;;  %v5875_v0 = vpop.f32.mrb[102].mxu1  ;;  %6220 = vmatpush3.bf16.msra.mxu1 %v7046_v37  ;;  %v7027_v13 = vld [vmem:[#allocation7 + $0x630] ss:$12 sps:$4 sm:$0xff]  }
 0x22a   : > { %v5876_v15 = vpop.f32.mrb[103].mxu1  ;;  %3502 = vmatpush1.bf16.msra.mxu0 %v7027_v13  ;;  %v1010_v13 = vld [vmem:[#allocation2 + $0x121] sm:$0xff] }
 0x22b   : > { %v8243_v20 = vadd.f32 %v5874_v36, %v3797_v1  ;;  %v5877_v51 = vadd.f32 %v5876_v15, %v5875_v0  ;;  %v8252_v1 = vpack.c.bf16 %v943_v35, %v942_v26  ;;  %v9337_v36 = vld [vmem:[#allocation24_spill] sm:$0xff]  ;;  %3503 = vmatprep.subr.bf16.mxu0 %v7032_v28  ;;  %v3808_v26 = vadd.f32 %v9338_v53, %v8043_v10 }
 0x22c   : > { %4238 = vmatmul.mubr.bf16.gmra.mrb[208].mxu1 %v8234_v55  ;;  %v3805_v0 = vadd.f32 %v9337_v36, %v8043_v10  ;;  %v7042_v28 = vld [vmem:[#allocation7 + $0x67c] ss:$12 sps:$4 sm:$0xff]   ;;  %3357 = vmatmul.mubr.bf16.gmra.mrb[8].mxu0 %v8197_v6  ;;  %v9339_v6 = vld [vmem:[#allocation27_spill] sm:$0xff] }
 0x22d   : > { %v8248_v34 = vadd.f32 %v5877_v51, %v3800_v25  ;;  %4245 = vmatprep.mubr.bf16.mxu1 %v8241_v33  ;;  %v7036_v25 = vld [vmem:[#allocation7 + $0x664] ss:$12 sps:$4 sm:$0xff]   ;;  %3366 = vmatprep.mubr.bf16.mxu0 %v8202_v50 }
 0x22e   : > { %3504 = vmatpush1.bf16.msra.mxu0 %v7030_v29  ;;  %v7040_v29 = vld [vmem:[#allocation7 + $0x678] ss:$12 sps:$4 sm:$0xff]  }
 0x22f   : > { %v5878_v47 = vpop.f32.mrb[104].mxu1  ;;  %3505 = vmatprep.subr.bf16.mxu0 %v7036_v25  ;;  %v7049_v25 = vld [vmem:[#allocation7 + $0x694] ss:$12 sps:$4 sm:$0xff]  }
 0x230   : > { %v5879_v37 = vpop.f32.mrb[105].mxu1  ;;  %v946_v50 = vld [vmem:[#allocation2 + $0x120] sm:$0xff] }
 0x231   : > { %v5880_v27 = vadd.f32 %v5879_v37, %v5878_v47  ;;  %v5881_v15 = vpop.f32.mrb[106].mxu1  ;;  %v1011_v37 = vld [vmem:[#allocation2 + $0x131] sm:$0xff] }
 0x232   : > { %v5882_v41 = vpop.f32.mrb[107].mxu1  ;;  %3506 = vmatpush1.bf16.msra.mxu0 %v7034_v39  ;;  %v7052_v39 = vld [vmem:[#allocation7 + $0x6ac] ss:$12 sps:$4 sm:$0xff]  }
 0x233   : > { %v8261_v51 = vadd.f32 %v5880_v27, %v3805_v0  ;;  %v5883_v35 = vadd.f32 %v5882_v41, %v5881_v15  ;;  %v8270_v27 = vpack.c.bf16 %v945_v9, %v944_v40  ;;  %v3813_v15 = vadd.f32 %v7959_v62, %v8043_v10  ;;  %3507 = vmatprep.subr.bf16.mxu0 %v7042_v28 }
 0x234   : > { %4246 = vmatmul.mubr.bf16.gmra.mrb[212].mxu1 %v8252_v1  ;;  %v3816_v40 = vadd.f32 %v9339_v6, %v8043_v10  ;;  %3367 = vmatmul.mubr.bf16.gmra.mrb[12].mxu0 %v8216_v2  ;;  %v9341_v2 = vld [vmem:[#allocation30_spill] sm:$0xff] }
 0x235   : > { %v8266_v47 = vadd.f32 %v5883_v35, %v3808_v26  ;;  %4253 = vmatprep.mubr.bf16.mxu1 %v8259_v22  ;;  %v8275_v26 = vpack.c.bf16 %v1011_v37, %v1010_v13  ;;  %v7047_v13 = vld [vmem:[#allocation7 + $0x690] ss:$12 sps:$4 sm:$0xff]   ;;  %3376 = vmatprep.mubr.bf16.mxu0 %v8223_v12  ;;  %v948_v12 = vld [vmem:[#allocation2 + $0x160] sm:$0xff] }
 0x236   : > { %3508 = vmatpush1.bf16.msra.mxu0 %v7040_v29  ;;  %v8294_v29 = vpack.c.bf16 %v7999_v24, %v7982_v18 }
 0x237   : > { %v5884_v36 = vpop.f32.mrb[108].mxu1  ;;  %3509 = vmatprep.subr.bf16.mxu0 %v7049_v25 }
 0x238   : > { %v5885_v0 = vpop.f32.mrb[109].mxu1 }
 0x239   : > { %v5886_v41 = vadd.f32 %v5885_v0, %v5884_v36  ;;  %v5887_v53 = vpop.f32.mrb[110].mxu1  ;;  %v8287_v36 = vpack.c.bf16 %v8213_v17, %v946_v50  ;;  %v9340_v0 = vld [vmem:[#allocation29_spill] sm:$0xff] }
 0x23a   : > { %v5888_v35 = vpop.f32.mrb[111].mxu1  ;;  %3510 = vmatpush1.bf16.msra.mxu0 %v7047_v13 }
 0x23b   : > { %v8277_v56 = vadd.f32 %v5886_v41, %v3813_v15  ;;  %v5889_v9 = vadd.f32 %v5888_v35, %v5887_v53  ;;  %v3821_v15 = vadd.f32 %v9340_v0, %v8043_v10  ;;  %v7050_v35 = vld [vmem:[#allocation7 + $0x6a8] ss:$12 sps:$4 sm:$0xff]   ;;  %3511 = vmatprep.subr.bf16.mxu0 %v7052_v39  ;;  %v3829_v39 = vadd.f32 %v7993_v31, %v8043_v10  ;;  %v950_v31 = vld [vmem:[#allocation2 + $0x180] sm:$0xff] }
 0x23c   : > { %4254 = vmatmul.mubr.bf16.gmra.mrb[216].mxu1 %v8270_v27  ;;  %3377 = vmatmul.mubr.bf16.gmra.mrb[16].mxu0 %v8234_v55 }
 0x23d   : > { %v8282_v62 = vadd.f32 %v5889_v9, %v3816_v40  ;;  %4261 = vmatprep.mubr.bf16.mxu1 %v8275_v26  ;;  %v3824_v40 = vadd.f32 %v9341_v2, %v8043_v10  ;;  %3386 = vmatprep.mubr.bf16.mxu0 %v8241_v33 }
 0x23e   : > { %3512 = vmatpush1.bf16.msra.mxu0 %v7050_v35  ;;  %v9344_v35 = vld [vmem:[#allocation31_spill] sm:$0xff] }
 0x23f   : > { %v5890_v37 = vpop.f32.mrb[112].mxu1 }
 0x240   : > { %v5891_v28 = vpop.f32.mrb[113].mxu1 }
 0x241   : > { %v5892_v41 = vadd.f32 %v5891_v28, %v5890_v37  ;;  %v5893_v53 = vpop.f32.mrb[114].mxu1  ;;  %v949_v37 = vld [vmem:[#allocation2 + $0x170] sm:$0xff] }
 0x242   : > { %v5894_v25 = vpop.f32.mrb[115].mxu1  ;;  %v8305_v13 = vpack.c.bf16 %v949_v37, %v948_v12  ;;  %v951_v12 = vld [vmem:[#allocation2 + $0x190] sm:$0xff] }
 0x243   : > { %v8296_v6 = vadd.f32 %v5892_v41, %v3821_v15  ;;  %v5895_v9 = vadd.f32 %v5894_v25, %v5893_v53  ;;  %v9342_v15 = vld [vmem:[#allocation32_spill] sm:$0xff]  ;;  %v9343_v41 = vld [vmem:[#allocation37_spill] sm:$0xff] }
 0x244   : > { %4262 = vmatmul.mubr.bf16.gmra.mrb[220].mxu1 %v8287_v36  ;;  %v8312_v53 = vpack.c.bf16 %v9343_v41, %v9342_v15  ;;  %3387 = vmatmul.mubr.bf16.gmra.mrb[20].mxu0 %v8252_v1 }
 0x245   : > { %v8301_v50 = vadd.f32 %v5895_v9, %v3824_v40  ;;  %4269 = vmatprep.mubr.bf16.mxu1 %v8294_v29  ;;  %v3832_v40 = vadd.f32 %v9344_v35, %v8043_v10  ;;  %3396 = vmatprep.mubr.bf16.mxu0 %v8259_v22  ;;  %v1018_v22 = vld [vmem:[#allocation2 + $0x1c1] sm:$0xff] }
 0x247   : > { %v5896_v18 = vpop.f32.mrb[116].mxu1 }
 0x248   : > { %v5897_v24 = vpop.f32.mrb[117].mxu1 }
 0x249   : > { %v5898_v28 = vadd.f32 %v5897_v24, %v5896_v18  ;;  %v5899_v0 = vpop.f32.mrb[118].mxu1  ;;  %v8323_v18 = vpack.c.bf16 %v951_v12, %v950_v31  ;;  %v9345_v24 = vld [vmem:[#allocation34_spill] sm:$0xff]  ;;  %v952_v12 = vld [vmem:[#allocation2 + $0x1a0] sm:$0xff] }
 0x24a   : > { %v5900_v25 = vpop.f32.mrb[119].mxu1 }
 0x24b   : > { %v8314_v2 = vadd.f32 %v5898_v28, %v3829_v39  ;;  %v5901_v55 = vadd.f32 %v5900_v25, %v5899_v0  ;;  %v3837_v39 = vadd.f32 %v9345_v24, %v8043_v10  ;;  %v9346_v0 = vld [vmem:[#allocation38_spill] sm:$0xff] }
 0x24c   : > { %4270 = vmatmul.mubr.bf16.gmra.mrb[224].mxu1 %v8305_v13  ;;  %v8330_v41 = vpack.c.bf16 %v8046_v16, %v9346_v0  ;;  %3397 = vmatmul.mubr.bf16.gmra.mrb[24].mxu0 %v8270_v27 }
 0x24d   : > { %v8319_v9 = vadd.f32 %v5901_v55, %v3832_v40  ;;  %4277 = vmatprep.mubr.bf16.mxu1 %v8312_v53  ;;  %v9347_v40 = vld [vmem:[#allocation35_spill] sm:$0xff]  ;;  %3406 = vmatprep.mubr.bf16.mxu0 %v8275_v26 }
 0x24e   : > { %v3840_v55 = vadd.f32 %v9347_v40, %v8043_v10 }
 0x24f   : > { %v5902_v33 = vpop.f32.mrb[120].mxu1 }
 0x250   : > { %v5903_v37 = vpop.f32.mrb[121].mxu1 }
 0x251   : > { %v5904_v28 = vadd.f32 %v5903_v37, %v5902_v33  ;;  %v5905_v15 = vpop.f32.mrb[122].mxu1  ;;  %v953_v33 = vld [vmem:[#allocation2 + $0x1b0] sm:$0xff] }
 0x252   : > { %v5906_v25 = vpop.f32.mrb[123].mxu1  ;;  %v1019_v37 = vld [vmem:[#allocation2 + $0x1d1] sm:$0xff] }
 0x253   : > { %v8332_v35 = vadd.f32 %v5904_v28, %v3837_v39  ;;  %v5907_v1 = vadd.f32 %v5906_v25, %v5905_v15  ;;  %v8341_v39 = vpack.c.bf16 %v953_v33, %v952_v12  ;;  %v9348_v28 = vld [vmem:[#allocation40_spill] sm:$0xff]  ;;  %v8346_v40 = vpack.c.bf16 %v1019_v37, %v1018_v22  ;;  %v954_v12 = vld [vmem:[#allocation2 + $0x1c0] sm:$0xff] }
 0x254   : > { %4278 = vmatmul.mubr.bf16.gmra.mrb[228].mxu1 %v8323_v18  ;;  %v3845_v0 = vadd.f32 %v9348_v28, %v8043_v10  ;;  %3407 = vmatmul.mubr.bf16.gmra.mrb[28].mxu0 %v8287_v36  ;;  %v8358_v26 = vpack.c.bf16 %v8213_v17, %v954_v12  ;;  %v8363_v10 = vpack.c.bf16 %v8091_v38, %v8065_v57  ;;  %v957_v28 = vld [vmem:[#allocation2 + $0x210] sm:$0xff] }
 0x255   : > { %v8337_v31 = vadd.f32 %v5907_v1, %v3840_v55  ;;  %4285 = vmatprep.mubr.bf16.mxu1 %v8330_v41  ;;  %3416 = vmatprep.mubr.bf16.mxu0 %v8294_v29 }
 0x257   : > { %v5908_v24 = vpop.f32.mrb[124].mxu1 }
 0x258   : > { %v5909_v16 = vpop.f32.mrb[125].mxu1 }
 0x259   : > { %v5910_v15 = vadd.f32 %v5909_v16, %v5908_v24  ;;  %v5911_v25 = vpop.f32.mrb[126].mxu1  ;;  %v956_v16 = vld [vmem:[#allocation2 + $0x200] sm:$0xff] }
 0x25a   : > { %v5912_v55 = vpop.f32.mrb[127].mxu1  ;;  %v8374_v57 = vpack.c.bf16 %v957_v28, %v956_v16  ;;  %v961_v16 = vld [vmem:[#allocation2 + $0x250] sm:$0xff]  ;;  %v1026_v28 = vld [vmem:[#allocation2 + $0x261] sm:$0xff] }
 0x25b   : > { %v8348_v1 = vadd.f32 %v5910_v15, %v3845_v0  ;;  %v5913_v5 = vadd.f32 %v5912_v55, %v5911_v25 }
 0x25c   : > { %4286 = vmatmul.mubr.bf16.gmra.mrb[232].mxu1 %v8341_v39  ;;  %3417 = vmatmul.mubr.bf16.gmra.mrb[32].mxu0 %v8305_v13  ;;  %v958_v13 = vld [vmem:[#allocation2 + $0x220] sm:$0xff] }
 0x25d   : > { %v8353_v27 = vadd.f32 %v5913_v5, %v3848_v21  ;;  %4293 = vmatprep.mubr.bf16.mxu1 %v8346_v40  ;;  %3426 = vmatprep.mubr.bf16.mxu0 %v8312_v53 }
 0x25f   : > { %v5930_v33 = vpop.f32.mrb[128].mxu1 }
 0x260   : > { %v5931_v24 = vpop.f32.mrb[129].mxu1 }
 0x261   : > { %v5932_v22 = vadd.f32 %v5931_v24, %v5930_v33  ;;  %v5933_v37 = vpop.f32.mrb[130].mxu1  ;;  %v959_v33 = vld [vmem:[#allocation2 + $0x230] sm:$0xff] }
 0x262   : > { %v5934_v5 = vpop.f32.mrb[131].mxu1 }
 0x263   : > { %v8366_v21 = vadd.f32 %v5932_v22, %v8061_v60  ;;  %v5935_v52 = vadd.f32 %v5934_v5, %v5933_v37  ;;  %v8379_v60 = vpack.c.bf16 %v8115_v14, %v8093_v48  ;;  %v8390_v48 = vpack.c.bf16 %v959_v33, %v958_v13  ;;  %v1060_v13 = vld [vmem:[#allocation2 + $0x22] sm:$0xff]  ;;  %v1061_v33 = vld [vmem:[#allocation2 + $0x32] sm:$0xff] }
 0x264   : > { %4294 = vmatmul.mubr.bf16.gmra.mrb[236].mxu1 %v8358_v26  ;;  %3427 = vmatmul.mubr.bf16.gmra.mrb[36].mxu0 %v8323_v18  ;;  %v960_v18 = vld [vmem:[#allocation2 + $0x240] sm:$0xff] }
 0x265   : > { %v8370_v36 = vadd.f32 %v5935_v52, %v8067_v58  ;;  %4301 = vmatprep.mubr.bf16.mxu1 %v8363_v10  ;;  %3436 = vmatprep.mubr.bf16.mxu0 %v8330_v41  ;;  %v1027_v41 = vld [vmem:[#allocation2 + $0x271] sm:$0xff] }
 0x267   : > { %v5936_v0 = vpop.f32.mrb[132].mxu1 }
 0x268   : > { %v5937_v29 = vpop.f32.mrb[133].mxu1 }
 0x269   : > { %v5938_v38 = vadd.f32 %v5937_v29, %v5936_v0  ;;  %v5939_v15 = vpop.f32.mrb[134].mxu1 }
 0x26a   : > { %v5940_v58 = vpop.f32.mrb[135].mxu1 }
 0x26b   : > { %v8382_v25 = vadd.f32 %v5938_v38, %v8082_v42  ;;  %v5941_v55 = vadd.f32 %v5940_v58, %v5939_v15  ;;  %v8395_v42 = vpack.c.bf16 %v8138_v44, %v8117_v8  ;;  %v8406_v8 = vpack.c.bf16 %v961_v16, %v960_v18  ;;  %v1064_v16 = vld [vmem:[#allocation2 + $0x62] sm:$0xff] }
 0x26c   : > { %4302 = vmatmul.mubr.bf16.gmra.mrb[240].mxu1 %v8374_v57  ;;  %3437 = vmatmul.mubr.bf16.gmra.mrb[40].mxu0 %v8341_v39  ;;  %v8409_v38 = vpack.c.bf16 %v1027_v41, %v1026_v28  ;;  %v962_v39 = vld [vmem:[#allocation2 + $0x260] sm:$0xff]  ;;  %v1065_v28 = vld [vmem:[#allocation2 + $0x72] sm:$0xff] }
 0x26d   : > { %v8386_v12 = vadd.f32 %v5941_v55, %v8088_v63  ;;  %4309 = vmatprep.mubr.bf16.mxu1 %v8379_v60  ;;  %3446 = vmatprep.mubr.bf16.mxu0 %v8346_v40  ;;  %v8421_v40 = vpack.c.bf16 %v8213_v17, %v962_v39  ;;  %v1062_v17 = vld [vmem:[#allocation2 + $0x42] sm:$0xff]  ;;  %v1067_v39 = vld [vmem:[#allocation2 + $0x92] sm:$0xff] }
 0x26f   : > { %v5942_v24 = vpop.f32.mrb[136].mxu1 }
 0x270   : > { %v5943_v53 = vpop.f32.mrb[137].mxu1 }
 0x271   : > { %v5944_v14 = vadd.f32 %v5943_v53, %v5942_v24  ;;  %v5945_v22 = vpop.f32.mrb[138].mxu1 }
 0x272   : > { %v5946_v63 = vpop.f32.mrb[139].mxu1 }
 0x273   : > { %v8398_v37 = vadd.f32 %v5944_v14, %v8107_v30  ;;  %v5947_v5 = vadd.f32 %v5946_v63, %v5945_v22  ;;  %v8424_v22 = vpack.c.bf16 %v1061_v33, %v1060_v13  ;;  %v1068_v13 = vld [vmem:[#allocation2 + $0xc2] sm:$0xff]  ;;  %v1069_v33 = vld [vmem:[#allocation2 + $0xd2] sm:$0xff] }
 0x274   : > { %4310 = vmatmul.mubr.bf16.gmra.mrb[244].mxu1 %v8390_v48  ;;  %3447 = vmatmul.mubr.bf16.gmra.mrb[44].mxu0 %v8358_v26  ;;  %v1063_v26 = vld [vmem:[#allocation2 + $0x52] sm:$0xff] }
 0x275   : > { %v8402_v52 = vadd.f32 %v5947_v5, %v8112_v45  ;;  %4317 = vmatprep.mubr.bf16.mxu1 %v8395_v42  ;;  %3456 = vmatprep.mubr.bf16.mxu0 %v8363_v10 }
 0x277   : > { %v5948_v0 = vpop.f32.mrb[140].mxu1 }
 0x278   : > { %v5949_v29 = vpop.f32.mrb[141].mxu1 }
 0x279   : > { %v5950_v30 = vadd.f32 %v5949_v29, %v5948_v0  ;;  %v5951_v44 = vpop.f32.mrb[142].mxu1  ;;  %v8435_v0 = vpack.c.bf16 %v1063_v26, %v1062_v17  ;;  %v1071_v26 = vld [vmem:[#allocation2 + $0xf2] sm:$0xff] }
 0x27a   : > { %v5952_v45 = vpop.f32.mrb[143].mxu1 }
 0x27b   : > { %v8412_v15 = vadd.f32 %v5950_v30, %v8130_v11  ;;  %v5953_v58 = vadd.f32 %v5952_v45, %v5951_v44  ;;  %v8438_v30 = vpack.c.bf16 %v1065_v28, %v1064_v16  ;;  %v1072_v16 = vld [vmem:[#allocation2 + $0x102] sm:$0xff]  ;;  %v1073_v28 = vld [vmem:[#allocation2 + $0x112] sm:$0xff] }
 0x27c   : > { %4318 = vmatmul.mubr.bf16.gmra.mrb[248].mxu1 %v8406_v8  ;;  %3457 = vmatmul.mubr.bf16.gmra.mrb[48].mxu0 %v8374_v57  ;;  %v1066_v57 = vld [vmem:[#allocation2 + $0x82] sm:$0xff] }
 0x27d   : > { %v8416_v55 = vadd.f32 %v5953_v58, %v8135_v23  ;;  %4325 = vmatprep.mubr.bf16.mxu1 %v8409_v38  ;;  %3466 = vmatprep.mubr.bf16.mxu0 %v8379_v60 }
 0x27f   : > { %v5954_v24 = vpop.f32.mrb[144].mxu1 }
 0x280   : > { %v5955_v53 = vpop.f32.mrb[145].mxu1 }
 0x281   : > { %v5956_v11 = vadd.f32 %v5955_v53, %v5954_v24  ;;  %v5957_v14 = vpop.f32.mrb[146].mxu1  ;;  %v8449_v53 = vpack.c.bf16 %v1067_v39, %v1066_v57  ;;  %v1075_v39 = vld [vmem:[#allocation2 + $0x132] sm:$0xff] }
 0x282   : > { %v5958_v23 = vpop.f32.mrb[147].mxu1 }
 0x283   : > { %v8427_v63 = vadd.f32 %v5956_v11, %v8151_v49  ;;  %v5959_v5 = vadd.f32 %v5958_v23, %v5957_v14  ;;  %v8452_v14 = vpack.c.bf16 %v1069_v33, %v1068_v13  ;;  %v1076_v13 = vld [vmem:[#allocation2 + $0x162] sm:$0xff]  ;;  %v1077_v33 = vld [vmem:[#allocation2 + $0x172] sm:$0xff] }
 0x284   : > { %4326 = vmatmul.mubr.bf16.gmra.mrb[252].mxu1 %v8421_v40  ;;  %3467 = vmatmul.mubr.bf16.gmra.mrb[52].mxu0 %v8390_v48  ;;  %v1070_v48 = vld [vmem:[#allocation2 + $0xe2] sm:$0xff] }
 0x285   : > { %v8431_v18 = vadd.f32 %v5959_v5, %v8156_v43  ;;  %6221 = vmatprep.mubr.bf16.mxu1 %v8424_v22  ;;  %3476 = vmatprep.mubr.bf16.mxu0 %v8395_v42 }
 0x287   : > { %v5960_v41 = vpop.f32.mrb[148].mxu1 }
 0x288   : > { %v5961_v10 = vpop.f32.mrb[149].mxu1 }
 0x289   : > { %v5962_v49 = vadd.f32 %v5961_v10, %v5960_v41  ;;  %v5963_v29 = vpop.f32.mrb[150].mxu1  ;;  %v8463_v10 = vpack.c.bf16 %v1071_v26, %v1070_v48 }
 0x28a   : > { %v5964_v43 = vpop.f32.mrb[151].mxu1 }
 0x28b   : > { %v8441_v44 = vadd.f32 %v5962_v49, %v8169_v54  ;;  %v5965_v45 = vadd.f32 %v5964_v43, %v5963_v29  ;;  %v8466_v29 = vpack.c.bf16 %v1073_v28, %v1072_v16  ;;  %v1079_v16 = vld [vmem:[#allocation2 + $0x192] sm:$0xff]  ;;  %v1080_v28 = vld [vmem:[#allocation2 + $0x1a2] sm:$0xff] }
 0x28c   : > { %6222 = vmatmul.mubr.bf16.vlgmr.msra.gmra.mrb[0].mxu1 %v8435_v0  ;;  %3477 = vmatmul.mubr.bf16.gmra.mrb[56].mxu0 %v8406_v8  ;;  %v1074_v8 = vld [vmem:[#allocation2 + $0x122] sm:$0xff] }
 0x28d   : > { %v8445_v58 = vadd.f32 %v5965_v45, %v8174_v3  ;;  %6225 = vmatprep.mubr.bf16.mxu1 %v8438_v30  ;;  %3486 = vmatprep.mubr.bf16.mxu0 %v8409_v38 }
 0x28f   : > { %v5966_v24 = vpop.f32.mrb[152].mxu1 }
 0x290   : > { %v5967_v60 = vpop.f32.mrb[153].mxu1 }
 0x291   : > { %v5968_v54 = vadd.f32 %v5967_v60, %v5966_v24  ;;  %v5969_v11 = vpop.f32.mrb[154].mxu1  ;;  %v8477_v60 = vpack.c.bf16 %v1075_v39, %v1074_v8 }
 0x292   : > { %v5970_v3 = vpop.f32.mrb[155].mxu1 }
 0x293   : > { %v8455_v23 = vadd.f32 %v5968_v54, %v8188_v59  ;;  %v5971_v5 = vadd.f32 %v5970_v3, %v5969_v11  ;;  %v7210_v11 = vmov 0   ;;  %v8480_v3 = vpack.c.bf16 %v1077_v33, %v1076_v13  ;;  %v1083_v33 = vld [vmem:[#allocation2 + $0x1d2] sm:$0xff] }
 0x294   : > { %6226 = vmatmul.mubr.bf16.gmra.mrb[4].mxu1 %v8449_v53  ;;  %3487 = vmatmul.mubr.bf16.gmra.mrb[60].mxu0 %v8421_v40  ;;  %v1078_v40 = vld [vmem:[#allocation2 + $0x182] sm:$0xff] }
 0x295   : > { %v8459_v17 = vadd.f32 %v5971_v5, %v8193_v46  ;;  %6229 = vmatprep.mubr.bf16.mxu1 %v8452_v14  ;;  %3529 = vmatprep.mubr.bf16.mxu0 %v7210_v11 }
 0x297   : > { %v5972_v41 = vpop.f32.mrb[156].mxu1 }
 0x298   : > { %v5973_v42 = vpop.f32.mrb[157].mxu1 }
 0x299   : > { %v5974_v59 = vadd.f32 %v5973_v42, %v5972_v41  ;;  %v5975_v49 = vpop.f32.mrb[158].mxu1  ;;  %v1081_v41 = vld [vmem:[#allocation2 + $0x1b2] sm:$0xff] }
 0x29a   : > { %v5976_v46 = vpop.f32.mrb[159].mxu1 }
 0x29b   : > { %v8469_v43 = vadd.f32 %v5974_v59, %v8204_v4  ;;  %v5977_v45 = vadd.f32 %v5976_v46, %v5975_v49  ;;  %v8491_v49 = vpack.c.bf16 %v1079_v16, %v1078_v40 }
 0x29c   : > { %6230 = vmatmul.mubr.bf16.gmra.mrb[8].mxu1 %v8463_v10  ;;  %3530 = vmatmul.mubr.bf16.vlgmr.msra.gmra.mrb[0].mxu0 %v8424_v22  ;;  %v1082_v22 = vld [vmem:[#allocation2 + $0x1c2] sm:$0xff] }
 0x29d   : > { %v8473_v57 = vadd.f32 %v5977_v45, %v8209_v32  ;;  %6233 = vmatprep.mubr.bf16.mxu1 %v8466_v29  ;;  %3539 = vmatprep.mubr.bf16.mxu0 %v7210_v11  ;;  %v8494_v45 = vpack.c.bf16 %v1081_v41, %v1080_v28 }
 0x29f   : > { %v5978_v24 = vpop.f32.mrb[160].mxu1 }
 0x2a0   : > { %v5979_v38 = vpop.f32.mrb[161].mxu1 }
 0x2a1   : > { %v5980_v4 = vadd.f32 %v5979_v38, %v5978_v24  ;;  %v5981_v54 = vpop.f32.mrb[162].mxu1  ;;  %v1084_v24 = vld [vmem:[#allocation2 + $0x202] sm:$0xff]  ;;  %v1085_v38 = vld [vmem:[#allocation2 + $0x212] sm:$0xff] }
 0x2a2   : > { %v5982_v32 = vpop.f32.mrb[163].mxu1  ;;  %v8508_v40 = vpack.c.bf16 %v1085_v38, %v1084_v24 }
 0x2a3   : > { %v8483_v5 = vadd.f32 %v5980_v4, %v8225_v61  ;;  %v5983_v48 = vadd.f32 %v5982_v32, %v5981_v54  ;;  %v8505_v32 = vpack.c.bf16 %v1083_v33, %v1082_v22 }
 0x2a4   : > { %6234 = vmatmul.mubr.bf16.gmra.mrb[12].mxu1 %v8477_v60  ;;  %3540 = vmatmul.mubr.bf16.gmra.mrb[4].mxu0 %v8435_v0  ;;  %v1086_v0 = vld [vmem:[#allocation2 + $0x222] sm:$0xff] }
 0x2a5   : > { %v8487_v26 = vadd.f32 %v5983_v48, %v8230_v7  ;;  %6237 = vmatprep.mubr.bf16.mxu1 %v8480_v3  ;;  %3549 = vmatprep.mubr.bf16.mxu0 %v7210_v11 }
 0x2a7   : > { %v5984_v42 = vpop.f32.mrb[164].mxu1 }
 0x2a8   : > { %v5985_v59 = vpop.f32.mrb[165].mxu1 }
 0x2a9   : > { %v5986_v61 = vadd.f32 %v5985_v59, %v5984_v42  ;;  %v5987_v46 = vpop.f32.mrb[166].mxu1  ;;  %v1087_v42 = vld [vmem:[#allocation2 + $0x232] sm:$0xff]  ;;  %v1088_v59 = vld [vmem:[#allocation2 + $0x242] sm:$0xff] }
 0x2aa   : > { %v5988_v7 = vpop.f32.mrb[167].mxu1 }
 0x2ab   : > { %v8497_v8 = vadd.f32 %v5986_v61, %v8243_v20  ;;  %v5989_v39 = vadd.f32 %v5988_v7, %v5987_v46  ;;  %v1089_v61 = vld [vmem:[#allocation2 + $0x252] sm:$0xff] }
 0x2ac   : > { %6238 = vmatmul.mubr.bf16.gmra.mrb[16].mxu1 %v8491_v49  ;;  %3550 = vmatmul.mubr.bf16.gmra.mrb[8].mxu0 %v8438_v30  ;;  %v8522_v33 = vpack.c.bf16 %v1089_v61, %v1088_v59  ;;  %v1090_v30 = vld [vmem:[#allocation2 + $0x262] sm:$0xff] }
 0x2ad   : > { %v8501_v13 = vadd.f32 %v5989_v39, %v8248_v34  ;;  %6241 = vmatprep.mubr.bf16.mxu1 %v8494_v45  ;;  %v8519_v39 = vpack.c.bf16 %v1087_v42, %v1086_v0  ;;  %3559 = vmatprep.mubr.bf16.mxu0 %v7210_v11  ;;  %v9350_v61 = vld [vmem:[#allocation15_spill] sm:$0xff] }
 0x2af   : > { %v5990_v4 = vpop.f32.mrb[168].mxu1 }
 0x2b0   : > { %v5991_v54 = vpop.f32.mrb[169].mxu1 }
 0x2b1   : > { %v5992_v20 = vadd.f32 %v5991_v54, %v5990_v4  ;;  %v5993_v48 = vpop.f32.mrb[170].mxu1  ;;  %v1091_v54 = vld [vmem:[#allocation2 + $0x272] sm:$0xff] }
 0x2b2   : > { %v5994_v34 = vpop.f32.mrb[171].mxu1 }
 0x2b3   : > { %v8511_v16 = vadd.f32 %v5992_v20, %v8261_v51  ;;  %v5995_v28 = vadd.f32 %v5994_v34, %v5993_v48  ;;  %v8533_v34 = vpack.c.bf16 %v1091_v54, %v1090_v30 }
 0x2b4   : > { %6242 = vmatmul.mubr.bf16.gmra.mrb[20].mxu1 %v8505_v32  ;;  %3560 = vmatmul.mubr.bf16.gmra.mrb[12].mxu0 %v8449_v53 }
 0x2b5   : > { %v8515_v41 = vadd.f32 %v5995_v28, %v8266_v47  ;;  %6245 = vmatprep.mubr.bf16.mxu1 %v8508_v40  ;;  %3569 = vmatprep.mubr.bf16.mxu0 %v7210_v11 }
 0x2b7   : > { %v5996_v46 = vpop.f32.mrb[172].mxu1 }
 0x2b8   : > { %v5997_v7 = vpop.f32.mrb[173].mxu1 }
 0x2b9   : > { %v5998_v51 = vadd.f32 %v5997_v7, %v5996_v46  ;;  %v5999_v22 = vpop.f32.mrb[174].mxu1 }
 0x2ba   : > { %v6000_v47 = vpop.f32.mrb[175].mxu1 }
 0x2bb   : > { %v8525_v24 = vadd.f32 %v5998_v51, %v8277_v56  ;;  %v6001_v38 = vadd.f32 %v6000_v47, %v5999_v22 }
 0x2bc   : > { %6246 = vmatmul.mubr.bf16.gmra.mrb[24].mxu1 %v8519_v39  ;;  %3570 = vmatmul.mubr.bf16.gmra.mrb[16].mxu0 %v8452_v14 }
 0x2bd   : > { %v8529_v4 = vadd.f32 %v6001_v38, %v8282_v62  ;;  %6249 = vmatprep.mubr.bf16.mxu1 %v8522_v33  ;;  %3579 = vmatprep.mubr.bf16.mxu0 %v7210_v11 }
 0x2bf   : > { %v6002_v20 = vpop.f32.mrb[176].mxu1 }
 0x2c0   : > { %v6003_v48 = vpop.f32.mrb[177].mxu1 }
 0x2c1   : > { %v6004_v28 = vadd.f32 %v6003_v48, %v6002_v20  ;;  %v6005_v0 = vpop.f32.mrb[178].mxu1 }
 0x2c2   : > { %v6006_v56 = vpop.f32.mrb[179].mxu1 }
 0x2c3   : > { %v8537_v42 = vadd.f32 %v6004_v28, %v8296_v6  ;;  %v6007_v62 = vadd.f32 %v6006_v56, %v6005_v0 }
 0x2c4   : > { %6250 = vmatmul.mubr.bf16.gmra.mrb[28].mxu1 %v8533_v34  ;;  %3580 = vmatmul.mubr.bf16.gmra.mrb[20].mxu0 %v8463_v10 }
 0x2c5   : > { %v8541_v59 = vadd.f32 %v6007_v62, %v8301_v50  ;;  %6269 = vmatprep.mubr.bf16.mxu1 %v9350_v61  ;;  %3589 = vmatprep.mubr.bf16.mxu0 %v7210_v11 }
 0x2c7   : > { %v6008_v46 = vpop.f32.mrb[180].mxu1 }
 0x2c8   : > { %v6009_v53 = vpop.f32.mrb[181].mxu1 }
 0x2c9   : > { %v6010_v7 = vadd.f32 %v6009_v53, %v6008_v46  ;;  %v6011_v51 = vpop.f32.mrb[182].mxu1 }
 0x2ca   : > { %v6012_v22 = vpop.f32.mrb[183].mxu1 }
 0x2cb   : > { %v8547_v6 = vadd.f32 %v6010_v7, %v8314_v2  ;;  %v6013_v47 = vadd.f32 %v6012_v22, %v6011_v51 }
 0x2cc   : > { %3590 = vmatmul.mubr.bf16.gmra.mrb[24].mxu0 %v8466_v29 }
 0x2cd   : > { %v8550_v38 = vadd.f32 %v6013_v47, %v8319_v9  ;;  %3599 = vmatprep.mubr.bf16.mxu0 %v7210_v11 }
 0x2cf   : > { %v6014_v50 = vpop.f32.mrb[184].mxu1 }
 0x2d0   : > { %v6015_v30 = vpop.f32.mrb[185].mxu1 }
 0x2d1   : > { %v6016_v54 = vadd.f32 %v6015_v30, %v6014_v50  ;;  %v6017_v20 = vpop.f32.mrb[186].mxu1 }
 0x2d2   : > { %v6018_v14 = vpop.f32.mrb[187].mxu1 }
 0x2d3   : > { %v8555_v48 = vadd.f32 %v6016_v54, %v8332_v35  ;;  %v6019_v28 = vadd.f32 %v6018_v14, %v6017_v20 }
 0x2d4   : > { %3600 = vmatmul.mubr.bf16.gmra.mrb[28].mxu0 %v8477_v60 }
 0x2d5   : > { %v8558_v2 = vadd.f32 %v6019_v28, %v8337_v31  ;;  %3609 = vmatprep.mubr.bf16.mxu0 %v7210_v11 }
 0x2d7   : > { %v6020_v0 = vpop.f32.mrb[188].mxu1 }
 0x2d8   : > { %v6021_v56 = vpop.f32.mrb[189].mxu1 }
 0x2d9   : > { %v6022_v9 = vadd.f32 %v6021_v56, %v6020_v0  ;;  %v6023_v62 = vpop.f32.mrb[190].mxu1 }
 0x2da   : > { %v6024_v10 = vpop.f32.mrb[191].mxu1 }
 0x2db   : > { %v8563_v61 = vadd.f32 %v6022_v9, %v8348_v1  ;;  %v6025_v46 = vadd.f32 %v6024_v10, %v6023_v62 }
 0x2dc   : > { %3610 = vmatmul.mubr.bf16.gmra.mrb[32].mxu0 %v8480_v3 }
 0x2dd   : > { %v8566_v35 = vadd.f32 %v6025_v46, %v8353_v27  ;;  %3619 = vmatprep.mubr.bf16.mxu0 %v7210_v11 }
 0x2df   : > { %v6042_v53 = vpop.f32.mrb[192].mxu1 }
 0x2e0   : > { %v6043_v7 = vpop.f32.mrb[193].mxu1 }
 0x2e1   : > { %v6044_v31 = vadd.f32 %v6043_v7, %v6042_v53  ;;  %v6045_v51 = vpop.f32.mrb[194].mxu1 }
 0x2e2   : > { %v6046_v29 = vpop.f32.mrb[195].mxu1 }
 0x2e3   : > { %v6047_v22 = vadd.f32 %v6046_v29, %v6045_v51  ;;  %v8571_v47 = vadd.f32 %v6044_v31, %v8366_v21 }
 0x2e4   : > { %3620 = vmatmul.mubr.bf16.gmra.mrb[36].mxu0 %v8491_v49 }
 0x2e5   : > { %v8574_v1 = vadd.f32 %v6047_v22, %v8370_v36  ;;  %3629 = vmatprep.mubr.bf16.mxu0 %v7210_v11 }
 0x2e7   : > { %v6048_v50 = vpop.f32.mrb[196].mxu1 }
 0x2e8   : > { %v6049_v30 = vpop.f32.mrb[197].mxu1 }
 0x2e9   : > { %v6050_v27 = vadd.f32 %v6049_v30, %v6048_v50  ;;  %v6051_v54 = vpop.f32.mrb[198].mxu1 }
 0x2ea   : > { %v6052_v60 = vpop.f32.mrb[199].mxu1 }
 0x2eb   : > { %v6053_v20 = vadd.f32 %v6052_v60, %v6051_v54  ;;  %v8579_v14 = vadd.f32 %v6050_v27, %v8382_v25 }
 0x2ec   : > { %3630 = vmatmul.mubr.bf16.gmra.mrb[40].mxu0 %v8494_v45 }
 0x2ed   : > { %v8582_v28 = vadd.f32 %v6053_v20, %v8386_v12  ;;  %3639 = vmatprep.mubr.bf16.mxu0 %v7210_v11 }
 0x2ef   : > { %v6054_v21 = vpop.f32.mrb[200].mxu1 }
 0x2f0   : > { %v6055_v0 = vpop.f32.mrb[201].mxu1 }
 0x2f1   : > { %v6056_v36 = vadd.f32 %v6055_v0, %v6054_v21  ;;  %v6057_v56 = vpop.f32.mrb[202].mxu1 }
 0x2f2   : > { %v6058_v3 = vpop.f32.mrb[203].mxu1 }
 0x2f3   : > { %v6059_v9 = vadd.f32 %v6058_v3, %v6057_v56  ;;  %v8587_v62 = vadd.f32 %v6056_v36, %v8398_v37 }
 0x2f4   : > { %3640 = vmatmul.mubr.bf16.gmra.mrb[44].mxu0 %v8505_v32 }
 0x2f5   : > { %v8590_v10 = vadd.f32 %v6059_v9, %v8402_v52  ;;  %3649 = vmatprep.mubr.bf16.mxu0 %v7210_v11 }
 0x2f7   : > { %v6060_v25 = vpop.f32.mrb[204].mxu1 }
 0x2f8   : > { %v6061_v46 = vpop.f32.mrb[205].mxu1 }
 0x2f9   : > { %v6062_v12 = vadd.f32 %v6061_v46, %v6060_v25  ;;  %v6063_v53 = vpop.f32.mrb[206].mxu1 }
 0x2fa   : > { %v6064_v49 = vpop.f32.mrb[207].mxu1 }
 0x2fb   : > { %v6065_v7 = vadd.f32 %v6064_v49, %v6063_v53  ;;  %v8595_v31 = vadd.f32 %v6062_v12, %v8412_v15 }
 0x2fc   : > { %3650 = vmatmul.mubr.bf16.gmra.mrb[48].mxu0 %v8508_v40 }
 0x2fd   : > { %v8598_v51 = vadd.f32 %v6065_v7, %v8416_v55  ;;  %3659 = vmatprep.mubr.bf16.mxu0 %v7210_v11 }
 0x2ff   : > { %v6066_v37 = vpop.f32.mrb[208].mxu1 }
 0x300   : > { %v6067_v29 = vpop.f32.mrb[209].mxu1 }
 0x301   : > { %v6068_v52 = vadd.f32 %v6067_v29, %v6066_v37  ;;  %v6069_v22 = vpop.f32.mrb[210].mxu1 }
 0x302   : > { %v6070_v45 = vpop.f32.mrb[211].mxu1 }
 0x303   : > { %v6071_v50 = vadd.f32 %v6070_v45, %v6069_v22  ;;  %v8603_v30 = vadd.f32 %v6068_v52, %v8427_v63 }
 0x304   : > { %3660 = vmatmul.mubr.bf16.gmra.mrb[52].mxu0 %v8519_v39 }
 0x305   : > { %v8606_v27 = vadd.f32 %v6071_v50, %v8431_v18  ;;  %3669 = vmatprep.mubr.bf16.mxu0 %v7210_v11 }
 0x307   : > { %v6072_v15 = vpop.f32.mrb[212].mxu1 }
 0x308   : > { %v6073_v54 = vpop.f32.mrb[213].mxu1 }
 0x309   : > { %v6074_v55 = vadd.f32 %v6073_v54, %v6072_v15  ;;  %v6075_v60 = vpop.f32.mrb[214].mxu1 }
 0x30a   : > { %v6076_v32 = vpop.f32.mrb[215].mxu1 }
 0x30b   : > { %v6077_v20 = vadd.f32 %v6076_v32, %v6075_v60  ;;  %v8611_v21 = vadd.f32 %v6074_v55, %v8441_v44 }
 0x30c   : > { %3670 = vmatmul.mubr.bf16.gmra.mrb[56].mxu0 %v8522_v33 }
 0x30d   : > { %v8614_v0 = vadd.f32 %v6077_v20, %v8445_v58  ;;  %v7053_v58 = vld [vmem:[%s9255_s3] sm:$0xff]   ;;  %3679 = vmatprep.mubr.bf16.mxu0 %v7210_v11 }
 0x30e   : > { %6253 = vmatprep.subr.bf16.mxu1 %v7053_v58 }
 0x30f   : > { %v6078_v63 = vpop.f32.mrb[216].mxu1  ;;  %6254 = vmatpush3.bf16.msra.mxu1 %v7053_v58 }
 0x310   : > { %v6079_v36 = vpop.f32.mrb[217].mxu1 }
 0x311   : > { %v6080_v18 = vadd.f32 %v6079_v36, %v6078_v63  ;;  %v6081_v56 = vpop.f32.mrb[218].mxu1 }
 0x312   : > { %v6082_v40 = vpop.f32.mrb[219].mxu1 }
 0x313   : > { %v6083_v3 = vadd.f32 %v6082_v40, %v6081_v56  ;;  %v8619_v9 = vadd.f32 %v6080_v18, %v8455_v23 }
 0x314   : > { %3680 = vmatmul.mubr.bf16.gmra.mrb[60].mxu0 %v8533_v34 }
 0x315   : > { %v8622_v25 = vadd.f32 %v6083_v3, %v8459_v17 }
 0x317   : > { %v6084_v44 = vpop.f32.mrb[220].mxu1 }
 0x318   : > { %v6085_v46 = vpop.f32.mrb[221].mxu1 }
 0x319   : > { %v6086_v39 = vadd.f32 %v6085_v46, %v6084_v44  ;;  %v6087_v12 = vpop.f32.mrb[222].mxu1 }
 0x31a   : > { %v6088_v53 = vpop.f32.mrb[223].mxu1 }
 0x31b   : > { %v6089_v49 = vadd.f32 %v6088_v53, %v6087_v12  ;;  %v8630_v23 = vadd.f32 %v6086_v39, %v8469_v43  ;;  %v7057_v39 = vld [vmem:[%s9255_s3 + $0x20] sm:$0xff]  }
 0x31d   : > { %v8633_v17 = vadd.f32 %v6089_v49, %v8473_v57 }
 0x31f   : > { %v6090_v7 = vpop.f32.mrb[224].mxu1 }
 0x320   : > { %v6091_v33 = vpop.f32.mrb[225].mxu1 }
 0x321   : > { %v6092_v37 = vadd.f32 %v6091_v33, %v6090_v7  ;;  %v6093_v29 = vpop.f32.mrb[226].mxu1 }
 0x322   : > { %v6094_v52 = vpop.f32.mrb[227].mxu1 }
 0x323   : > { %v6095_v22 = vadd.f32 %v6094_v52, %v6093_v29  ;;  %v8637_v11 = vadd.f32 %v6092_v37, %v8483_v5  ;;  %v7054_v5 = vld [vmem:[%s9255_s3 + $0x8] sm:$0xff]  }
 0x324   : > { %6255 = vmatprep.subr.bf16.mxu1 %v7054_v5 }
 0x325   : > { %v8640_v45 = vadd.f32 %v6095_v22, %v8487_v26  ;;  %v7055_v26 = vld [vmem:[%s9255_s3 + $0x10] sm:$0xff]   ;;  %6256 = vmatpush3.bf16.msra.mxu1 %v7054_v5 }
 0x326   : > { %6257 = vmatprep.subr.bf16.mxu1 %v7055_v26 }
 0x327   : > { %v6096_v43 = vpop.f32.mrb[228].mxu1 }
 0x328   : > { %v6097_v50 = vpop.f32.mrb[229].mxu1 }
 0x329   : > { %v6098_v15 = vadd.f32 %v6097_v50, %v6096_v43  ;;  %v6099_v54 = vpop.f32.mrb[230].mxu1  ;;  %6258 = vmatpush3.bf16.msra.mxu1 %v7055_v26  ;;  %v7058_v43 = vld [vmem:[%s9255_s3 + $0x28] sm:$0xff]  }
 0x32a   : > { %v6100_v57 = vpop.f32.mrb[231].mxu1 }
 0x32b   : > { %v6101_v55 = vadd.f32 %v6100_v57, %v6099_v54  ;;  %v8643_v60 = vadd.f32 %v6098_v15, %v8497_v8  ;;  %v7056_v8 = vld [vmem:[%s9255_s3 + $0x18] sm:$0xff]   ;;  %v7059_v15 = vld [vmem:[%s9255_s3 + $0x30] sm:$0xff]  }
 0x32c   : > { %6259 = vmatprep.subr.bf16.mxu1 %v7056_v8 }
 0x32d   : > { %v8646_v34 = vadd.f32 %v6101_v55, %v8501_v13  ;;  %6260 = vmatpush3.bf16.msra.mxu1 %v7056_v8  ;;  %v9351_v8 = vld [vmem:[#allocation16_spill] sm:$0xff] }
 0x32e   : > { %6261 = vmatprep.subr.bf16.mxu1 %v7057_v39 }
 0x32f   : > { %v6102_v32 = vpop.f32.mrb[232].mxu1 }
 0x330   : > { %v6103_v20 = vpop.f32.mrb[233].mxu1 }
 0x331   : > { %v6104_v63 = vadd.f32 %v6103_v20, %v6102_v32  ;;  %v6105_v36 = vpop.f32.mrb[234].mxu1  ;;  %6262 = vmatpush3.bf16.msra.mxu1 %v7057_v39 }
 0x332   : > { %v6106_v18 = vpop.f32.mrb[235].mxu1  ;;  %6263 = vmatprep.subr.bf16.mxu1 %v7058_v43 }
 0x333   : > { %v6107_v13 = vadd.f32 %v6106_v18, %v6105_v36  ;;  %v8658_v56 = vadd.f32 %v6104_v63, %v8511_v16 }
 0x335   : > { %v8661_v40 = vadd.f32 %v6107_v13, %v8515_v41  ;;  %6264 = vmatpush3.bf16.msra.mxu1 %v7058_v43 }
 0x336   : > { %6265 = vmatprep.subr.bf16.mxu1 %v7059_v15 }
 0x337   : > { %v6108_v3 = vpop.f32.mrb[236].mxu1 }
 0x338   : > { %v6109_v44 = vpop.f32.mrb[237].mxu1 }
 0x339   : > { %v6110_v46 = vadd.f32 %v6109_v44, %v6108_v3  ;;  %v6111_v58 = vpop.f32.mrb[238].mxu1  ;;  %6266 = vmatpush3.bf16.msra.mxu1 %v7059_v15  ;;  %v9352_v3 = vld [vmem:[#allocation17_spill] sm:$0xff] }
 0x33a   : > { %v6112_v12 = vpop.f32.mrb[239].mxu1 }
 0x33b   : > { %v6113_v53 = vadd.f32 %v6112_v12, %v6111_v58  ;;  %v8667_v49 = vadd.f32 %v6110_v46, %v8525_v24  ;;  %v4960_v12 = vld [vmem:[%s9257_s5] sm:$0xff] }
 0x33d   : > { %v8670_v16 = vadd.f32 %v6113_v53, %v8529_v4  ;;  %v4961_v53 = vld [vmem:[%s9257_s5 + $0x8] sm:$0xff] }
 0x33f   : > { %v6114_v41 = vpop.f32.mrb[240].mxu1 }
 0x340   : > { %v6115_v7 = vpop.f32.mrb[241].mxu1 }
 0x341   : > { %v6116_v33 = vadd.f32 %v6115_v7, %v6114_v41  ;;  %v6117_v37 = vpop.f32.mrb[242].mxu1  ;;  %v6342_v7 = vpack.c.bf16 %v4961_v53, %v4960_v12  ;;  %v4966_v12 = vld [vmem:[%s9257_s5 + $0x30] sm:$0xff] }
 0x342   : > { %v6118_v29 = vpop.f32.mrb[243].mxu1  ;;  %v9358_v53 = vld [vmem:[#allocation33_spill] sm:$0xff] }
 0x343   : > { %v6119_v52 = vadd.f32 %v6118_v29, %v6117_v37  ;;  %v8673_v22 = vadd.f32 %v6116_v33, %v8537_v42  ;;  %v9353_v33 = vld [vmem:[#allocation18_spill] sm:$0xff]  ;;  %v9354_v29 = vld [vmem:[#allocation20_spill] sm:$0xff] }
 0x345   : > { %v8679_v24 = vadd.f32 %v6119_v52, %v8541_v59  ;;  %v7060_v59 = vld [vmem:[%s9255_s3 + $0x38] sm:$0xff]  }
 0x346   : > { %6267 = vmatprep.subr.bf16.mxu1 %v7060_v59 }
 0x347   : > { %v6120_v4 = vpop.f32.mrb[244].mxu1  ;;  %6268 = vmatpush3.bf16.msra.mxu1 %v7060_v59 }
 0x348   : > { %v6121_v50 = vpop.f32.mrb[245].mxu1 }
 0x349   : > { %v6122_v54 = vadd.f32 %v6121_v50, %v6120_v4  ;;  %v6123_v57 = vpop.f32.mrb[246].mxu1 }
 0x34a   : > { %v6124_v55 = vpop.f32.mrb[247].mxu1  ;;  %6270 = vmatmul.mubr.bf16.vlgmr.msra.gmra.mrb[32].mxu1 %v9351_v8 }
 0x34b   : > { %v6125_v42 = vadd.f32 %v6124_v55, %v6123_v57  ;;  %v8685_v5 = vadd.f32 %v6122_v54, %v8547_v6  ;;  %6273 = vmatprep.mubr.bf16.mxu1 %v9352_v3  ;;  %v9355_v55 = vld [vmem:[#allocation23_spill] sm:$0xff] }
 0x34d   : > { %v8691_v26 = vadd.f32 %v6125_v42, %v8550_v38  ;;  %v9356_v42 = vld [vmem:[#allocation26_spill] sm:$0xff] }
 0x34f   : > { %v6126_v32 = vpop.f32.mrb[248].mxu1 }
 0x350   : > { %v6127_v20 = vpop.f32.mrb[249].mxu1 }
 0x351   : > { %v6128_v63 = vadd.f32 %v6127_v20, %v6126_v32  ;;  %v6129_v36 = vpop.f32.mrb[250].mxu1 }
 0x352   : > { %v6130_v18 = vpop.f32.mrb[251].mxu1  ;;  %6274 = vmatmul.mubr.bf16.gmra.mrb[36].mxu1 %v9353_v33 }
 0x353   : > { %v6131_v13 = vadd.f32 %v6130_v18, %v6129_v36  ;;  %v8695_v6 = vadd.f32 %v6128_v63, %v8555_v48  ;;  %v7211_v48 = vmov 0.0|0.0   ;;  %6277 = vmatprep.mubr.bf16.mxu1 %v9354_v29  ;;  %v9357_v36 = vld [vmem:[#allocation28_spill] sm:$0xff] }
 0x354   : > { %6341 = vmatprep.subr.bf16.mxu1 %v7211_v48 }
 0x355   : > { %v8699_v44 = vadd.f32 %v6131_v13, %v8558_v2  ;;  %6343 = vmatpush3.bf16.msra.mxu1 %v6342_v7 }
 0x356   : > { %6344 = vmatprep.subr.bf16.mxu1 %v7211_v48 }
 0x357   : > { %v6132_v38 = vpop.f32.mrb[252].mxu1 }
 0x358   : > { %v6133_v46 = vpop.f32.mrb[253].mxu1 }
 0x359   : > { %v6134_v58 = vadd.f32 %v6133_v46, %v6132_v38  ;;  %v6135_v39 = vpop.f32.mrb[254].mxu1 }
 0x35a   : > { %v6136_v41 = vpop.f32.mrb[255].mxu1  ;;  %6278 = vmatmul.mubr.bf16.gmra.mrb[40].mxu1 %v9355_v55 }
 0x35b   : > { %v6137_v2 = vadd.f32 %v6136_v41, %v6135_v39  ;;  %v8710_v37 = vadd.f32 %v6134_v58, %v8563_v61  ;;  %6281 = vmatprep.mubr.bf16.mxu1 %v9356_v42  ;;  %v9359_v41 = vld [vmem:[#allocation39_spill] sm:$0xff] }
 0x35d   : > { %v8714_v52 = vadd.f32 %v6137_v2, %v8566_v35 }
 0x35f   : > { %v6223_v43 = vpop.f32.mrb[0].mxu1 }
 0x360   : > { %v8718_v4 = vadd.f32 %v6223_v43, %v8579_v14  ;;  %v4368_v50 = vpop.f32.mrb[1].mxu1 }
 0x361   : > { %v8721_v15 = vadd.f32 %v4368_v50, %v8571_v47  ;;  %v6224_v54 = vpop.f32.mrb[2].mxu1 }
 0x362   : > { %v8724_v61 = vadd.f32 %v6224_v54, %v8582_v28  ;;  %v4371_v57 = vpop.f32.mrb[3].mxu1  ;;  %6282 = vmatmul.mubr.bf16.gmra.mrb[44].mxu1 %v9357_v36 }
 0x363   : > { %v8728_v35 = vadd.f32 %v4371_v57, %v8574_v1  ;;  %6285 = vmatprep.mubr.bf16.mxu1 %v7986_v19 }
 0x367   : > { %v6227_v59 = vpop.f32.mrb[4].mxu1 }
 0x368   : > { %v8732_v14 = vadd.f32 %v6227_v59, %v8595_v31  ;;  %v4384_v32 = vpop.f32.mrb[5].mxu1  ;;  %v4962_v31 = vld [vmem:[%s9257_s5 + $0x10] sm:$0xff]  ;;  %v4969_v59 = vld [vmem:[%s9257_s5 + $0x48] sm:$0xff] }
 0x369   : > { %v8735_v47 = vadd.f32 %v4384_v32, %v8587_v62  ;;  %v6228_v20 = vpop.f32.mrb[6].mxu1  ;;  %v4963_v62 = vld [vmem:[%s9257_s5 + $0x18] sm:$0xff] }
 0x36a   : > { %v8738_v28 = vadd.f32 %v6228_v20, %v8598_v51  ;;  %v4387_v63 = vpop.f32.mrb[7].mxu1  ;;  %v4964_v51 = vld [vmem:[%s9257_s5 + $0x20] sm:$0xff]  ;;  %v6345_v8 = vpack.c.bf16 %v4963_v62, %v4962_v31  ;;  %6286 = vmatmul.mubr.bf16.gmra.mrb[48].mxu1 %v9358_v53 }
 0x36b   : > { %v8742_v1 = vadd.f32 %v4387_v63, %v8590_v10  ;;  %v4965_v10 = vld [vmem:[%s9257_s5 + $0x28] sm:$0xff]  ;;  %6289 = vmatprep.mubr.bf16.mxu1 %v9359_v41  ;;  %v9361_v63 = vld [vmem:[#allocation42_spill] sm:$0xff]  ;;  %v9362_v62 = vld [vmem:[#allocation43_spill] sm:$0xff] }
 0x36c   : > { %6346 = vmatpush3.bf16.msra.mxu1 %v6345_v8  ;;  %v6348_v46 = vpack.c.bf16 %v4965_v10, %v4964_v51 }
 0x36d   : > { %6347 = vmatprep.subr.bf16.mxu1 %v7211_v48 }
 0x36f   : > { %v6231_v18 = vpop.f32.mrb[8].mxu1  ;;  %v3531_v31 = vpop.f32.mrb[0].mxu0 }
 0x370   : > { %v8758_v19 = vadd.f32 %v6231_v18, %v8611_v21  ;;  %v4400_v13 = vpop.f32.mrb[9].mxu1  ;;  %v4967_v21 = vld [vmem:[%s9257_s5 + $0x38] sm:$0xff]  ;;  %6349 = vmatpush3.bf16.msra.mxu1 %v6348_v46  ;;  %v3533_v18 = vpop.f32.mrb[1].mxu0 }
 0x371   : > { %v8761_v3 = vadd.f32 %v4400_v13, %v8603_v30  ;;  %v6232_v38 = vpop.f32.mrb[10].mxu1  ;;  %v6351_v2 = vpack.c.bf16 %v4967_v21, %v4966_v12  ;;  %6350 = vmatprep.subr.bf16.mxu1 %v7211_v48  ;;  %v3535_v10 = vpop.f32.mrb[2].mxu0 }
 0x372   : > { %v8764_v58 = vadd.f32 %v6232_v38, %v8614_v0  ;;  %v4403_v39 = vpop.f32.mrb[11].mxu1  ;;  %v9360_v0 = vld [vmem:[#allocation36_spill] sm:$0xff]  ;;  %6290 = vmatmul.mubr.bf16.gmra.mrb[52].mxu1 %v9361_v63  ;;  %v3537_v38 = vpop.f32.mrb[3].mxu0 }
 0x373   : > { %v8775_v30 = vadd.f32 %v4403_v39, %v8606_v27  ;;  %v8779_v7 = vsub.s32 0, %v9360_v0  ;;  %v1564_v33 = vsub.s32 1, %v9360_v0  ;;  %v7071_v27 = vld [vmem:[%s9254_s2] sm:$0x7]  ;;  %6293 = vmatprep.mubr.bf16.mxu1 %v9362_v62 }
 0x374   : > { %6352 = vmatpush3.bf16.msra.mxu1 %v6351_v2 }
 0x375   : > { %v8790_v54 = vrot.slane %v7071_v27, %v8779_v7  ;;  %v8795_v42 = vrot.slane %v7071_v27, %v1564_v33  ;;  %6353 = vmatprep.subr.bf16.mxu1 %v7211_v48 }
 0x377   : > { %v6235_v29 = vpop.f32.mrb[12].mxu1  ;;  %v6365_v51 = vadd.f32 %v3531_v31, %v8790_v54  ;;  %v6366_v8 = vadd.f32 %v3533_v18, %v8795_v42  ;;  %v6367_v13 = vadd.f32 %v3535_v10, %v8790_v54  ;;  %v4970_v10 = vld [vmem:[%s9257_s5 + $0x50] sm:$0xff] }
 0x378   : > { %v8784_v43 = vadd.f32 %v6235_v29, %v8630_v23  ;;  %v4416_v50 = vpop.f32.mrb[13].mxu1  ;;  %v4968_v23 = vld [vmem:[%s9257_s5 + $0x40] sm:$0xff] }
 0x379   : > { %v8793_v57 = vadd.f32 %v4416_v50, %v8619_v9  ;;  %v6236_v55 = vpop.f32.mrb[14].mxu1  ;;  %v6354_v9 = vpack.c.bf16 %v4969_v59, %v4968_v23  ;;  %v4496_v53 = vmax.f32 %v6367_v13, 0.0  ;;  %v9364_v59 = vld [vmem:[#allocation45_spill] sm:$0xff] }
 0x37a   : > { %v8804_v32 = vadd.f32 %v6236_v55, %v8633_v17  ;;  %v4419_v20 = vpop.f32.mrb[15].mxu1  ;;  %v4495_v17 = vmax.f32 %v6365_v51, 0.0  ;;  %v9363_v55 = vld [vmem:[#allocation44_spill] sm:$0xff] }
 0x37b   : > { %v8809_v36 = vadd.f32 %v4419_v20, %v8622_v25  ;;  %6355 = vmatpush3.bf16.msra.mxu1 %v6354_v9  ;;  %v6368_v25 = vadd.f32 %v3537_v38, %v8795_v42 }
 0x37c   : > { %6356 = vmatprep.subr.bf16.mxu1 %v7211_v48  ;;  %v4527_v12 = vmul.f32 %v6366_v8, %v4495_v17  ;;  %6294 = vmatmul.mubr.bf16.gmra.mrb[56].mxu1 %v9363_v55  ;;  %v9365_v55 = vld [vmem:[#allocation46_spill] sm:$0xff] }
 0x37d   : > { %v4528_v50 = vmul.f32 %v6368_v25, %v4496_v53  ;;  %6297 = vmatprep.mubr.bf16.mxu1 %v9364_v59 }
 0x37e   : > { %v4559_v2 = vadd.f32 %v4527_v12, %v8721_v15 }
 0x37f   : > { %v6239_v46 = vpop.f32.mrb[16].mxu1  ;;  %v4560_v20 = vadd.f32 %v4528_v50, %v8728_v35  ;;  %v4971_v35 = vld [vmem:[%s9257_s5 + $0x58] sm:$0xff] }
 0x380   : > { %v8818_v39 = vadd.f32 %v6239_v46, %v8643_v60  ;;  %v4432_v21 = vpop.f32.mrb[17].mxu1  ;;  %v3541_v60 = vpop.f32.mrb[4].mxu0  ;;  %v6357_v53 = vpack.c.bf16 %v4971_v35, %v4970_v10 }
 0x381   : > { %v8821_v41 = vadd.f32 %v4432_v21, %v8637_v11  ;;  %v6240_v33 = vpop.f32.mrb[18].mxu1  ;;  %v6369_v11 = vadd.f32 %v3541_v60, %v8790_v54  ;;  %v3543_v9 = vpop.f32.mrb[5].mxu0  ;;  %v4592_v31 = vmax.f32 %v4560_v20, 0.0 }
 0x382   : > { %v8825_v29 = vadd.f32 %v6240_v33, %v8646_v34  ;;  %v4435_v27 = vpop.f32.mrb[19].mxu1  ;;  %v6370_v15 = vadd.f32 %v3543_v9, %v8795_v42  ;;  %v3545_v63 = vpop.f32.mrb[6].mxu0  ;;  %v4591_v34 = vmax.f32 %v4559_v2, 0.0  ;;  %6358 = vmatpush3.bf16.msra.mxu1 %v6357_v53 }
 0x383   : > { %v8829_v23 = vadd.f32 %v4435_v27, %v8640_v45  ;;  %v4497_v62 = vmax.f32 %v6369_v11, 0.0  ;;  %v6371_v51 = vadd.f32 %v3545_v63, %v8790_v54  ;;  %v3547_v18 = vpop.f32.mrb[7].mxu0  ;;  %6359 = vmatprep.subr.bf16.mxu1 %v7211_v48 }
 0x384   : > { %v6372_v45 = vadd.f32 %v3547_v18, %v8795_v42  ;;  %v4903_v17 = vadd.f32 %v4592_v31, %v4591_v34  ;;  %6298 = vmatmul.mubr.bf16.gmra.mrb[60].mxu1 %v9365_v55  ;;  %v3551_v60 = vpop.f32.mrb[8].mxu0  ;;  %v4974_v18 = vld [vmem:[%s9257_s5 + $0x70] sm:$0xff] }
 0x385   : > { %v4529_v38 = vmul.f32 %v6370_v15, %v4497_v62  ;;  %v4498_v25 = vmax.f32 %v6371_v51, 0.0  ;;  %v6373_v20 = vadd.f32 %v3551_v60, %v8790_v54  ;;  %v3553_v11 = vpop.f32.mrb[9].mxu0 }
 0x386   : > { %v6374_v9 = vadd.f32 %v3553_v11, %v8795_v42  ;;  %v3555_v15 = vpop.f32.mrb[10].mxu0 }
 0x387   : > { %v6243_v8 = vpop.f32.mrb[20].mxu1  ;;  %v4561_v33 = vadd.f32 %v4529_v38, %v8718_v4  ;;  %v4530_v50 = vmul.f32 %v6372_v45, %v4498_v25  ;;  %v4973_v4 = vld [vmem:[%s9257_s5 + $0x68] sm:$0xff]  ;;  %v4499_v31 = vmax.f32 %v6373_v20, 0.0  ;;  %v6375_v62 = vadd.f32 %v3555_v15, %v8790_v54  ;;  %v3557_v51 = vpop.f32.mrb[11].mxu0 }
 0x388   : > { %v8844_v13 = vadd.f32 %v6243_v8, %v8667_v49  ;;  %v4448_v46 = vpop.f32.mrb[21].mxu1  ;;  %v6376_v45 = vadd.f32 %v3557_v51, %v8795_v42 }
 0x389   : > { %v8847_v12 = vadd.f32 %v4448_v46, %v8658_v56  ;;  %v6244_v21 = vpop.f32.mrb[22].mxu1  ;;  %v4972_v56 = vld [vmem:[%s9257_s5 + $0x60] sm:$0xff]  ;;  %v4593_v59 = vmax.f32 %v4561_v33, 0.0  ;;  %v4531_v38 = vmul.f32 %v6374_v9, %v4499_v31  ;;  %v4500_v25 = vmax.f32 %v6375_v62, 0.0 }
 0x38a   : > { %v8851_v2 = vadd.f32 %v6244_v21, %v8670_v16  ;;  %v4451_v27 = vpop.f32.mrb[23].mxu1  ;;  %v4562_v16 = vadd.f32 %v4530_v50, %v8724_v61  ;;  %v4975_v61 = vld [vmem:[%s9257_s5 + $0x78] sm:$0xff]  ;;  %v8879_v21 = vld [vmem:[#allocation2] sm:$0xff] }
 0x38b   : > { %v8855_v49 = vadd.f32 %v4451_v27, %v8661_v40  ;;  %v6360_v40 = vpack.c.bf16 %v4973_v4, %v4972_v56  ;;  %v4904_v63 = vadd.f32 %v4903_v17, %v4593_v59  ;;  %v6363_v10 = vpack.c.bf16 %v4975_v61, %v4974_v18  ;;  %6333 = vmatprep.mubr.msk.f32.mxu1 %vm7212_vm0, %v8879_v21 }
 0x38c   : > { %v4594_v34 = vmax.f32 %v4562_v16, 0.0  ;;  %v4563_v50 = vadd.f32 %v4531_v38, %v8735_v47  ;;  %v4532_v27 = vmul.f32 %v6376_v45, %v4500_v25 }
 0x38d   : > { %6361 = vmatpush3.bf16.msra.mxu1 %v6360_v40 }
 0x38e   : > { %v4905_v35 = vadd.f32 %v4904_v63, %v4594_v34  ;;  %6362 = vmatprep.subr.bf16.mxu1 %v7211_v48  ;;  %v3561_v48 = vpop.f32.mrb[12].mxu0  ;;  %v4595_v56 = vmax.f32 %v4563_v50, 0.0  ;;  %v4564_v4 = vadd.f32 %v4532_v27, %v8742_v1 }
 0x38f   : > { %v6247_v8 = vpop.f32.mrb[24].mxu1  ;;  %v6377_v59 = vadd.f32 %v3561_v48, %v8790_v54 }
 0x390   : > { %v8876_v17 = vadd.f32 %v6247_v8, %v8685_v5  ;;  %v4464_v46 = vpop.f32.mrb[25].mxu1  ;;  %v4596_v20 = vmax.f32 %v4564_v4, 0.0 }
 0x391   : > { %v8884_v53 = vadd.f32 %v4464_v46, %v8673_v22  ;;  %v6248_v33 = vpop.f32.mrb[26].mxu1  ;;  %6364 = vmatpush3.bf16.msra.mxu1 %v6363_v10  ;;  %v3563_v22 = vpop.f32.mrb[13].mxu0  ;;  %v4501_v11 = vmax.f32 %v6377_v59, 0.0 }
 0x392   : > { %v8888_v5 = vadd.f32 %v6248_v33, %v8691_v26  ;;  %v4467_v55 = vpop.f32.mrb[27].mxu1  ;;  %6336 = vmatprep.subr.mxu1 %v8879_v21  ;;  %v6378_v47 = vadd.f32 %v3563_v22, %v8795_v42  ;;  %v3565_v16 = vpop.f32.mrb[14].mxu0  ;;  %v4906_v26 = vadd.f32 %v4905_v35, %v4595_v56 }
 0x393   : > { %v8891_v60 = vadd.f32 %v4467_v55, %v8679_v24  ;;  %v6379_v40 = vadd.f32 %v3565_v16, %v8790_v54  ;;  %v3567_v24 = vpop.f32.mrb[15].mxu0 }
 0x394   : > { %v6380_v15 = vadd.f32 %v3567_v24, %v8795_v42  ;;  %v4907_v63 = vadd.f32 %v4906_v26, %v4596_v20  ;;  %v4533_v34 = vmul.f32 %v6378_v47, %v4501_v11  ;;  %v3571_v38 = vpop.f32.mrb[16].mxu0 }
 0x395   : > { %v4502_v62 = vmax.f32 %v6379_v40, 0.0  ;;  %v6381_v25 = vadd.f32 %v3571_v38, %v8790_v54  ;;  %v3573_v33 = vpop.f32.mrb[17].mxu0 }
 0x396   : > { %v4565_v61 = vadd.f32 %v4533_v34, %v8732_v14  ;;  %v3575_v50 = vpop.f32.mrb[18].mxu0 }
 0x397   : > { %v6251_v9 = vpop.f32.mrb[28].mxu1  ;;  %v4534_v45 = vmul.f32 %v6380_v15, %v4502_v62  ;;  %v4503_v55 = vmax.f32 %v6381_v25, 0.0  ;;  %v3577_v48 = vpop.f32.mrb[19].mxu0 }
 0x398   : > { %v8900_v1 = vadd.f32 %v6251_v9, %v8710_v37  ;;  %v4480_v31 = vpop.f32.mrb[29].mxu1  ;;  %v4597_v37 = vmax.f32 %v4565_v61, 0.0  ;;  %v6384_v56 = vadd.f32 %v3577_v48, %v8795_v42  ;;  %v3581_v47 = vpop.f32.mrb[20].mxu0 }
 0x399   : > { %v8903_v51 = vadd.f32 %v4480_v31, %v8695_v6  ;;  %v6252_v18 = vpop.f32.mrb[30].mxu1  ;;  %v4566_v46 = vadd.f32 %v4534_v45, %v8738_v28  ;;  %v6382_v6 = vadd.f32 %v3573_v33, %v8795_v42  ;;  %v6385_v26 = vadd.f32 %v3581_v47, %v8790_v54  ;;  %v3583_v20 = vpop.f32.mrb[21].mxu0 }
 0x39a   : > { %v8907_v8 = vadd.f32 %v6252_v18, %v8714_v52  ;;  %v4483_v10 = vpop.f32.mrb[31].mxu1  ;;  %v4908_v27 = vadd.f32 %v4907_v63, %v4597_v37  ;;  %v6383_v52 = vadd.f32 %v3575_v50, %v8790_v54  ;;  %v6386_v11 = vadd.f32 %v3583_v20, %v8795_v42  ;;  %v3585_v40 = vpop.f32.mrb[22].mxu0 }
 0x39b   : > { %v8910_v35 = vadd.f32 %v4483_v10, %v8699_v44  ;;  %v4598_v14 = vmax.f32 %v4566_v46, 0.0  ;;  %v4535_v4 = vmul.f32 %v6382_v6, %v4503_v55  ;;  %v4505_v15 = vmax.f32 %v6385_v26, 0.0  ;;  %v3587_v34 = vpop.f32.mrb[23].mxu0 }
 0x39c   : > { %v4504_v59 = vmax.f32 %v6383_v52, 0.0  ;;  %v6387_v63 = vadd.f32 %v3585_v40, %v8790_v54  ;;  %v6388_v31 = vadd.f32 %v3587_v34, %v8795_v42 }
 0x39d   : > { %v4909_v44 = vadd.f32 %v4908_v27, %v4598_v14  ;;  %v4567_v22 = vadd.f32 %v4535_v4, %v8761_v3  ;;  %v4537_v3 = vmul.f32 %v6386_v11, %v4505_v15 }
 0x39e   : > { %v4536_v28 = vmul.f32 %v6384_v56, %v4504_v59  ;;  %v4506_v18 = vmax.f32 %v6387_v63, 0.0 }
 0x39f   : > { %v4599_v24 = vmax.f32 %v4567_v22, 0.0  ;;  %v4569_v61 = vadd.f32 %v4537_v3, %v8758_v19  ;;  %v3591_v45 = vpop.f32.mrb[24].mxu0 }
 0x3a0   : > { %v4568_v16 = vadd.f32 %v4536_v28, %v8775_v30  ;;  %v4538_v30 = vmul.f32 %v6388_v31, %v4506_v18  ;;  %v6389_v37 = vadd.f32 %v3591_v45, %v8790_v54  ;;  %v3593_v46 = vpop.f32.mrb[25].mxu0 }
 0x3a1   : > { %v4601_v10 = vmax.f32 %v4569_v61, 0.0  ;;  %v6390_v25 = vadd.f32 %v3593_v46, %v8795_v42  ;;  %v3595_v33 = vpop.f32.mrb[26].mxu0 }
 0x3a2   : > { %v4600_v9 = vmax.f32 %v4568_v16, 0.0  ;;  %v4570_v38 = vadd.f32 %v4538_v30, %v8764_v58  ;;  %v4507_v27 = vmax.f32 %v6389_v37, 0.0  ;;  %v3597_v14 = vpop.f32.mrb[27].mxu0  ;;  %v6391_v55 = vadd.f32 %v3595_v33, %v8790_v54 }
 0x3a3   : > { %v6392_v52 = vadd.f32 %v3597_v14, %v8795_v42  ;;  %v4910_v16 = vrot.slane %v4909_v44, 4 }
 0x3a4   : > { %v4916_v62 = vadd.f32 %v4600_v9, %v4599_v24  ;;  %v4602_v50 = vmax.f32 %v4570_v38, 0.0  ;;  %v4539_v48 = vmul.f32 %v6390_v25, %v4507_v27  ;;  %v4508_v56 = vmax.f32 %v6391_v55, 0.0 }
 0x3a6   : > { %v4917_v6 = vadd.f32 %v4916_v62, %v4601_v10  ;;  %v4571_v4 = vadd.f32 %v4539_v48, %v8793_v57  ;;  %v4540_v58 = vmul.f32 %v6392_v52, %v4508_v56  ;;  %v4911_v62 = vadd.f32 %v4910_v16, %v4909_v44 }
 0x3a7   : > { %v3601_v59 = vpop.f32.mrb[28].mxu0 }
 0x3a8   : > { %v4918_v19 = vadd.f32 %v4917_v6, %v4602_v50  ;;  %v4603_v22 = vmax.f32 %v4571_v4, 0.0  ;;  %v6393_v28 = vadd.f32 %v3601_v59, %v8790_v54  ;;  %v3603_v47 = vpop.f32.mrb[29].mxu0  ;;  %v4572_v26 = vadd.f32 %v4540_v58, %v8809_v36 }
 0x3a9   : > { %v6394_v20 = vadd.f32 %v3603_v47, %v8795_v42  ;;  %v3605_v11 = vpop.f32.mrb[30].mxu0  ;;  %v4912_v37 = vrot.slane %v4911_v62, 2 }
 0x3aa   : > { %v4919_v40 = vadd.f32 %v4918_v19, %v4603_v22  ;;  %v4509_v24 = vmax.f32 %v6393_v28, 0.0  ;;  %v6395_v9 = vadd.f32 %v3605_v11, %v8790_v54  ;;  %v3607_v15 = vpop.f32.mrb[31].mxu0  ;;  %v4604_v63 = vmax.f32 %v4572_v26, 0.0 }
 0x3ab   : > { %v6396_v57 = vadd.f32 %v3607_v15, %v8795_v42  ;;  %v4913_v19 = vadd.f32 %v4912_v37, %v4911_v62 }
 0x3ac   : > { %v4541_v34 = vmul.f32 %v6394_v20, %v4509_v24  ;;  %v4510_v31 = vmax.f32 %v6395_v9, 0.0  ;;  %v4920_v3 = vadd.f32 %v4919_v40, %v4604_v63 }
 0x3ad   : > { %v4914_v47 = vrot.slane %v4913_v19, 1 }
 0x3ae   : > { %v4573_v18 = vadd.f32 %v4541_v34, %v8784_v43  ;;  %v4542_v61 = vmul.f32 %v6396_v57, %v4510_v31 }
 0x3af   : > { %v3611_v30 = vpop.f32.mrb[32].mxu0  ;;  %v4915_v31 = vadd.f32 %v4914_v47, %v4913_v19 }
 0x3b0   : > { %v4605_v36 = vmax.f32 %v4573_v18, 0.0  ;;  %v4574_v45 = vadd.f32 %v4542_v61, %v8804_v32  ;;  %v6397_v10 = vadd.f32 %v3611_v30, %v8790_v54  ;;  %v3613_v38 = vpop.f32.mrb[33].mxu0 }
 0x3b1   : > { %v6398_v46 = vadd.f32 %v3613_v38, %v8795_v42  ;;  %v3615_v25 = vpop.f32.mrb[34].mxu0  ;;  %v4956_v37 = vmul.f32 0.015625, %v4915_v31 }
 0x3b2   : > { %v4921_v33 = vadd.f32 %v4920_v3, %v4605_v36  ;;  %v4606_v6 = vmax.f32 %v4574_v45, 0.0  ;;  %v4511_v50 = vmax.f32 %v6397_v10, 0.0  ;;  %v6399_v44 = vadd.f32 %v3615_v25, %v8790_v54  ;;  %v3617_v27 = vpop.f32.mrb[35].mxu0 }
 0x3b3   : > { %v6400_v43 = vadd.f32 %v3617_v27, %v8795_v42 }
 0x3b4   : > { %v4922_v14 = vadd.f32 %v4921_v33, %v4606_v6  ;;  %v4543_v55 = vmul.f32 %v6398_v46, %v4511_v50  ;;  %v4512_v52 = vmax.f32 %v6399_v44, 0.0 }
 0x3b6   : > { %v4923_v32 = vrot.slane %v4922_v14, 4  ;;  %v4575_v48 = vadd.f32 %v4543_v55, %v8821_v41  ;;  %v4544_v56 = vmul.f32 %v6400_v43, %v4512_v52 }
 0x3b7   : > { %v3621_v4 = vpop.f32.mrb[36].mxu0 }
 0x3b8   : > { %v4924_v58 = vadd.f32 %v4923_v32, %v4922_v14  ;;  %v4576_v59 = vadd.f32 %v4544_v56, %v8829_v23  ;;  %v6401_v22 = vadd.f32 %v3621_v4, %v8790_v54  ;;  %v3623_v28 = vpop.f32.mrb[37].mxu0  ;;  %v4607_v16 = vmax.f32 %v4575_v48, 0.0 }
 0x3b9   : > { %v6402_v26 = vadd.f32 %v3623_v28, %v8795_v42  ;;  %v3625_v20 = vpop.f32.mrb[38].mxu0 }
 0x3ba   : > { %v4925_v11 = vrot.slane %v4924_v58, 2  ;;  %v4608_v40 = vmax.f32 %v4576_v59, 0.0  ;;  %v4513_v24 = vmax.f32 %v6401_v22, 0.0  ;;  %v6403_v9 = vadd.f32 %v3625_v20, %v8790_v54  ;;  %v3627_v15 = vpop.f32.mrb[39].mxu0 }
 0x3bb   : > { %v6404_v41 = vadd.f32 %v3627_v15, %v8795_v42 }
 0x3bc   : > { %v4926_v63 = vadd.f32 %v4925_v11, %v4924_v58  ;;  %v4929_v57 = vadd.f32 %v4608_v40, %v4607_v16  ;;  %v4545_v34 = vmul.f32 %v6402_v26, %v4513_v24  ;;  %v4514_v23 = vmax.f32 %v6403_v9, 0.0 }
 0x3be   : > { %v4927_v62 = vrot.slane %v4926_v63, 1  ;;  %v4577_v3 = vadd.f32 %v4545_v34, %v8818_v39  ;;  %v4546_v18 = vmul.f32 %v6404_v41, %v4514_v23 }
 0x3bf   : > { %v3631_v61 = vpop.f32.mrb[40].mxu0 }
 0x3c0   : > { %v4928_v30 = vadd.f32 %v4927_v62, %v4926_v63  ;;  %v4609_v36 = vmax.f32 %v4577_v3, 0.0  ;;  %v4578_v45 = vadd.f32 %v4546_v18, %v8825_v29  ;;  %v6405_v10 = vadd.f32 %v3631_v61, %v8790_v54  ;;  %v3633_v38 = vpop.f32.mrb[41].mxu0 }
 0x3c1   : > { %v6406_v46 = vadd.f32 %v3633_v38, %v8795_v42  ;;  %v3635_v25 = vpop.f32.mrb[42].mxu0 }
 0x3c2   : > { %v4957_v33 = vmul.f32 0.015625, %v4928_v30  ;;  %v4930_v6 = vadd.f32 %v4929_v57, %v4609_v36  ;;  %v4610_v50 = vmax.f32 %v4578_v45, 0.0  ;;  %v4515_v44 = vmax.f32 %v6405_v10, 0.0  ;;  %v3637_v27 = vpop.f32.mrb[43].mxu0 }
 0x3c3   : > { %v6407_v39 = vadd.f32 %v3635_v25, %v8790_v54  ;;  %v6408_v43 = vadd.f32 %v3637_v27, %v8795_v42 }
 0x3c4   : > { %v4931_v14 = vadd.f32 %v4930_v6, %v4610_v50  ;;  %v4547_v55 = vmul.f32 %v6406_v46, %v4515_v44  ;;  %v8953_v29 = vsel %vm4987_vm1, %v4957_v33, %v4956_v37 }
 0x3c5   : > { %v4516_v52 = vmax.f32 %v6407_v39, 0.0 }
 0x3c6   : > { %v4579_v19 = vadd.f32 %v4547_v55, %v8847_v12 }
 0x3c7   : > { %v4548_v32 = vmul.f32 %v6408_v43, %v4516_v52  ;;  %v3641_v48 = vpop.f32.mrb[44].mxu0 }
 0x3c8   : > { %v4611_v56 = vmax.f32 %v4579_v19, 0.0  ;;  %v6409_v4 = vadd.f32 %v3641_v48, %v8790_v54  ;;  %v3643_v58 = vpop.f32.mrb[45].mxu0 }
 0x3c9   : > { %v4580_v59 = vadd.f32 %v4548_v32, %v8855_v49  ;;  %v6410_v22 = vadd.f32 %v3643_v58, %v8795_v42  ;;  %v3645_v28 = vpop.f32.mrb[46].mxu0 }
 0x3ca   : > { %v4932_v47 = vadd.f32 %v4931_v14, %v4611_v56  ;;  %v4517_v16 = vmax.f32 %v6409_v4, 0.0  ;;  %v6411_v26 = vadd.f32 %v3645_v28, %v8790_v54  ;;  %v3647_v20 = vpop.f32.mrb[47].mxu0 }
 0x3cb   : > { %v4612_v11 = vmax.f32 %v4580_v59, 0.0  ;;  %v6412_v40 = vadd.f32 %v3647_v20, %v8795_v42 }
 0x3cc   : > { %v4549_v12 = vmul.f32 %v6410_v22, %v4517_v16  ;;  %v4518_v24 = vmax.f32 %v6411_v26, 0.0 }
 0x3cd   : > { %v4933_v9 = vadd.f32 %v4932_v47, %v4612_v11 }
 0x3ce   : > { %v4581_v15 = vadd.f32 %v4549_v12, %v8844_v13  ;;  %v4550_v41 = vmul.f32 %v6412_v40, %v4518_v24 }
 0x3cf   : > { %v3651_v63 = vpop.f32.mrb[48].mxu0 }
 0x3d0   : > { %v4613_v57 = vmax.f32 %v4581_v15, 0.0  ;;  %v4582_v49 = vadd.f32 %v4550_v41, %v8851_v2  ;;  %v6413_v34 = vadd.f32 %v3651_v63, %v8790_v54  ;;  %v3653_v23 = vpop.f32.mrb[49].mxu0 }
 0x3d1   : > { %v6414_v31 = vadd.f32 %v3653_v23, %v8795_v42  ;;  %v3655_v62 = vpop.f32.mrb[50].mxu0 }
 0x3d2   : > { %v4934_v3 = vadd.f32 %v4933_v9, %v4613_v57  ;;  %v4614_v18 = vmax.f32 %v4582_v49, 0.0  ;;  %v4519_v61 = vmax.f32 %v6413_v34, 0.0  ;;  %v6415_v30 = vadd.f32 %v3655_v62, %v8790_v54  ;;  %v3657_v36 = vpop.f32.mrb[51].mxu0 }
 0x3d3   : > { %v6416_v45 = vadd.f32 %v3657_v36, %v8795_v42 }
 0x3d4   : > { %v4935_v13 = vadd.f32 %v4934_v3, %v4614_v18  ;;  %v4551_v10 = vmul.f32 %v6414_v31, %v4519_v61  ;;  %v4520_v38 = vmax.f32 %v6415_v30, 0.0 }
 0x3d6   : > { %v4936_v37 = vrot.slane %v4935_v13, 4  ;;  %v4583_v2 = vadd.f32 %v4551_v10, %v8884_v53  ;;  %v4552_v46 = vmul.f32 %v6416_v45, %v4520_v38 }
 0x3d7   : > { %v3661_v25 = vpop.f32.mrb[52].mxu0 }
 0x3d8   : > { %v4937_v33 = vadd.f32 %v4936_v37, %v4935_v13  ;;  %v4584_v6 = vadd.f32 %v4552_v46, %v8891_v60  ;;  %v6417_v50 = vadd.f32 %v3661_v25, %v8790_v54  ;;  %v3663_v44 = vpop.f32.mrb[53].mxu0  ;;  %v4615_v27 = vmax.f32 %v4583_v2, 0.0 }
 0x3d9   : > { %v6418_v39 = vadd.f32 %v3663_v44, %v8795_v42  ;;  %v3665_v43 = vpop.f32.mrb[54].mxu0 }
 0x3da   : > { %v4938_v14 = vrot.slane %v4937_v33, 2  ;;  %v4616_v55 = vmax.f32 %v4584_v6, 0.0  ;;  %v4521_v52 = vmax.f32 %v6417_v50, 0.0  ;;  %v6419_v19 = vadd.f32 %v3665_v43, %v8790_v54  ;;  %v3667_v32 = vpop.f32.mrb[55].mxu0 }
 0x3db   : > { %v6420_v53 = vadd.f32 %v3667_v32, %v8795_v42 }
 0x3dc   : > { %v4939_v48 = vadd.f32 %v4938_v14, %v4937_v33  ;;  %v4942_v56 = vadd.f32 %v4616_v55, %v4615_v27  ;;  %v4553_v4 = vmul.f32 %v6418_v39, %v4521_v52  ;;  %v4522_v58 = vmax.f32 %v6419_v19, 0.0 }
 0x3de   : > { %v4940_v60 = vrot.slane %v4939_v48, 1  ;;  %v4585_v59 = vadd.f32 %v4553_v4, %v8876_v17  ;;  %v4554_v22 = vmul.f32 %v6420_v53, %v4522_v58 }
 0x3df   : > { %v3671_v28 = vpop.f32.mrb[56].mxu0 }
 0x3e0   : > { %v4941_v47 = vadd.f32 %v4940_v60, %v4939_v48  ;;  %v4617_v16 = vmax.f32 %v4585_v59, 0.0  ;;  %v4586_v26 = vadd.f32 %v4554_v22, %v8888_v5  ;;  %v6421_v20 = vadd.f32 %v3671_v28, %v8790_v54  ;;  %v3673_v11 = vpop.f32.mrb[57].mxu0 }
 0x3e1   : > { %v6422_v40 = vadd.f32 %v3673_v11, %v8795_v42  ;;  %v3675_v12 = vpop.f32.mrb[58].mxu0 }
 0x3e2   : > { %v4958_v24 = vmul.f32 0.015625, %v4941_v47  ;;  %v4943_v9 = vadd.f32 %v4942_v56, %v4617_v16  ;;  %v4618_v15 = vmax.f32 %v4586_v26, 0.0  ;;  %v4523_v41 = vmax.f32 %v6421_v20, 0.0  ;;  %v3677_v63 = vpop.f32.mrb[59].mxu0 }
 0x3e3   : > { %v6423_v17 = vadd.f32 %v3675_v12, %v8790_v54  ;;  %v6424_v57 = vadd.f32 %v3677_v63, %v8795_v42 }
 0x3e4   : > { %v4944_v49 = vadd.f32 %v4943_v9, %v4618_v15  ;;  %v4555_v34 = vmul.f32 %v6422_v40, %v4523_v41  ;;  %v4990_v5 = vsel %vm4989_vm2, %v4958_v24, %v8953_v29 }
 0x3e5   : > { %v4524_v23 = vmax.f32 %v6423_v17, 0.0 }
 0x3e6   : > { %v4587_v31 = vadd.f32 %v4555_v34, %v8903_v51 }
 0x3e7   : > { %v4556_v62 = vmul.f32 %v6424_v57, %v4524_v23  ;;  %v3681_v3 = vpop.f32.mrb[60].mxu0 }
 0x3e8   : > { %v4619_v18 = vmax.f32 %v4587_v31, 0.0  ;;  %v6425_v61 = vadd.f32 %v3681_v3, %v8790_v54  ;;  %v3683_v30 = vpop.f32.mrb[61].mxu0 }
 0x3e9   : > { %v4588_v36 = vadd.f32 %v4556_v62, %v8910_v35  ;;  %v6426_v45 = vadd.f32 %v3683_v30, %v8795_v42  ;;  %v3685_v13 = vpop.f32.mrb[62].mxu0 }
 0x3ea   : > { %v4945_v10 = vadd.f32 %v4944_v49, %v4619_v18  ;;  %v4525_v38 = vmax.f32 %v6425_v61, 0.0  ;;  %v6427_v37 = vadd.f32 %v3685_v13, %v8790_v54  ;;  %v3687_v2 = vpop.f32.mrb[63].mxu0  ;;  %v5065_v18 = vld [vmem:[%s9259_s7] sm:$0xff] }
 0x3eb   : > { %v4620_v29 = vmax.f32 %v4588_v36, 0.0  ;;  %v6428_v46 = vadd.f32 %v3687_v2, %v8795_v42  ;;  %v5597_v61 = vld [vmem:[%s9258_s6] ss:$0 sm:$0xff] }
 0x3ec   : > { %v4557_v51 = vmul.f32 %v6426_v45, %v4525_v38  ;;  %v4526_v25 = vmax.f32 %v6427_v37, 0.0 }
 0x3ed   : > { %v4946_v33 = vadd.f32 %v4945_v10, %v4620_v29  ;;  %v5598_v10 = vld [vmem:[%s9260_s8] ss:$0 sm:$0xff] }
 0x3ee   : > { %v4589_v6 = vadd.f32 %v4557_v51, %v8900_v1  ;;  %v4558_v50 = vmul.f32 %v6428_v46, %v4526_v25  ;;  %v5588_v46 = vld [vmem:[%s9256_s4] ss:$0 sm:$0xff] }
 0x3f0   : > { %v4621_v44 = vmax.f32 %v4589_v6, 0.0  ;;  %v4590_v35 = vadd.f32 %v4558_v50, %v8907_v8 }
 0x3f2   : > { %v4947_v27 = vadd.f32 %v4946_v33, %v4621_v44  ;;  %v4622_v39 = vmax.f32 %v4590_v35, 0.0 }
 0x3f4   : > { %v4948_v43 = vadd.f32 %v4947_v27, %v4622_v39  ;;  %v7213_v39 = vmov 1966171168  }
 0x3f6   : > { %v4949_v14 = vrot.slane %v4948_v43, 4 }
 0x3f8   : > { %v4950_v55 = vadd.f32 %v4949_v14, %v4948_v43  ;;  %v5155_v43 = vunpack.c.l.s4 %v7213_v39 }
 0x3fa   : > { %v4951_v52 = vrot.slane %v4950_v55, 2 }
 0x3fc   : > { %v4952_v54 = vadd.f32 %v4951_v52, %v4950_v55 }
 0x3fe   : > { %v4953_v19 = vrot.slane %v4952_v54, 1 }
 0x400   : > { %v4954_v32 = vadd.f32 %v4953_v19, %v4952_v54 }
 0x402   : > { %v4959_v42 = vmul.f32 0.015625, %v4954_v32 }
 0x404   : > { %v4992_v53 = vsel %vm4991_vm3, %v4959_v42, %v4990_v5 }
 0x405   : > { %6334 = vmatmul.mubr.f32.vlgmr.msra.gmra.mrb[64].mxu1 %v4992_v53 }
 0x406   : > { %6338 = vmatprep.mubr.msk.f32.mxu1 %vm7212_vm0, %v8879_v21  ;;  %6337 = vmatpush3.msra.mxu1 %v5065_v18 }
 0x41d   : > { %v6271_v1 = vpop.f32.mrb[32].mxu1 }
 0x41e   : > { %v4744_v48 = vpop.f32.mrb[33].mxu1  ;;  %v9028_v51 = vadd.f32 %v6271_v1, %v5588_v46 }
 0x41f   : > { %v6272_v56 = vpop.f32.mrb[34].mxu1  ;;  %v9030_v25 = vadd.f32 %v5588_v46, %v4744_v48 }
 0x420   : > { %v4747_v8 = vpop.f32.mrb[35].mxu1  ;;  %v9032_v6 = vadd.f32 %v6272_v56, %v5588_v46  ;;  %v4873_v14 = vmax.f32 %v9028_v51, 0.0 }
 0x421   : > { %v9034_v50 = vadd.f32 %v5588_v46, %v4747_v8  ;;  %v4871_v55 = vmax.f32 %v9030_v25, 0.0 }
 0x422   : > { %v4874_v52 = vmax.f32 %v9032_v6, 0.0 }
 0x423   : > { %v4872_v54 = vmax.f32 %v9034_v50, 0.0 }
 0x425   : > { %v6275_v4 = vpop.f32.mrb[36].mxu1 }
 0x426   : > { %v4760_v58 = vpop.f32.mrb[37].mxu1  ;;  %v9036_v35 = vadd.f32 %v6275_v4, %v5588_v46 }
 0x427   : > { %v6276_v60 = vpop.f32.mrb[38].mxu1  ;;  %v9038_v27 = vadd.f32 %v5588_v46, %v4760_v58  ;;  %v5156_v58 = vunpack.c.0.s8 %v5155_v43 }
 0x428   : > { %v4763_v59 = vpop.f32.mrb[39].mxu1  ;;  %v9044_v19 = vadd.f32 %v6276_v60, %v5588_v46  ;;  %v4877_v56 = vmax.f32 %v9036_v35, 0.0 }
 0x429   : > { %v9046_v32 = vadd.f32 %v5588_v46, %v4763_v59  ;;  %v4875_v8 = vmax.f32 %v9038_v27, 0.0 }
 0x42d   : > { %v6279_v22 = vpop.f32.mrb[40].mxu1 }
 0x42e   : > { %v4776_v28 = vpop.f32.mrb[41].mxu1  ;;  %v9048_v42 = vadd.f32 %v6279_v22, %v5588_v46 }
 0x42f   : > { %v6280_v47 = vpop.f32.mrb[42].mxu1  ;;  %v9050_v53 = vadd.f32 %v5588_v46, %v4776_v28  ;;  %v4878_v28 = vmax.f32 %v9044_v19, 0.0 }
 0x430   : > { %v4779_v16 = vpop.f32.mrb[43].mxu1  ;;  %v9052_v1 = vadd.f32 %v6280_v47, %v5588_v46  ;;  %v4876_v47 = vmax.f32 %v9046_v32, 0.0 }
 0x431   : > { %v9054_v48 = vadd.f32 %v5588_v46, %v4779_v16 }
 0x435   : > { %v6283_v26 = vpop.f32.mrb[44].mxu1 }
 0x436   : > { %v4792_v20 = vpop.f32.mrb[45].mxu1  ;;  %v9058_v4 = vadd.f32 %v6283_v26, %v5588_v46  ;;  %v4881_v26 = vmax.f32 %v9048_v42, 0.0 }
 0x437   : > { %v6284_v11 = vpop.f32.mrb[46].mxu1  ;;  %v9060_v18 = vadd.f32 %v5588_v46, %v4792_v20  ;;  %v4882_v20 = vmax.f32 %v9052_v1, 0.0 }
 0x438   : > { %v4795_v40 = vpop.f32.mrb[47].mxu1  ;;  %v9062_v60 = vadd.f32 %v6284_v11, %v5588_v46  ;;  %v4880_v11 = vmax.f32 %v9054_v48, 0.0 }
 0x439   : > { %v9064_v59 = vadd.f32 %v5588_v46, %v4795_v40  ;;  %v4885_v40 = vmax.f32 %v9058_v4, 0.0 }
 0x43d   : > { %v6287_v12 = vpop.f32.mrb[48].mxu1 }
 0x43e   : > { %v4808_v24 = vpop.f32.mrb[49].mxu1  ;;  %v9066_v22 = vadd.f32 %v6287_v12, %v5588_v46 }
 0x43f   : > { %v6288_v9 = vpop.f32.mrb[50].mxu1  ;;  %v9070_v16 = vadd.f32 %v5588_v46, %v4808_v24  ;;  %v5159_v24 = vsub.s32 %v5156_v58, %v9360_v0 }
 0x440   : > { %v8990_v21 = vpop.f32.mrb[51].mxu1 }
 0x441   : > { %v9080_v12 = vadd.f32 %v5588_v46, %v8990_v21 }
 0x445   : > { %v8992_v15 = vpop.f32.mrb[52].mxu1 }
 0x446   : > { %v8994_v41 = vpop.f32.mrb[53].mxu1 }
 0x447   : > { %v8996_v63 = vpop.f32.mrb[54].mxu1  ;;  %v9093_v21 = vadd.f32 %v5588_v46, %v8994_v41  ;;  %v4888_v41 = vmax.f32 %v9080_v12, 0.0 }
 0x448   : > { %v8998_v17 = vpop.f32.mrb[55].mxu1 }
 0x449   : > { %v4891_v19 = vmax.f32 %v9093_v21, 0.0 }
 0x44f   : > { %v9000_v57 = vpop.f32.mrb[56].mxu1 }
 0x450   : > { %v9002_v49 = vpop.f32.mrb[57].mxu1 }
 0x451   : > { %v9004_v34 = vpop.f32.mrb[58].mxu1 }
 0x452   : > { %v9006_v5 = vpop.f32.mrb[59].mxu1 }
 0x457   : > { %v9008_v23 = vpop.f32.mrb[60].mxu1 }
 0x458   : > { %v9010_v31 = vpop.f32.mrb[61].mxu1 }
 0x459   : > { %v9012_v62 = vpop.f32.mrb[62].mxu1 }
 0x45a   : > { %v9014_v3 = vpop.f32.mrb[63].mxu1 }
 0x4d8   : > { %v5060_v30 = vpop.f32.mrb[64].mxu1 }
 0x4d9   : > { %v5061_v36 = vadd.f32 %v5597_v61, %v5060_v30  ;;  %v6335_v45 = vpop.f32.mrb[65].mxu1  ;;  %v9072_v61 = vadd.f32 %v6288_v9, %v5588_v46  ;;  %v4879_v30 = vmax.f32 %v9050_v53, 0.0  ;;  %v4883_v9 = vmax.f32 %v9060_v18, 0.0 }
 0x4da   : > { %v4886_v45 = vmax.f32 %v9062_v60, 0.0 }
 0x4db   : > { %v5064_v13 = vmax.f32 %v5061_v36, 0.0  ;;  %v9083_v36 = vadd.f32 %v8992_v15, %v5588_v46  ;;  %v9096_v15 = vadd.f32 %v8996_v63, %v5588_v46  ;;  %v9113_v63 = vadd.f32 %v5588_v46, %v9006_v5 }
 0x4dd   : > { %6339 = vmatmul.mubr.msk.f32.vlgmr.msra.gmra.mrb[66].mxu1 %vm5073_vm4, %v5064_v13  ;;  %v4884_v13 = vmax.f32 %v9064_v59, 0.0  ;;  %v4893_v39 = vmax.f32 %v9083_v36, 0.0  ;;  %v4894_v32 = vmax.f32 %v9096_v15, 0.0 }
 0x5b0   : > { %v5143_v38 = vpop.f32.mrb[66].mxu1 }
 0x5b1   : > { %v5144_v37 = vadd.f32 %v5598_v10, %v5143_v38  ;;  %v6340_v2 = vpop.f32.mrb[67].mxu1  ;;  %v4889_v10 = vmax.f32 %v9066_v22, 0.0  ;;  %v4887_v38 = vmax.f32 %v9070_v16, 0.0 }
 0x5b2   : > { %v9099_v2 = vadd.f32 %v5588_v46, %v8998_v17  ;;  %v9116_v17 = vadd.f32 %v9008_v23, %v5588_v46 }
 0x5b3   : > { %v5600_v29 = vmul.f32 -1.442695, %v5144_v37  ;;  %v4890_v37 = vmax.f32 %v9072_v61, 0.0 }
 0x5b4   : > { %v4892_v53 = vmax.f32 %v9099_v2, 0.0  ;;  %v4901_v58 = vmax.f32 %v9116_v17, 0.0 }
 0x5b5   : > { %7061 = vpow2.f32 %v5600_v29  ;;  %v9102_v29 = vadd.f32 %v9000_v57, %v5588_v46  ;;  %v9119_v57 = vadd.f32 %v5588_v46, %v9010_v31 }
 0x5b7   : > { %v4897_v23 = vmax.f32 %v9102_v29, 0.0  ;;  %v4899_v18 = vmax.f32 %v9119_v57, 0.0 }
 0x5bf   : > { %v7062_v33 = vpop.eup %7061 }
 0x5c0   : > { %v5150_v44 = vadd.f32 1.0, %v7062_v33  ;;  %v9105_v33 = vadd.f32 %v5588_v46, %v9002_v49  ;;  %v9122_v49 = vadd.f32 %v9012_v62, %v5588_v46  ;;  %v4896_v62 = vmax.f32 %v9113_v63, 0.0 }
 0x5c2   : > { %7063 = vrcp.f32 %v5150_v44  ;;  %v9108_v44 = vadd.f32 %v9004_v34, %v5588_v46  ;;  %v9125_v34 = vadd.f32 %v5588_v46, %v9014_v3  ;;  %v4895_v31 = vmax.f32 %v9105_v33, 0.0 }
 0x5c3   : > { %v4902_v60 = vmax.f32 %v9122_v49, 0.0 }
 0x5c4   : > { %v4898_v1 = vmax.f32 %v9108_v44, 0.0  ;;  %v4900_v59 = vmax.f32 %v9125_v34, 0.0 }
 0x5cc   : > { %v7064_v0 = vpop.eup %7063 }
 0x5cd   : > { %v5160_v43 = vrot.slane %v7064_v0, %v5159_v24 }
 0x5cf   : > { %v5161_v5 = vcombine.high %v5160_v43, %v5160_v43  ;;  %v5168_v42 = vrot.slane %v5160_v43, %v5159_v24 }
 0x5d1   : > { %v5175_v48 = vrot.slane %v5161_v5, %v5159_v24  ;;  %v5176_v3 = vcombine.high %v5168_v42, %v5168_v42  ;;  %v5181_v46 = vrot.slane %v5168_v42, %v8779_v7 }
 0x5d3   : > { %v5177_v12 = vcombine.high %v5175_v48, %v5175_v48  ;;  %v5185_v21 = vrot.slane %v5175_v48, %v8779_v7  ;;  %v5189_v15 = vrot.slane %v5176_v3, %v8779_v7  ;;  %v5198_v0 = vmul.f32 %v5181_v46, %v4871_v55 }
 0x5d4   : > { %v5199_v24 = vmul.f32 %v5181_v46, %v4872_v54  ;;  %v5200_v2 = vmul.f32 %v5181_v46, %v4873_v14  ;;  %v5201_v29 = vmul.f32 %v5181_v46, %v4874_v52  ;;  %v5202_v33 = vmul.f32 %v5181_v46, %v4875_v8 }
 0x5d5   : > { %v5193_v44 = vrot.slane %v5177_v12, %v8779_v7  ;;  %v5203_v63 = vmul.f32 %v5181_v46, %v4876_v47  ;;  %v5204_v43 = vmul.f32 %v5181_v46, %v4877_v56  ;;  %v5205_v25 = vmul.f32 %v5181_v46, %v4878_v28  ;;  %5230 = vst [vmem:[%s9155_s27] sm:$0xff] %v5198_v0 }
 0x5d6   : > { %v5206_v51 = vmul.f32 %v5185_v21, %v4879_v30  ;;  %v5207_v7 = vmul.f32 %v5185_v21, %v4880_v11  ;;  %v5208_v6 = vmul.f32 %v5185_v21, %v4881_v26  ;;  %v5209_v50 = vmul.f32 %v5185_v21, %v4882_v20  ;;  %5231 = vst [vmem:[%s9155_s27 + $0x8] sm:$0xff] %v5199_v24 }
 0x5d7   : > { %5232 = vst [vmem:[%s9155_s27 + $0x10] sm:$0xff] %v5200_v2  ;;  %5233 = vst [vmem:[%s9155_s27 + $0x18] sm:$0xff] %v5201_v29  ;;  %v5210_v35 = vmul.f32 %v5185_v21, %v4883_v9  ;;  %v5211_v27 = vmul.f32 %v5185_v21, %v4884_v13  ;;  %v5212_v14 = vmul.f32 %v5185_v21, %v4885_v40 }
 0x5d8   : > { %5234 = vst [vmem:[%s9155_s27 + $0x20] sm:$0xff] %v5202_v33  ;;  %v5213_v55 = vmul.f32 %v5185_v21, %v4886_v45  ;;  %5235 = vst [vmem:[%s9155_s27 + $0x28] sm:$0xff] %v5203_v63  ;;  %v5214_v52 = vmul.f32 %v5189_v15, %v4887_v38  ;;  %v5215_v54 = vmul.f32 %v5189_v15, %v4888_v41 }
 0x5d9   : > { %5236 = vst [vmem:[%s9155_s27 + $0x30] sm:$0xff] %v5204_v43  ;;  %5237 = vst [vmem:[%s9155_s27 + $0x38] sm:$0xff] %v5205_v25  ;;  %v5216_v56 = vmul.f32 %v5189_v15, %v4889_v10  ;;  %v5217_v8 = vmul.f32 %v5189_v15, %v4890_v37  ;;  %v5218_v4 = vmul.f32 %v5189_v15, %v4891_v19 }
 0x5da   : > { %5238 = vst [vmem:[%s9155_s27 + $0x40] sm:$0xff] %v5206_v51  ;;  %5239 = vst [vmem:[%s9155_s27 + $0x48] sm:$0xff] %v5207_v7  ;;  %v5219_v28 = vmul.f32 %v5189_v15, %v4892_v53  ;;  %v5220_v47 = vmul.f32 %v5189_v15, %v4893_v39  ;;  %v5221_v16 = vmul.f32 %v5189_v15, %v4894_v32 }
 0x5db   : > { %5240 = vst [vmem:[%s9155_s27 + $0x50] sm:$0xff] %v5208_v6  ;;  %5241 = vst [vmem:[%s9155_s27 + $0x58] sm:$0xff] %v5209_v50  ;;  %v5222_v22 = vmul.f32 %v5193_v44, %v4895_v31  ;;  %v5223_v61 = vmul.f32 %v5193_v44, %v4896_v62  ;;  %v5224_v26 = vmul.f32 %v5193_v44, %v4897_v23 }
 0x5dc   : > { %5242 = vst [vmem:[%s9155_s27 + $0x60] sm:$0xff] %v5210_v35  ;;  %5243 = vst [vmem:[%s9155_s27 + $0x68] sm:$0xff] %v5211_v27  ;;  %v5225_v30 = vmul.f32 %v5193_v44, %v4898_v1  ;;  %v5226_v20 = vmul.f32 %v5193_v44, %v4899_v18  ;;  %v5227_v11 = vmul.f32 %v5193_v44, %v4900_v59 }
 0x5dd   : > { %5244 = vst [vmem:[%s9155_s27 + $0x70] sm:$0xff] %v5212_v14  ;;  %5245 = vst [vmem:[%s9155_s27 + $0x78] sm:$0xff] %v5213_v55  ;;  %v5228_v40 = vmul.f32 %v5193_v44, %v4901_v58  ;;  %v5229_v36 = vmul.f32 %v5193_v44, %v4902_v60 }
 0x5de   : > { %5246 = vst [vmem:[%s9155_s27 + $0x80] sm:$0xff] %v5214_v52  ;;  %5247 = vst [vmem:[%s9155_s27 + $0x88] sm:$0xff] %v5215_v54 }
 0x5df   : > { %5248 = vst [vmem:[%s9155_s27 + $0x90] sm:$0xff] %v5216_v56  ;;  %5249 = vst [vmem:[%s9155_s27 + $0x98] sm:$0xff] %v5217_v8 }
 0x5e0   : > { %5250 = vst [vmem:[%s9155_s27 + $0xa0] sm:$0xff] %v5218_v4  ;;  %5251 = vst [vmem:[%s9155_s27 + $0xa8] sm:$0xff] %v5219_v28 }
 0x5e1   : > { %5252 = vst [vmem:[%s9155_s27 + $0xb0] sm:$0xff] %v5220_v47  ;;  %5253 = vst [vmem:[%s9155_s27 + $0xb8] sm:$0xff] %v5221_v16 }
 0x5e2   : > { %5254 = vst [vmem:[%s9155_s27 + $0xc0] sm:$0xff] %v5222_v22  ;;  %5255 = vst [vmem:[%s9155_s27 + $0xc8] sm:$0xff] %v5223_v61 }
 0x5e3   : > { %5256 = vst [vmem:[%s9155_s27 + $0xd0] sm:$0xff] %v5224_v26  ;;  %5257 = vst [vmem:[%s9155_s27 + $0xd8] sm:$0xff] %v5225_v30 }
 0x5e4   : > { %5258 = vst [vmem:[%s9155_s27 + $0xe0] sm:$0xff] %v5226_v20  ;;  %5259 = vst [vmem:[%s9155_s27 + $0xe8] sm:$0xff] %v5227_v11 }
 0x5e5   : > { %5260 = vst [vmem:[%s9155_s27 + $0xf0] sm:$0xff] %v5228_v40  ;;  %5261 = vst [vmem:[%s9155_s27 + $0xf8] sm:$0xff] %v5229_v36 }
 0x5e6   : > { %7144 = shalt.err (!%p7141_p7)
}
 0x5e7   : > { %s7145_s16 = scalar_lea.hbm %s9192_s15, 4096  ;;  %s7149_s27 = scalar_lea.hbm %s9261_s9, 8192 }
 0x5e8   : > { %p7146_p9 = scmp.ne.s32.totalorder %s9192_s15, %s7145_s16  ;;  %p7150_p5 = scmp.lt.u32.totalorder %s9192_s15, %s9261_s9 }
 0x5e9   : > { %p7151_p11 = scmp.lt.u32.totalorder %s7149_s27, %s7145_s16  ;;  %p7153_p4 = scmp.lt.u32.totalorder %s7145_s16, %s9192_s15 }
 0x5ea   : > { %p7147_p2 = pnand %p7146_p9, %p7358_p12 }
 0x5eb   : > { %p7152_p1 = por %p7151_p11, %p7150_p5 }
 0x5ec   : > { %p7148_p0 = pneg %p7147_p2 }
 0x5ed   : > { %p7154_p6 = por %p7153_p4, %p7152_p1 }
 0x5ef   : > { %p7155_p8 = pnand %p7154_p6, %p7148_p0 }
 0x5f1   : > { %7158 = shalt.err (!%p7155_p8)
}
 0x5f2   : > { %s7215_s19 = smov 128   ;;  %s7216_s26 = smov 8  }
 0x5f3   : > { %6691 = dma.vmem_to_hbm [thread:$0]  (%p7358_p12), %s9194_s14, 4096, %s9192_s15, %s5263_s17, %s7215_s19, %s7215_s19, %s7216_s26  }
 0x5f4 PF: > { %s9366_s22 = sld [smem:[#allocation13_spill]]  ;;  %s5292_s23 = sand.u32 1, %s7189_s30  }
 0x5f5   : > { %p9368_p13 = scmp.ge.s32.totalorder %s7201_s12, 2  ;;  %s5293_s24 = scalar_lea.sflag [#allocation6], %s5292_s23 }
 0x5fa   : > { %p9367_p10 = scmp.ne.s32.totalorder %s9366_s22, 0 }
 0x5fc   : > { %p6702_p3 = pnand %p9368_p13, %p9367_p10 }
 0x5fe   : > { %7184 = dma.done.wait (!%p6702_p3), %s5293_s24, 4096  }
 0x5ff   : > { %7186 = vsyncadd (!%p6702_p3), %s5293_s24, 4294963200  ;;  %s9369_s12 = sld [smem:[#allocation14_spill]]  ;;  %s9370_s30 = smov %s7193_s10 }
 0x600   : > { %s9371_s10 = smov %s7197_s11  ;;  %s9372_s11 = smov %s7354_s28 }
 0x605   : > { %p23_p7 = scmp.ge.s32.totalorder %s9369_s12, 4  }
 0x607   :  { %25 = sbr.rel (!%p23_p7) target bundleno = 6 (0x6), region = 107 }
 0x60e   :  { %5298 = vsyncpa [#allocation5], 1 }
 0x60f   :  { %5300 = vsyncpa [#allocation5 + $0x1], 1 }
 0x610   :  { %5301 = vsyncpa [#allocation8], 1 }
 0x611   :  { %5302 = vsyncpa [#allocation6], 1 }
 0x612   :  { %5304 = vsyncpa [#allocation6 + $0x1], 1 }

</bundles_post_ra>
